<compile_context>
chip_gen: v5e
topology: v5e:2x2
jax: 0.10.0
libtpu: 0.0.40
codegen_flags: <defaults>
</compile_context>

<pallas_src>
import functools
import math

import jax
import jax.numpy as jnp
from jax import lax
from jax.experimental import pallas as pl
from jax.experimental.pallas import tpu as pltpu


def _attn_kernel(xq_ref, xkv_ref, wq_ref, bq_ref, wk_ref, bk_ref,
                 wv_ref, bv_ref, o_ref, *, scale):
    # Block views (leading batch dim squeezed away by the BlockSpecs):
    #   xq_ref : (tq,  d)  f32   query-row tile of x for this batch element
    #   xkv_ref: (seq, d)  f32   full sequence of x for this batch element
    #   w*_ref : (d,   d)  bf16  pre-transposed projection weights (in, out)
    #   b*_ref : (1,   d)  f32
    #   o_ref  : (tq,  d)  f32
    xq = xq_ref[...].astype(jnp.bfloat16)
    xkv = xkv_ref[...].astype(jnp.bfloat16)

    # Projections: bf16 operands on the MXU, f32 accumulation, f32 bias add.
    q = jnp.dot(xq, wq_ref[...], preferred_element_type=jnp.float32) + bq_ref[...]
    k = jnp.dot(xkv, wk_ref[...], preferred_element_type=jnp.float32) + bk_ref[...]
    v = jnp.dot(xkv, wv_ref[...], preferred_element_type=jnp.float32) + bv_ref[...]

    # Scores: Q @ K^T / sqrt(d) — contract the feature dim directly (no
    # explicit transpose op needed).
    s = lax.dot_general(
        q.astype(jnp.bfloat16), k.astype(jnp.bfloat16),
        (((1,), (1,)), ((), ())),
        preferred_element_type=jnp.float32) * scale

    # Numerically-stable softmax over keys, in f32.
    m = jnp.max(s, axis=-1, keepdims=True)
    p = jnp.exp(s - m)
    p = p / jnp.sum(p, axis=-1, keepdims=True)

    # Attention output: P @ V (bf16 operands, f32 accumulate).
    z = jnp.dot(p.astype(jnp.bfloat16), v.astype(jnp.bfloat16),
                preferred_element_type=jnp.float32)
    o_ref[...] = z.astype(o_ref.dtype)


@functools.partial(jax.jit, static_argnames=("tq",))
def self_attention(x, wq, bq, wk, bk, wv, bv, *, tq=None):
    """x: (batch, seq, d); w*: (d, d) pre-transposed (in, out); b*: (1, d)."""
    batch, seq, d = x.shape
    scale = 1.0 / math.sqrt(d)  # matches np.sqrt(embed_dim) in the PyTorch module

    # Query-row tile: as large as possible (fills the MXU, amortizes the
    # ~0.35us per-grid-step overhead), capped at 256 to bound VMEM on v7x.
    if tq is None:
        tq = seq if seq <= 256 else 256
    assert seq % tq == 0, "seq must be divisible by the query tile"
    assert d % 128 == 0, "embed_dim must be a multiple of 128"

    # Store/feed weights in bf16 (halves weight DMA, peak MXU throughput);
    # biases stay f32 for the f32 epilogue.
    wq_bf, wk_bf, wv_bf = (w.astype(jnp.bfloat16) for w in (wq, wk, wv))
    bq32, bk32, bv32 = (b.astype(jnp.float32) for b in (bq, bk, bv))

    kernel = functools.partial(_attn_kernel, scale=scale)

    # Explicit VMEM budget: double-buffered input/output blocks + headroom for
    # in-kernel intermediates, clamped to v7x's 64 MiB per-TC VMEM.
    itm = jnp.dtype(x.dtype).itemsize
    block_bytes = (tq * d * itm + seq * d * itm       # xq tile, xkv tile
                   + 3 * d * d * 2 + 3 * d * 4        # bf16 weights, f32 biases
                   + tq * d * itm)                    # output tile
    vmem_limit = int(min(2 * block_bytes + (16 << 20), 64 << 20))

    cost = pl.CostEstimate(
        flops=batch * (3 * 2 * seq * d * d + 2 * 2 * seq * seq * d),
        transcendentals=batch * seq * seq,
        bytes_accessed=int(3 * batch * seq * d * itm + 3 * d * d * 2 + 3 * d * 4),
    )

    out = pl.pallas_call(
        kernel,
        out_shape=jax.ShapeDtypeStruct((batch, seq, d), x.dtype),
        grid_spec=pltpu.PrefetchScalarGridSpec(
            num_scalar_prefetch=0,
            grid=(batch, seq // tq),
            in_specs=[
                pl.BlockSpec((None, tq, d), lambda b, i: (b, i, 0)),   # x (query rows)
                pl.BlockSpec((None, seq, d), lambda b, i: (b, 0, 0)),  # x (keys/values)
                pl.BlockSpec((d, d), lambda b, i: (0, 0)),             # Wq (full, resident)
                pl.BlockSpec((1, d), lambda b, i: (0, 0)),             # bq
                pl.BlockSpec((d, d), lambda b, i: (0, 0)),             # Wk
                pl.BlockSpec((1, d), lambda b, i: (0, 0)),             # bk
                pl.BlockSpec((d, d), lambda b, i: (0, 0)),             # Wv
                pl.BlockSpec((1, d), lambda b, i: (0, 0)),             # bv
            ],
            out_specs=pl.BlockSpec((None, tq, d), lambda b, i: (b, i, 0)),
        ),
        compiler_params=pltpu.CompilerParams(
            # Both axes independent -> megacore / 2-TC sharding on v7x.
            dimension_semantics=("parallel", "parallel"),
            vmem_limit_bytes=vmem_limit,
        ),
        cost_estimate=cost,
    )(x, x, wq_bf, bq32, wk_bf, bk32, wv_bf, bv32)

    return out


def _ref_attention(x, wq, bq, wk, bk, wv, bv):
    """Pure-JAX reference mirroring the kernel's bf16-operand / f32-accumulate math."""
    d = x.shape[-1]
    scale = 1.0 / math.sqrt(d)
    xb = x.astype(jnp.bfloat16)

    def lin(w, b):
        return jnp.dot(xb, w.astype(jnp.bfloat16),
                       preferred_element_type=jnp.float32) + b.astype(jnp.float32)

    q, k, v = lin(wq, bq), lin(wk, bk), lin(wv, bv)
    s = jnp.einsum("bqd,bkd->bqk", q.astype(jnp.bfloat16), k.astype(jnp.bfloat16),
                   preferred_element_type=jnp.float32) * scale
    p = jax.nn.softmax(s, axis=-1)
    z = jnp.einsum("bqk,bkd->bqd", p.astype(jnp.bfloat16), v.astype(jnp.bfloat16),
                   preferred_element_type=jnp.float32)
    return z


def init_params(key, dim, dtype=jnp.float32):
    # Mimic nn.Linear init: U(-1/sqrt(fan_in), 1/sqrt(fan_in)) for weight & bias.
    ks = jax.random.split(key, 6)
    bound = 1.0 / math.sqrt(dim)

    def lin(kw, kb):
        # Stored pre-transposed: (in_features, out_features).
        w = jax.random.uniform(kw, (dim, dim), dtype, -bound, bound)
        b = jax.random.uniform(kb, (1, dim), dtype, -bound, bound)
        return w, b

    wq, bq = lin(ks[0], ks[1])
    wk, bk = lin(ks[2], ks[3])
    wv, bv = lin(ks[4], ks[5])
    return wq, bq, wk, bk, wv, bv


if __name__ == "__main__":
    # Small shapes consistent with the module: batch=2, seq=8, embed_dim=512.
    batch, seq, dim = 2, 8, 512

    key = jax.random.PRNGKey(0)
    kx, kp = jax.random.split(key)
    x = jax.random.normal(kx, (batch, seq, dim), jnp.float32)
    params = init_params(kp, dim)

    out = self_attention(x, *params)
    out = jax.block_until_ready(out)

    ref = _ref_attention(x, *params)
    assert out.shape == x.shape
    assert jnp.allclose(out, ref, atol=2e-3, rtol=2e-3), (
        "max abs err = %f" % float(jnp.max(jnp.abs(out - ref))))

    print("KERNEL_OK")
</pallas_src>

<mosaic_0001>
module attributes {stable_mosaic.version = 11 : i64} {
  func.func @_attn_kernel(%arg0: i32, %arg1: i32, %arg2: memref<1x8x512xf32, #tpu.memory_space<vmem>>, %arg3: memref<1x8x512xf32, #tpu.memory_space<vmem>>, %arg4: memref<512x512xbf16, #tpu.memory_space<vmem>>, %arg5: memref<1x512xf32, #tpu.memory_space<vmem>>, %arg6: memref<512x512xbf16, #tpu.memory_space<vmem>>, %arg7: memref<1x512xf32, #tpu.memory_space<vmem>>, %arg8: memref<512x512xbf16, #tpu.memory_space<vmem>>, %arg9: memref<1x512xf32, #tpu.memory_space<vmem>>, %arg10: memref<1x8x512xf32, #tpu.memory_space<vmem>>) attributes {dimension_semantics = [#tpu.dimension_semantics<parallel>, #tpu.dimension_semantics<parallel>], iteration_bounds = array<i64: 2, 1>, scalar_prefetch = 0 : i64, scratch_operands = 0 : i64, tpu.core_type = #tpu.core_type<tc>, window_params = [{transform_indices = @transform_0, window_bounds = array<i64: 1, 8, 512>}, {transform_indices = @transform_1, window_bounds = array<i64: 1, 8, 512>}, {pipeline_mode = #tpu.pipeline_mode<synchronous>, transform_indices = @transform_2, window_bounds = array<i64: 512, 512>}, {pipeline_mode = #tpu.pipeline_mode<synchronous>, transform_indices = @transform_3, window_bounds = array<i64: 1, 512>}, {pipeline_mode = #tpu.pipeline_mode<synchronous>, transform_indices = @transform_4, window_bounds = array<i64: 512, 512>}, {pipeline_mode = #tpu.pipeline_mode<synchronous>, transform_indices = @transform_5, window_bounds = array<i64: 1, 512>}, {pipeline_mode = #tpu.pipeline_mode<synchronous>, transform_indices = @transform_6, window_bounds = array<i64: 512, 512>}, {pipeline_mode = #tpu.pipeline_mode<synchronous>, transform_indices = @transform_7, window_bounds = array<i64: 1, 512>}, {transform_indices = @transform_8, window_bounds = array<i64: 1, 8, 512>}]} {
    %c0 = arith.constant 0 : index
    %c0_0 = arith.constant 0 : index
    %c0_1 = arith.constant 0 : index
    %0 = vector.load %arg2[%c0, %c0_0, %c0_1] : memref<1x8x512xf32, #tpu.memory_space<vmem>>, vector<1x8x512xf32>
    %1 = vector.shape_cast %0 : vector<1x8x512xf32> to vector<8x512xf32>
    %2 = arith.truncf %1 : vector<8x512xf32> to vector<8x512xbf16>
    %c0_2 = arith.constant 0 : index
    %c0_3 = arith.constant 0 : index
    %c0_4 = arith.constant 0 : index
    %3 = vector.load %arg3[%c0_2, %c0_3, %c0_4] : memref<1x8x512xf32, #tpu.memory_space<vmem>>, vector<1x8x512xf32>
    %4 = vector.shape_cast %3 : vector<1x8x512xf32> to vector<8x512xf32>
    %5 = arith.truncf %4 : vector<8x512xf32> to vector<8x512xbf16>
    %c0_5 = arith.constant 0 : index
    %c0_6 = arith.constant 0 : index
    %6 = vector.load %arg4[%c0_5, %c0_6] : memref<512x512xbf16, #tpu.memory_space<vmem>>, vector<512x512xbf16>
    %cst = arith.constant dense<0.000000e+00> : vector<8x512xf32>
    %7 = tpu.matmul %2, %6, %cst {dimension_numbers = #tpu.dot_dimension_numbers<[1], [0], [0], [1], [0, 0, 1, 1], [], []>} : vector<8x512xbf16>, vector<512x512xbf16>, vector<8x512xf32> -> vector<8x512xf32>
    %c0_7 = arith.constant 0 : index
    %c0_8 = arith.constant 0 : index
    %8 = vector.load %arg5[%c0_7, %c0_8] : memref<1x512xf32, #tpu.memory_space<vmem>>, vector<1x512xf32>
    %9 = vector.broadcast %8 : vector<1x512xf32> to vector<8x512xf32>
    %10 = arith.addf %7, %9 : vector<8x512xf32>
    %c0_9 = arith.constant 0 : index
    %c0_10 = arith.constant 0 : index
    %11 = vector.load %arg6[%c0_9, %c0_10] : memref<512x512xbf16, #tpu.memory_space<vmem>>, vector<512x512xbf16>
    %cst_11 = arith.constant dense<0.000000e+00> : vector<8x512xf32>
    %12 = tpu.matmul %5, %11, %cst_11 {dimension_numbers = #tpu.dot_dimension_numbers<[1], [0], [0], [1], [0, 0, 1, 1], [], []>} : vector<8x512xbf16>, vector<512x512xbf16>, vector<8x512xf32> -> vector<8x512xf32>
    %c0_12 = arith.constant 0 : index
    %c0_13 = arith.constant 0 : index
    %13 = vector.load %arg7[%c0_12, %c0_13] : memref<1x512xf32, #tpu.memory_space<vmem>>, vector<1x512xf32>
    %14 = vector.broadcast %13 : vector<1x512xf32> to vector<8x512xf32>
    %15 = arith.addf %12, %14 : vector<8x512xf32>
    %c0_14 = arith.constant 0 : index
    %c0_15 = arith.constant 0 : index
    %16 = vector.load %arg8[%c0_14, %c0_15] : memref<512x512xbf16, #tpu.memory_space<vmem>>, vector<512x512xbf16>
    %cst_16 = arith.constant dense<0.000000e+00> : vector<8x512xf32>
    %17 = tpu.matmul %5, %16, %cst_16 {dimension_numbers = #tpu.dot_dimension_numbers<[1], [0], [0], [1], [0, 0, 1, 1], [], []>} : vector<8x512xbf16>, vector<512x512xbf16>, vector<8x512xf32> -> vector<8x512xf32>
    %c0_17 = arith.constant 0 : index
    %c0_18 = arith.constant 0 : index
    %18 = vector.load %arg9[%c0_17, %c0_18] : memref<1x512xf32, #tpu.memory_space<vmem>>, vector<1x512xf32>
    %19 = vector.broadcast %18 : vector<1x512xf32> to vector<8x512xf32>
    %20 = arith.addf %17, %19 : vector<8x512xf32>
    %21 = arith.truncf %10 : vector<8x512xf32> to vector<8x512xbf16>
    %22 = arith.truncf %15 : vector<8x512xf32> to vector<8x512xbf16>
    %cst_19 = arith.constant dense<0.000000e+00> : vector<8x8xf32>
    %23 = tpu.matmul %21, %22, %cst_19 {dimension_numbers = #tpu.dot_dimension_numbers<[1], [1], [0], [0], [0, 0, 1, 0], [], []>} : vector<8x512xbf16>, vector<8x512xbf16>, vector<8x8xf32> -> vector<8x8xf32>
    %cst_20 = arith.constant 0.0441941731 : f32
    %24 = vector.broadcast %cst_20 : f32 to vector<8x8xf32>
    %25 = arith.mulf %23, %24 : vector<8x8xf32>
    %cst_21 = arith.constant dense<0xFF800000> : vector<8xf32>
    %26 = vector.multi_reduction <maximumf>, %25, %cst_21 [1] : vector<8x8xf32> to vector<8xf32>
    %27 = vector.shape_cast %26 : vector<8xf32> to vector<8x1xf32>
    %28 = vector.broadcast %27 : vector<8x1xf32> to vector<8x8xf32>
    %29 = arith.subf %25, %28 : vector<8x8xf32>
    %30 = math.exp %29 : vector<8x8xf32>
    %cst_22 = arith.constant dense<0.000000e+00> : vector<8xf32>
    %31 = vector.multi_reduction <add>, %30, %cst_22 [1] : vector<8x8xf32> to vector<8xf32>
    %32 = vector.shape_cast %31 : vector<8xf32> to vector<8x1xf32>
    %33 = vector.broadcast %32 : vector<8x1xf32> to vector<8x8xf32>
    %34 = arith.divf %30, %33 : vector<8x8xf32>
    %35 = arith.truncf %34 : vector<8x8xf32> to vector<8x8xbf16>
    %36 = arith.truncf %20 : vector<8x512xf32> to vector<8x512xbf16>
    %cst_23 = arith.constant dense<0.000000e+00> : vector<8x512xf32>
    %37 = tpu.matmul %35, %36, %cst_23 {dimension_numbers = #tpu.dot_dimension_numbers<[1], [0], [0], [1], [0, 0, 1, 1], [], []>} : vector<8x8xbf16>, vector<8x512xbf16>, vector<8x512xf32> -> vector<8x512xf32>
    %c0_24 = arith.constant 0 : index
    %c0_25 = arith.constant 0 : index
    %c0_26 = arith.constant 0 : index
    %38 = vector.load %arg10[%c0_24, %c0_25, %c0_26] : memref<1x8x512xf32, #tpu.memory_space<vmem>>, vector<1x8x512xf32>
    %39 = vector.shape_cast %38 : vector<1x8x512xf32> to vector<8x512xf32>
    %40 = vector.shape_cast %37 : vector<8x512xf32> to vector<1x8x512xf32>
    tpu.vector_store %arg10[%c0_24, %c0_25, %c0_26], %40 {strides = array<i32>} : memref<1x8x512xf32, #tpu.memory_space<vmem>>, vector<1x8x512xf32>,
    return
  }
  func.func @transform_0(%arg0: i32, %arg1: i32) -> (i32, i32, i32) {
    %c0_i32 = arith.constant 0 : i32
    %c0_i32_0 = arith.constant 0 : i32
    return %arg0, %arg1, %c0_i32 : i32, i32, i32
  }
  func.func @transform_1(%arg0: i32, %arg1: i32) -> (i32, i32, i32) {
    %c0_i32 = arith.constant 0 : i32
    %c0_i32_0 = arith.constant 0 : i32
    %c0_i32_1 = arith.constant 0 : i32
    return %arg0, %c0_i32, %c0_i32_0 : i32, i32, i32
  }
  func.func @transform_2(%arg0: i32, %arg1: i32) -> (i32, i32) {
    %c0_i32 = arith.constant 0 : i32
    %c0_i32_0 = arith.constant 0 : i32
    %c0_i32_1 = arith.constant 0 : i32
    return %c0_i32, %c0_i32_0 : i32, i32
  }
  func.func @transform_3(%arg0: i32, %arg1: i32) -> (i32, i32) {
    %c0_i32 = arith.constant 0 : i32
    %c0_i32_0 = arith.constant 0 : i32
    %c0_i32_1 = arith.constant 0 : i32
    return %c0_i32, %c0_i32_0 : i32, i32
  }
  func.func @transform_4(%arg0: i32, %arg1: i32) -> (i32, i32) {
    %c0_i32 = arith.constant 0 : i32
    %c0_i32_0 = arith.constant 0 : i32
    %c0_i32_1 = arith.constant 0 : i32
    return %c0_i32, %c0_i32_0 : i32, i32
  }
  func.func @transform_5(%arg0: i32, %arg1: i32) -> (i32, i32) {
    %c0_i32 = arith.constant 0 : i32
    %c0_i32_0 = arith.constant 0 : i32
    %c0_i32_1 = arith.constant 0 : i32
    return %c0_i32, %c0_i32_0 : i32, i32
  }
  func.func @transform_6(%arg0: i32, %arg1: i32) -> (i32, i32) {
    %c0_i32 = arith.constant 0 : i32
    %c0_i32_0 = arith.constant 0 : i32
    %c0_i32_1 = arith.constant 0 : i32
    return %c0_i32, %c0_i32_0 : i32, i32
  }
  func.func @transform_7(%arg0: i32, %arg1: i32) -> (i32, i32) {
    %c0_i32 = arith.constant 0 : i32
    %c0_i32_0 = arith.constant 0 : i32
    %c0_i32_1 = arith.constant 0 : i32
    return %c0_i32, %c0_i32_0 : i32, i32
  }
  func.func @transform_8(%arg0: i32, %arg1: i32) -> (i32, i32, i32) {
    %c0_i32 = arith.constant 0 : i32
    %c0_i32_0 = arith.constant 0 : i32
    return %arg0, %arg1, %c0_i32 : i32, i32, i32
  }
}

</mosaic_0001>

<bundles_post_ra>
// kernel: self_attention.1
= control target key start
LH: loop header
LB: loop body
LE: loop exit
PB: predicated region body
PF: predicated region fallthrough
CT: control target
= control target key end

     0   :  { %13 = vsyncpa [#allocation3], 0  ;;  %s8264_s0 = inlined_call_operand.vmem [shape: f32[2,8,512], index: 0, kind: input, shape index: {}, may-alias: {0,1}]   ;;  %s8265_s1 = inlined_call_operand.vmem [shape: f32[2,8,512], index: 1, kind: input, shape index: {}, may-alias: {0,1}]   ;;  %s8266_s2 = inlined_call_operand.vmem [shape: bf16[512,512], index: 2, kind: input, shape index: {}]   ;;  %s8267_s3 = inlined_call_operand.vmem [shape: f32[1,512], index: 3, kind: input, shape index: {}]   ;;  %s8268_s4 = inlined_call_operand.vmem [shape: bf16[512,512], index: 4, kind: input, shape index: {}]   ;;  %s8269_s5 = inlined_call_operand.vmem [shape: f32[1,512], index: 5, kind: input, shape index: {}]   ;;  %s8270_s6 = inlined_call_operand.vmem [shape: bf16[512,512], index: 6, kind: input, shape index: {}]   ;;  %s8271_s7 = inlined_call_operand.vmem [shape: f32[1,512], index: 7, kind: input, shape index: {}]   ;;  %s8272_s8 = inlined_call_operand.hbm [shape: f32[2,8,512], index: 8, kind: output, shape index: {}]  }
   0x1   :  { %15 = vsyncpa [#allocation3 + $0x1], 0  ;;  %s5726_s27 = smov 0   ;;  %s5728_s28 = smov 0  }
   0x2   :  { %s5730_s29 = smov 0   ;;  %s5732_s30 = smov 0  }
   0x3   :  { %s5734_s9 = smov 0   ;;  %s5736_s10 = smov 0  }
   0x4 LB: > { %s3600_s11 = sadd.s32 4294967295, %s5679_s10   ;;  %s3601_s12 = sadd.s32 4294967294, %s5679_s10   ;;  %s5679_s10 = sphi %s5736_s10, %s21_s10   ;;  %s5675_s9 = sphi %s5734_s9, %s8284_s9   ;;  %s5671_s30 = sphi %s5732_s30, %s8283_s30   ;;  %s5667_s29 = sphi %s5730_s29, %s8282_s29   ;;  %s5663_s28 = sphi %s5728_s28, %s8281_s28   ;;  %s5659_s27 = sphi %s5726_s27, %s8280_s27  }
   0x5   : > { %s33_s13 = sadd.s32 1, %s5675_s9  ;;  %s222_s14 = sadd.s32 1, %s5667_s29 }
   0x6   : > { %p35_p0 = scmp.ge.s32.totalorder %s33_s13, 2  ;;  %p232_p1 = scmp.ne.s32.totalorder %s5667_s29, %s5663_s28 }
   0x7   : > { %p233_p2 = scmp.eq.s32.totalorder %s3600_s11, 1  ;;  %p238_p3 = scmp.ne.s32.totalorder %s5663_s28, %s5659_s27 }
   0x8   : > { %s8286_s13 = smov (%p35_p0, %s33_s13), 0  ;;  %p239_p5 = scmp.eq.s32.totalorder %s3601_s12, 1 }
   0x9   : > { %8275 = sst [smem:[#allocation5_spill]] %s8286_s13  ;;  %p5766_p4 = por %p233_p2, %p232_p1 }
   0xa   : > { %s217_s16 = ssub.s32 %s5675_s9, %s8286_s13  ;;  %p3604_p6 = scmp.ge.s32.totalorder %s5679_s10, 1 }
   0xb   : > { %p220_p7 = scmp.eq.s32.totalorder %s217_s16, 0  ;;  %p5773_p8 = por %p239_p5, %p238_p3 }
   0xc   : > { %p295_p9 = scmp.lt.s32.totalorder %s5679_s10, 3 }
   0xd   : > { %s5779_s18 = scalar_select %p220_p7, %s5667_s29, %s222_s14  }
   0xe   : > { %p296_p10 = pnand %p3604_p6, %p295_p9 }
   0xf   : > { %p338_p11 = scmp.lt.s32.totalorder (!%p296_p10), %s5671_s30, 1  ;;  %s335_s19 = sand.u32 (!%p296_p10), 1, %s5663_s28  }
  0x10   : > { %299 = sbr.rel (%p296_p10) target bundleno = 970 (0x3ca), region = 52  ;;  %s3605_s21 = sshll.u32 (!%p296_p10), %s335_s19, 5 }
  0x11   : > { %s337_s23 = scalar_lea.vmem (!%p296_p10), [#allocation2], %s3605_s21  ;;  %s5621_s21 = scalar_lea.hbm (!%p296_p10), %s8272_s8, 64 }
  0x12   : > { %s3506_s25 = sshll.u32 (!%p296_p10), %s337_s23, 4  ;;  %s3507_s25 = int_to_ptr.vmem [resolvable:$true] %s3506_s25 }
  0x15   : > { %v3724_v0 = vld [vmem:[%s8266_s2 + $0xe0] sm:$0xf]  ;;  %v5187_v1 = vld [vmem:[%s8266_s2 + $0xec] sm:$0xf0]  ;;  %s6065_s11 = scalar_select %p338_p11, %s5671_s30, 1  ;;  %vm3421_vm0 = vcmask 1043456  }
  0x16   : > { %v3852_v2 = vld [vmem:[%s8266_s2 + $0x1e0] sm:$0xf]  ;;  %v3725_v3 = vor.u32 %v5187_v1, %v3724_v0  ;;  %v5219_v4 = vld [vmem:[%s8266_s2 + $0x1ec] sm:$0xf0]  ;;  %vm3388_vm1 = vcmask 64512  }
  0x17   : > { %v3980_v5 = vld [vmem:[%s8266_s2 + $0x2e0] sm:$0xf]  ;;  %v5251_v6 = vld [vmem:[%s8266_s2 + $0x2ec] sm:$0xf0]  ;;  %v3853_v7 = vor.u32 %v5219_v4, %v3852_v2  ;;  %s8274_s22 = sshll.u32 %s6065_s11, 5  ;;  %s8278_s12 = sshll.u32 %s6065_s11, 5 }
  0x18   : > { %v3981_v8 = vor.u32 %v5251_v6, %v3980_v5  ;;  %v4108_v9 = vld [vmem:[%s8266_s2 + $0x3e0] sm:$0xf]  ;;  %v5283_v10 = vld [vmem:[%s8266_s2 + $0x3ec] sm:$0xf0]  ;;  %1147 = vmatpush.bf16.msra.mxu0 %v3725_v3  ;;  %s346_s20 = scalar_lea.vmem %s8264_s0, %s8274_s22  ;;  %s351_s16 = scalar_lea.vmem %s8265_s1, %s8278_s12 }
  0x19   : > { %v3708_v11 = vld [vmem:[%s8266_s2 + $0xc0] sm:$0xf]  ;;  %v4109_v12 = vor.u32 %v5283_v10, %v4108_v9  ;;  %v5183_v13 = vld [vmem:[%s8266_s2 + $0xcc] sm:$0xf0]  ;;  %1160 = vmatpush.bf16.msra.mxu1 %v3853_v7  ;;  %s5541_s22 = sshll.u32 %s5671_s30, 5  ;;  %s3491_s30 = scalar_lea.sflag [#allocation3], %s335_s19 }
  0x1a   : > { %v3836_v14 = vld [vmem:[%s8266_s2 + $0x1c0] sm:$0xf]  ;;  %v5215_v15 = vld [vmem:[%s8266_s2 + $0x1cc] sm:$0xf0]  ;;  %1173 = vmatpush.bf16.msra.mxu2 %v3981_v8  ;;  %v3709_v16 = vor.u32 %v5183_v13, %v3708_v11 }
  0x1b   : > { %v3837_v17 = vor.u32 %v5215_v15, %v3836_v14  ;;  %v3964_v18 = vld [vmem:[%s8266_s2 + $0x2c0] sm:$0xf]  ;;  %v5247_v19 = vld [vmem:[%s8266_s2 + $0x2cc] sm:$0xf0]  ;;  %1186 = vmatpush.bf16.msra.mxu3 %v4109_v12 }
  0x1c   : > { %v4092_v20 = vld [vmem:[%s8266_s2 + $0x3c0] sm:$0xf]  ;;  %v3965_v21 = vor.u32 %v5247_v19, %v3964_v18  ;;  %v5279_v22 = vld [vmem:[%s8266_s2 + $0x3cc] sm:$0xf0]  ;;  %1148 = vmatpush.bf16.msra.mxu0 %v3709_v16 }
  0x1d   : > { %v3692_v23 = vld [vmem:[%s8266_s2 + $0xa0] sm:$0xf]  ;;  %v5179_v24 = vld [vmem:[%s8266_s2 + $0xac] sm:$0xf0]  ;;  %v4093_v25 = vor.u32 %v5279_v22, %v4092_v20  ;;  %1161 = vmatpush.bf16.msra.mxu1 %v3837_v17 }
  0x1e   : > { %v3820_v26 = vld [vmem:[%s8266_s2 + $0x1a0] sm:$0xf]  ;;  %v5211_v27 = vld [vmem:[%s8266_s2 + $0x1ac] sm:$0xf0]  ;;  %v3693_v29 = vor.u32 %v5179_v24, %v3692_v23  ;;  %1174 = vmatpush.bf16.msra.mxu2 %v3965_v21 }
  0x1f   : > { %v3948_v28 = vld [vmem:[%s8266_s2 + $0x2a0] sm:$0xf]  ;;  %v5243_v30 = vld [vmem:[%s8266_s2 + $0x2ac] sm:$0xf0]  ;;  %v3821_v33 = vor.u32 %v5211_v27, %v3820_v26  ;;  %1187 = vmatpush.bf16.msra.mxu3 %v4093_v25 }
  0x20   : > { %v4076_v31 = vld [vmem:[%s8266_s2 + $0x3a0] sm:$0xf]  ;;  %v5275_v32 = vld [vmem:[%s8266_s2 + $0x3ac] sm:$0xf0]  ;;  %v3949_v34 = vor.u32 %v5243_v30, %v3948_v28  ;;  %1149 = vmatpush.bf16.msra.mxu0 %v3693_v29  ;;  %v5185_v28 = vld [vmem:[%s8266_s2 + $0xe4] sm:$0xf] }
  0x21   : > { %v3676_v35 = vld [vmem:[%s8266_s2 + $0x80] sm:$0xf]  ;;  %v5175_v36 = vld [vmem:[%s8266_s2 + $0x8c] sm:$0xf0]  ;;  %v4077_v38 = vor.u32 %v5275_v32, %v4076_v31  ;;  %1162 = vmatpush.bf16.msra.mxu1 %v3821_v33  ;;  %v3726_v29 = vld [vmem:[%s8266_s2 + $0xf0] sm:$0xf0] }
  0x22   : > { %v3804_v37 = vld [vmem:[%s8266_s2 + $0x180] sm:$0xf]  ;;  %v5207_v39 = vld [vmem:[%s8266_s2 + $0x18c] sm:$0xf0]  ;;  %v3677_v44 = vor.u32 %v5175_v36, %v3676_v35  ;;  %1175 = vmatpush.bf16.msra.mxu2 %v3949_v34  ;;  %v5217_v30 = vld [vmem:[%s8266_s2 + $0x1e4] sm:$0xf] }
  0x23   : > { %v3932_v40 = vld [vmem:[%s8266_s2 + $0x280] sm:$0xf]  ;;  %v5239_v41 = vld [vmem:[%s8266_s2 + $0x28c] sm:$0xf0]  ;;  %v3805_v45 = vor.u32 %v5207_v39, %v3804_v37  ;;  %1188 = vmatpush.bf16.msra.mxu3 %v4077_v38  ;;  %v3854_v32 = vld [vmem:[%s8266_s2 + $0x1f0] sm:$0xf0] }
  0x24   : > { %v4060_v42 = vld [vmem:[%s8266_s2 + $0x380] sm:$0xf]  ;;  %v5271_v43 = vld [vmem:[%s8266_s2 + $0x38c] sm:$0xf0]  ;;  %v3933_v46 = vor.u32 %v5239_v41, %v3932_v40  ;;  %1150 = vmatpush.bf16.msra.mxu0 %v3677_v44  ;;  %v5249_v33 = vld [vmem:[%s8266_s2 + $0x2e4] sm:$0xf]  ;;  %v3729_v40 = vor.u32 %v5185_v28, %v3726_v29  ;;  %v3857_v41 = vor.u32 %v5217_v30, %v3854_v32 }
  0x25   : > { %v3660_v47 = vld [vmem:[%s8266_s2 + $0x60] sm:$0xf]  ;;  %v5171_v48 = vld [vmem:[%s8266_s2 + $0x6c] sm:$0xf0]  ;;  %v4061_v50 = vor.u32 %v5271_v43, %v4060_v42  ;;  %1163 = vmatpush.bf16.msra.mxu1 %v3805_v45  ;;  %v3982_v34 = vld [vmem:[%s8266_s2 + $0x2f0] sm:$0xf0] }
  0x26   : > { %v3788_v49 = vld [vmem:[%s8266_s2 + $0x160] sm:$0xf]  ;;  %v5203_v51 = vld [vmem:[%s8266_s2 + $0x16c] sm:$0xf0]  ;;  %v3661_v56 = vor.u32 %v5171_v48, %v3660_v47  ;;  %1176 = vmatpush.bf16.msra.mxu2 %v3933_v46  ;;  %v5281_v37 = vld [vmem:[%s8266_s2 + $0x3e4] sm:$0xf]  ;;  %v3985_v42 = vor.u32 %v5249_v33, %v3982_v34 }
  0x27   : > { %v3916_v52 = vld [vmem:[%s8266_s2 + $0x260] sm:$0xf]  ;;  %v5235_v53 = vld [vmem:[%s8266_s2 + $0x26c] sm:$0xf0]  ;;  %v3789_v57 = vor.u32 %v5203_v51, %v3788_v49  ;;  %1189 = vmatpush.bf16.msra.mxu3 %v4061_v50  ;;  %v4110_v38 = vld [vmem:[%s8266_s2 + $0x3f0] sm:$0xf0] }
  0x28   : > { %v4044_v54 = vld [vmem:[%s8266_s2 + $0x360] sm:$0xf]  ;;  %v5267_v55 = vld [vmem:[%s8266_s2 + $0x36c] sm:$0xf0]  ;;  %v3917_v58 = vor.u32 %v5235_v53, %v3916_v52  ;;  %1151 = vmatpush.bf16.msra.mxu0 %v3661_v56  ;;  %v5181_v43 = vld [vmem:[%s8266_s2 + $0xc4] sm:$0xf]  ;;  %v4113_v46 = vor.u32 %v5281_v37, %v4110_v38 }
  0x29   : > { %v3644_v59 = vld [vmem:[%s8266_s2 + $0x40] sm:$0xf]  ;;  %v5167_v60 = vld [vmem:[%s8266_s2 + $0x4c] sm:$0xf0]  ;;  %v4045_v62 = vor.u32 %v5267_v55, %v4044_v54  ;;  %1164 = vmatpush.bf16.msra.mxu1 %v3789_v57  ;;  %v3710_v44 = vld [vmem:[%s8266_s2 + $0xd0] sm:$0xf0] }
  0x2a   : > { %v3772_v61 = vld [vmem:[%s8266_s2 + $0x140] sm:$0xf]  ;;  %v5199_v63 = vld [vmem:[%s8266_s2 + $0x14c] sm:$0xf0]  ;;  %v3645_v4 = vor.u32 %v5167_v60, %v3644_v59  ;;  %1177 = vmatpush.bf16.msra.mxu2 %v3917_v58  ;;  %v5213_v45 = vld [vmem:[%s8266_s2 + $0x1c4] sm:$0xf]  ;;  %v3713_v52 = vor.u32 %v5181_v43, %v3710_v44 }
  0x2b   : > { %v3900_v0 = vld [vmem:[%s8266_s2 + $0x240] sm:$0xf]  ;;  %v5231_v1 = vld [vmem:[%s8266_s2 + $0x24c] sm:$0xf0]  ;;  %v3773_v5 = vor.u32 %v5199_v63, %v3772_v61  ;;  %1190 = vmatpush.bf16.msra.mxu3 %v4045_v62  ;;  %v3838_v47 = vld [vmem:[%s8266_s2 + $0x1d0] sm:$0xf0] }
  0x2c   : > { %v4028_v2 = vld [vmem:[%s8266_s2 + $0x340] sm:$0xf]  ;;  %v5263_v3 = vld [vmem:[%s8266_s2 + $0x34c] sm:$0xf0]  ;;  %v3901_v6 = vor.u32 %v5231_v1, %v3900_v0  ;;  %1152 = vmatpush.bf16.msra.mxu0 %v3645_v4  ;;  %v5245_v48 = vld [vmem:[%s8266_s2 + $0x2c4] sm:$0xf]  ;;  %v3841_v53 = vor.u32 %v5213_v45, %v3838_v47 }
  0x2d   : > { %v3628_v7 = vld [vmem:[%s8266_s2 + $0x20] sm:$0xf]  ;;  %v5163_v8 = vld [vmem:[%s8266_s2 + $0x2c] sm:$0xf0]  ;;  %v4029_v10 = vor.u32 %v5263_v3, %v4028_v2  ;;  %1165 = vmatpush.bf16.msra.mxu1 %v3773_v5  ;;  %v3966_v49 = vld [vmem:[%s8266_s2 + $0x2d0] sm:$0xf0] }
  0x2e   : > { %v3756_v9 = vld [vmem:[%s8266_s2 + $0x120] sm:$0xf]  ;;  %v5195_v11 = vld [vmem:[%s8266_s2 + $0x12c] sm:$0xf0]  ;;  %v3629_v16 = vor.u32 %v5163_v8, %v3628_v7  ;;  %1178 = vmatpush.bf16.msra.mxu2 %v3901_v6  ;;  %v5277_v50 = vld [vmem:[%s8266_s2 + $0x3c4] sm:$0xf]  ;;  %v3969_v54 = vor.u32 %v5245_v48, %v3966_v49 }
  0x2f   : > { %v3884_v12 = vld [vmem:[%s8266_s2 + $0x220] sm:$0xf]  ;;  %v5227_v13 = vld [vmem:[%s8266_s2 + $0x22c] sm:$0xf0]  ;;  %v3757_v19 = vor.u32 %v5195_v11, %v3756_v9  ;;  %1191 = vmatpush.bf16.msra.mxu3 %v4029_v10  ;;  %v4094_v51 = vld [vmem:[%s8266_s2 + $0x3d0] sm:$0xf0] }
  0x30   : > { %v4012_v14 = vld [vmem:[%s8266_s2 + $0x320] sm:$0xf]  ;;  %v5259_v15 = vld [vmem:[%s8266_s2 + $0x32c] sm:$0xf0]  ;;  %v3885_v20 = vor.u32 %v5227_v13, %v3884_v12  ;;  %1153 = vmatpush.bf16.msra.mxu0 %v3629_v16  ;;  %v5177_v55 = vld [vmem:[%s8266_s2 + $0xa4] sm:$0xf]  ;;  %v4097_v58 = vor.u32 %v5277_v50, %v4094_v51 }
  0x31   : > { %v3612_v17 = vld [vmem:[%s8266_s2] sm:$0xf]  ;;  %v5159_v18 = vld [vmem:[%s8266_s2 + $0xc] sm:$0xf0]  ;;  %v4013_v24 = vor.u32 %v5259_v15, %v4012_v14  ;;  %1166 = vmatpush.bf16.msra.mxu1 %v3757_v19  ;;  %v3694_v56 = vld [vmem:[%s8266_s2 + $0xb0] sm:$0xf0] }
  0x32   : > { %v3740_v21 = vld [vmem:[%s8266_s2 + $0x100] sm:$0xf]  ;;  %v5191_v22 = vld [vmem:[%s8266_s2 + $0x10c] sm:$0xf0]  ;;  %v3613_v31 = vor.u32 %v5159_v18, %v3612_v17  ;;  %1179 = vmatpush.bf16.msra.mxu2 %v3885_v20  ;;  %v5209_v57 = vld [vmem:[%s8266_s2 + $0x1a4] sm:$0xf]  ;;  %v3697_v0 = vor.u32 %v5177_v55, %v3694_v56 }
  0x33   : > { %v3868_v23 = vld [vmem:[%s8266_s2 + $0x200] sm:$0xf]  ;;  %v5223_v25 = vld [vmem:[%s8266_s2 + $0x20c] sm:$0xf0]  ;;  %v3741_v35 = vor.u32 %v5191_v22, %v3740_v21  ;;  %1192 = vmatpush.bf16.msra.mxu3 %v4013_v24  ;;  %v3822_v59 = vld [vmem:[%s8266_s2 + $0x1b0] sm:$0xf0] }
  0x34   : > { %v3996_v26 = vld [vmem:[%s8266_s2 + $0x300] sm:$0xf]  ;;  %v5255_v27 = vld [vmem:[%s8266_s2 + $0x30c] sm:$0xf0]  ;;  %v3869_v36 = vor.u32 %v5223_v25, %v3868_v23  ;;  %1154 = vmatpush.bf16.msra.mxu0 %v3613_v31  ;;  %v5241_v60 = vld [vmem:[%s8266_s2 + $0x2a4] sm:$0xf]  ;;  %v3825_v2 = vor.u32 %v5209_v57, %v3822_v59 }
  0x35   : > { %v3997_v39 = vor.u32 %v5255_v27, %v3996_v26  ;;  %1167 = vmatpush.bf16.msra.mxu1 %v3741_v35  ;;  %v3950_v61 = vld [vmem:[%s8266_s2 + $0x2b0] sm:$0xf0]  ;;  %v5273_v62 = vld [vmem:[%s8266_s2 + $0x3a4] sm:$0xf]  ;;  %v356_v30 = vld [vmem:[%s346_s20 + $0x18] sm:$0xff] }
  0x36   : > { %1180 = vmatpush.bf16.msra.mxu2 %v3869_v36  ;;  %v4078_v63 = vld [vmem:[%s8266_s2 + $0x3b0] sm:$0xf0]  ;;  %v5173_v1 = vld [vmem:[%s8266_s2 + $0x84] sm:$0xf]  ;;  %v3953_v3 = vor.u32 %v5241_v60, %v3950_v61  ;;  %v354_v31 = vld [vmem:[%s346_s20 + $0x8] sm:$0xff]  ;;  %v6116_v36 = vpack.c.bf16 %v356_v30, %v356_v30 }
  0x37   : > { %1193 = vmatpush.bf16.msra.mxu3 %v3997_v39  ;;  %v3678_v4 = vld [vmem:[%s8266_s2 + $0x90] sm:$0xf0]  ;;  %v5205_v5 = vld [vmem:[%s8266_s2 + $0x184] sm:$0xf]  ;;  %v4081_v7 = vor.u32 %v5273_v62, %v4078_v63  ;;  %v6118_v37 = vpack.c.bf16 %v354_v31, %v354_v31 }
  0x38   : > { %1199 = vmatpush.bf16.msrb.mxu0 %v3729_v40  ;;  %v3806_v6 = vld [vmem:[%s8266_s2 + $0x190] sm:$0xf0]  ;;  %v5237_v8 = vld [vmem:[%s8266_s2 + $0x284] sm:$0xf]  ;;  %v3681_v12 = vor.u32 %v5173_v1, %v3678_v4  ;;  %v3732_v4 = vld [vmem:[%s8266_s2 + $0xe8] sm:$0xf] }
  0x39   : > { %1212 = vmatpush.bf16.msrb.mxu1 %v3857_v41  ;;  %v3934_v9 = vld [vmem:[%s8266_s2 + $0x290] sm:$0xf0]  ;;  %v5269_v10 = vld [vmem:[%s8266_s2 + $0x384] sm:$0xf]  ;;  %v3809_v14 = vor.u32 %v5205_v5, %v3806_v6  ;;  %v5188_v5 = vld [vmem:[%s8266_s2 + $0xf4] sm:$0xf0] }
  0x3a   : > { %1225 = vmatpush.bf16.msrb.mxu2 %v3985_v42  ;;  %v4062_v11 = vld [vmem:[%s8266_s2 + $0x390] sm:$0xf0]  ;;  %v5169_v13 = vld [vmem:[%s8266_s2 + $0x64] sm:$0xf]  ;;  %v3937_v15 = vor.u32 %v5237_v8, %v3934_v9  ;;  %1194 = vmatmul.bf16.vlgmr.msra.gmra.mxu3 %v6116_v36  ;;  %v3860_v6 = vld [vmem:[%s8266_s2 + $0x1e8] sm:$0xf] }
  0x3b   : > { %1238 = vmatpush.bf16.msrb.mxu3 %v4113_v46  ;;  %v3662_v16 = vld [vmem:[%s8266_s2 + $0x70] sm:$0xf0]  ;;  %v5201_v17 = vld [vmem:[%s8266_s2 + $0x164] sm:$0xf]  ;;  %v4065_v19 = vor.u32 %v5269_v10, %v4062_v11  ;;  %1168 = vmatmul.bf16.vlgmr.msra.gmra.mxu1 %v6118_v37  ;;  %v5220_v8 = vld [vmem:[%s8266_s2 + $0x1f4] sm:$0xf0] }
  0x3c   : > { %1200 = vmatpush.bf16.msrb.mxu0 %v3713_v52  ;;  %v3790_v18 = vld [vmem:[%s8266_s2 + $0x170] sm:$0xf0]  ;;  %v5233_v20 = vld [vmem:[%s8266_s2 + $0x264] sm:$0xf]  ;;  %v3665_v27 = vor.u32 %v5169_v13, %v3662_v16  ;;  %v3988_v9 = vld [vmem:[%s8266_s2 + $0x2e8] sm:$0xf]  ;;  %v3733_v16 = vor.u32 %v5188_v5, %v3732_v4 }
  0x3d   : > { %1213 = vmatpush.bf16.msrb.mxu1 %v3841_v53  ;;  %v3918_v21 = vld [vmem:[%s8266_s2 + $0x270] sm:$0xf0]  ;;  %v5265_v23 = vld [vmem:[%s8266_s2 + $0x364] sm:$0xf]  ;;  %v3793_v28 = vor.u32 %v5201_v17, %v3790_v18  ;;  %v5252_v10 = vld [vmem:[%s8266_s2 + $0x2f4] sm:$0xf0]  ;;  %v3861_v17 = vor.u32 %v5220_v8, %v3860_v6 }
  0x3e   : > { %1226 = vmatpush.bf16.msrb.mxu2 %v3969_v54  ;;  %v355_v22 = vld [vmem:[%s346_s20 + $0x10] sm:$0xff]  ;;  %v353_v26 = vld [vmem:[%s346_s20] sm:$0xff]  ;;  %v3921_v32 = vor.u32 %v5233_v20, %v3918_v21  ;;  %v4116_v13 = vld [vmem:[%s8266_s2 + $0x3e8] sm:$0xf]  ;;  %v3989_v18 = vor.u32 %v5252_v10, %v3988_v9  ;;  %s3504_s20 = scalar_lea.hbm %s8272_s8, %s5541_s22 }
  0x3f   : > { %1239 = vmatpush.bf16.msrb.mxu3 %v4097_v58  ;;  %v4046_v24 = vld [vmem:[%s8266_s2 + $0x370] sm:$0xf0]  ;;  %v6103_v25 = vpack.c.bf16 %v355_v22, %v355_v22  ;;  %v6105_v29 = vpack.c.bf16 %v353_v26, %v353_v26  ;;  %v5165_v33 = vld [vmem:[%s8266_s2 + $0x44] sm:$0xf]  ;;  %v5184_v20 = vld [vmem:[%s8266_s2 + $0xd4] sm:$0xf0] }
  0x40   : > { %1201 = vmatpush.bf16.msrb.mxu0 %v3697_v0  ;;  %v3646_v34 = vld [vmem:[%s8266_s2 + $0x50] sm:$0xf0]  ;;  %v5197_v35 = vld [vmem:[%s8266_s2 + $0x144] sm:$0xf]  ;;  %v4049_v38 = vor.u32 %v5265_v23, %v4046_v24  ;;  %v3844_v21 = vld [vmem:[%s8266_s2 + $0x1c8] sm:$0xf] }
  0x41   : > { %1214 = vmatpush.bf16.msrb.mxu1 %v3825_v2  ;;  %v3774_v39 = vld [vmem:[%s8266_s2 + $0x150] sm:$0xf0]  ;;  %v5229_v40 = vld [vmem:[%s8266_s2 + $0x244] sm:$0xf]  ;;  %1181 = vmatmul.bf16.vlgmr.msra.gmra.mxu2 %v6103_v25  ;;  %v3649_v44 = vor.u32 %v5165_v33, %v3646_v34  ;;  %v5216_v23 = vld [vmem:[%s8266_s2 + $0x1d4] sm:$0xf0] }
  0x42   : > { %1227 = vmatpush.bf16.msrb.mxu2 %v3953_v3  ;;  %v3902_v41 = vld [vmem:[%s8266_s2 + $0x250] sm:$0xf0]  ;;  %v5261_v42 = vld [vmem:[%s8266_s2 + $0x344] sm:$0xf]  ;;  %1155 = vmatmul.bf16.vlgmr.msra.gmra.mxu0 %v6105_v29  ;;  %v3777_v45 = vor.u32 %v5197_v35, %v3774_v39  ;;  %v3972_v24 = vld [vmem:[%s8266_s2 + $0x2c8] sm:$0xf]  ;;  %v3845_v31 = vor.u32 %v5216_v23, %v3844_v21 }
  0x43   : > { %1240 = vmatpush.bf16.msrb.mxu3 %v4081_v7  ;;  %v4030_v43 = vld [vmem:[%s8266_s2 + $0x350] sm:$0xf0]  ;;  %v3905_v46 = vor.u32 %v5229_v40, %v3902_v41  ;;  %v5161_v47 = vld [vmem:[%s8266_s2 + $0x24] sm:$0xf]  ;;  %v5248_v26 = vld [vmem:[%s8266_s2 + $0x2d4] sm:$0xf0] }
  0x44   : > { %1202 = vmatpush.bf16.msrb.mxu0 %v3681_v12  ;;  %v3630_v48 = vld [vmem:[%s8266_s2 + $0x30] sm:$0xf0]  ;;  %v5193_v49 = vld [vmem:[%s8266_s2 + $0x124] sm:$0xf]  ;;  %v4033_v50 = vor.u32 %v5261_v42, %v4030_v43  ;;  %v3700_v33 = vld [vmem:[%s8266_s2 + $0xa8] sm:$0xf] }
  0x45   : > { %1215 = vmatpush.bf16.msrb.mxu1 %v3809_v14  ;;  %v3758_v51 = vld [vmem:[%s8266_s2 + $0x130] sm:$0xf0]  ;;  %v5225_v52 = vld [vmem:[%s8266_s2 + $0x224] sm:$0xf]  ;;  %v3633_v56 = vor.u32 %v5161_v47, %v3630_v48  ;;  %v5284_v14 = vld [vmem:[%s8266_s2 + $0x3f4] sm:$0xf0] }
  0x46   : > { %1228 = vmatpush.bf16.msrb.mxu2 %v3937_v15  ;;  %v3886_v53 = vld [vmem:[%s8266_s2 + $0x230] sm:$0xf0]  ;;  %v5257_v54 = vld [vmem:[%s8266_s2 + $0x324] sm:$0xf]  ;;  %v3761_v59 = vor.u32 %v5193_v49, %v3758_v51  ;;  %v4117_v22 = vor.u32 %v5284_v14, %v4116_v13  ;;  %v5180_v34 = vld [vmem:[%s8266_s2 + $0xb4] sm:$0xf0] }
  0x47   : > { %1241 = vmatpush.bf16.msrb.mxu3 %v4065_v19  ;;  %v4014_v55 = vld [vmem:[%s8266_s2 + $0x330] sm:$0xf0]  ;;  %v5157_v57 = vld [vmem:[%s8266_s2 + $0x4] sm:$0xf]  ;;  %v3889_v60 = vor.u32 %v5225_v52, %v3886_v53  ;;  %v3716_v19 = vld [vmem:[%s8266_s2 + $0xc8] sm:$0xf] }
  0x48   : > { %1203 = vmatpush.bf16.msrb.mxu0 %v3665_v27  ;;  %v3614_v58 = vld [vmem:[%s8266_s2 + $0x10] sm:$0xf0]  ;;  %v5189_v61 = vld [vmem:[%s8266_s2 + $0x104] sm:$0xf]  ;;  %v4017_v0 = vor.u32 %v5257_v54, %v4014_v55  ;;  %v4100_v27 = vld [vmem:[%s8266_s2 + $0x3c8] sm:$0xf]  ;;  %v3717_v30 = vor.u32 %v5184_v20, %v3716_v19 }
  0x49   : > { %1216 = vmatpush.bf16.msrb.mxu1 %v3793_v28  ;;  %v3742_v62 = vld [vmem:[%s8266_s2 + $0x110] sm:$0xf0]  ;;  %v5221_v63 = vld [vmem:[%s8266_s2 + $0x204] sm:$0xf]  ;;  %v3617_v7 = vor.u32 %v5157_v57, %v3614_v58  ;;  %v5280_v28 = vld [vmem:[%s8266_s2 + $0x3d4] sm:$0xf0] }
  0x4a   : > { %1229 = vmatpush.bf16.msrb.mxu2 %v3921_v32  ;;  %v3870_v1 = vld [vmem:[%s8266_s2 + $0x210] sm:$0xf0]  ;;  %v5253_v2 = vld [vmem:[%s8266_s2 + $0x304] sm:$0xf]  ;;  %v3745_v11 = vor.u32 %v5189_v61, %v3742_v62  ;;  %v3973_v32 = vor.u32 %v5248_v26, %v3972_v24  ;;  %v3828_v35 = vld [vmem:[%s8266_s2 + $0x1a8] sm:$0xf] }
  0x4b   : > { %1242 = vmatpush.bf16.msrb.mxu3 %v4049_v38  ;;  %v3998_v3 = vld [vmem:[%s8266_s2 + $0x310] sm:$0xf0]  ;;  %v3873_v12 = vor.u32 %v5221_v63, %v3870_v1  ;;  %v4101_v38 = vor.u32 %v5280_v28, %v4100_v27  ;;  %v5212_v39 = vld [vmem:[%s8266_s2 + $0x1b4] sm:$0xf0]  ;;  %v3956_v40 = vld [vmem:[%s8266_s2 + $0x2a8] sm:$0xf] }
  0x4c   : > { %1204 = vmatpush.bf16.msrb.mxu0 %v3649_v44  ;;  %v4001_v15 = vor.u32 %v5253_v2, %v3998_v3  ;;  %v5244_v41 = vld [vmem:[%s8266_s2 + $0x2b4] sm:$0xf0]  ;;  %v4084_v42 = vld [vmem:[%s8266_s2 + $0x3a8] sm:$0xf]  ;;  %v3701_v44 = vor.u32 %v5180_v34, %v3700_v33  ;;  %s3508_s11 = sshll.u32 %s3504_s20, 4  ;;  %s3509_s11 = int_to_ptr.hbm [resolvable:$true] %s3508_s11 }
  0x4d   : > { %1217 = vmatpush.bf16.msrb.mxu1 %v3777_v45  ;;  %v5276_v43 = vld [vmem:[%s8266_s2 + $0x3b4] sm:$0xf0]  ;;  %v3829_v45 = vor.u32 %v5212_v39, %v3828_v35  ;;  %v3684_v47 = vld [vmem:[%s8266_s2 + $0x88] sm:$0xf]  ;;  %s5615_s26 = sshra.s32 %s3509_s11, 4  ;;  %s5616_s26 = int_to_ptr.hbm [resolvable:$true] %s5615_s26 }
  0x4e   : > { %1230 = vmatpush.bf16.msrb.mxu2 %v3905_v46  ;;  %v3957_v46 = vor.u32 %v5244_v41, %v3956_v40  ;;  %v5176_v48 = vld [vmem:[%s8266_s2 + $0x94] sm:$0xf0]  ;;  %v3812_v49 = vld [vmem:[%s8266_s2 + $0x188] sm:$0xf]  ;;  %s5617_s12 = scalar_lea.hbm %s5616_s26, 32  ;;  %p5622_p1 = scmp.lt.s32.totalorder %s5616_s26, %s8272_s8 }
  0x4f   : > { %1243 = vmatpush.bf16.msrb.mxu3 %v4033_v50  ;;  %v4085_v50 = vor.u32 %v5276_v43, %v4084_v42  ;;  %v5208_v51 = vld [vmem:[%s8266_s2 + $0x194] sm:$0xf0]  ;;  %v3940_v52 = vld [vmem:[%s8266_s2 + $0x288] sm:$0xf]  ;;  %p5618_p12 = scmp.ne.s32.totalorder %s5616_s26, %s5617_s12  ;;  %p5623_p2 = scmp.lt.s32.totalorder %s5621_s21, %s5617_s12 }
  0x50   : > { %1205 = vmatpush.bf16.msrb.mxu0 %v3633_v56  ;;  %v5240_v53 = vld [vmem:[%s8266_s2 + $0x294] sm:$0xf0]  ;;  %v4068_v54 = vld [vmem:[%s8266_s2 + $0x388] sm:$0xf]  ;;  %v3685_v56 = vor.u32 %v5176_v48, %v3684_v47  ;;  %v3813_v57 = vor.u32 %v5208_v51, %v3812_v49  ;;  %v3862_v48 = vld [vmem:[%s8266_s2 + $0x1f8] sm:$0xf0] }
  0x51   : > { %1218 = vmatpush.bf16.msrb.mxu1 %v3761_v59  ;;  %v5272_v55 = vld [vmem:[%s8266_s2 + $0x394] sm:$0xf0]  ;;  %v3941_v58 = vor.u32 %v5240_v53, %v3940_v52  ;;  %v3668_v59 = vld [vmem:[%s8266_s2 + $0x68] sm:$0xf]  ;;  %v5250_v49 = vld [vmem:[%s8266_s2 + $0x2ec] sm:$0xf]  ;;  %p5619_p13 = pnand %p5618_p12, %p5766_p4  ;;  %p5624_p3 = por %p5623_p2, %p5622_p1 }
  0x52   : > { %1231 = vmatpush.bf16.msrb.mxu2 %v3889_v60  ;;  %v5172_v60 = vld [vmem:[%s8266_s2 + $0x74] sm:$0xf0]  ;;  %v3796_v61 = vld [vmem:[%s8266_s2 + $0x168] sm:$0xf]  ;;  %v4069_v62 = vor.u32 %v5272_v55, %v4068_v54  ;;  %v5282_v53 = vld [vmem:[%s8266_s2 + $0x3ec] sm:$0xf] }
  0x53   : > { %1244 = vmatpush.bf16.msrb.mxu3 %v4017_v0  ;;  %v5204_v63 = vld [vmem:[%s8266_s2 + $0x174] sm:$0xf0]  ;;  %v3924_v0 = vld [vmem:[%s8266_s2 + $0x268] sm:$0xf]  ;;  %v3669_v4 = vor.u32 %v5172_v60, %v3668_v59  ;;  %v4118_v54 = vld [vmem:[%s8266_s2 + $0x3f8] sm:$0xf0]  ;;  %p5620_p0 = pneg %p5619_p13 }
  0x54   : > { %1206 = vmatpush.bf16.msrb.mxu0 %v3617_v7  ;;  %v5236_v1 = vld [vmem:[%s8266_s2 + $0x274] sm:$0xf0]  ;;  %v4052_v2 = vld [vmem:[%s8266_s2 + $0x368] sm:$0xf]  ;;  %v3797_v5 = vor.u32 %v5204_v63, %v3796_v61  ;;  %v5182_v59 = vld [vmem:[%s8266_s2 + $0xcc] sm:$0xf] }
  0x55   : > { %1219 = vmatpush.bf16.msrb.mxu1 %v3745_v11  ;;  %v5268_v3 = vld [vmem:[%s8266_s2 + $0x374] sm:$0xf0]  ;;  %v3925_v6 = vor.u32 %v5236_v1, %v3924_v0  ;;  %v3652_v7 = vld [vmem:[%s8266_s2 + $0x48] sm:$0xf]  ;;  %v3718_v60 = vld [vmem:[%s8266_s2 + $0xd8] sm:$0xf0]  ;;  %p5625_p5 = pnand %p5624_p3, %p5620_p0 }
  0x56   : > { %1232 = vmatpush.bf16.msrb.mxu2 %v3873_v12  ;;  %v5168_v8 = vld [vmem:[%s8266_s2 + $0x54] sm:$0xf0]  ;;  %v3780_v9 = vld [vmem:[%s8266_s2 + $0x148] sm:$0xf]  ;;  %v4053_v10 = vor.u32 %v5268_v3, %v4052_v2  ;;  %v5214_v61 = vld [vmem:[%s8266_s2 + $0x1cc] sm:$0xf] }
  0x57   : > { %1245 = vmatpush.bf16.msrb.mxu3 %v4001_v15  ;;  %1207 = vmatmul.bf16.vlgmr.msrb.gmra.mxu0 %v6105_v29  ;;  %v5200_v11 = vld [vmem:[%s8266_s2 + $0x154] sm:$0xf0]  ;;  %v3908_v12 = vld [vmem:[%s8266_s2 + $0x248] sm:$0xf]  ;;  %v3846_v63 = vld [vmem:[%s8266_s2 + $0x1d8] sm:$0xf0] }
  0x58   : > { %1251 = vmatpush.bf16.msra.mxu0 %v3733_v16  ;;  %1220 = vmatmul.bf16.vlgmr.msrb.gmra.mxu1 %v6118_v37  ;;  %v5232_v13 = vld [vmem:[%s8266_s2 + $0x254] sm:$0xf0]  ;;  %v4036_v14 = vld [vmem:[%s8266_s2 + $0x348] sm:$0xf]  ;;  %v3653_v16 = vor.u32 %v5168_v8, %v3652_v7  ;;  %v5246_v0 = vld [vmem:[%s8266_s2 + $0x2cc] sm:$0xf] }
  0x59   : > { %1264 = vmatpush.bf16.msra.mxu1 %v3861_v17  ;;  %1233 = vmatmul.bf16.vlgmr.msrb.gmra.mxu2 %v6103_v25  ;;  %v5264_v15 = vld [vmem:[%s8266_s2 + $0x354] sm:$0xf0]  ;;  %v3781_v17 = vor.u32 %v5200_v11, %v3780_v9  ;;  %v3636_v19 = vld [vmem:[%s8266_s2 + $0x28] sm:$0xf]  ;;  %v3974_v1 = vld [vmem:[%s8266_s2 + $0x2d8] sm:$0xf0] }
  0x5a   : > { %1277 = vmatpush.bf16.msra.mxu2 %v3989_v18  ;;  %1246 = vmatmul.bf16.vlgmr.msrb.gmra.mxu3 %v6116_v36  ;;  %v3909_v18 = vor.u32 %v5232_v13, %v3908_v12  ;;  %v5164_v20 = vld [vmem:[%s8266_s2 + $0x34] sm:$0xf0]  ;;  %v3764_v21 = vld [vmem:[%s8266_s2 + $0x128] sm:$0xf]  ;;  %v5278_v2 = vld [vmem:[%s8266_s2 + $0x3cc] sm:$0xf] }
  0x5b   : > { %1290 = vmatpush.bf16.msra.mxu3 %v4117_v22  ;;  %v4037_v22 = vor.u32 %v5264_v15, %v4036_v14  ;;  %v5196_v23 = vld [vmem:[%s8266_s2 + $0x134] sm:$0xf0]  ;;  %v3892_v24 = vld [vmem:[%s8266_s2 + $0x228] sm:$0xf]  ;;  %v4102_v3 = vld [vmem:[%s8266_s2 + $0x3d8] sm:$0xf0] }
  0x5c   : > { %1252 = vmatpush.bf16.msra.mxu0 %v3717_v30  ;;  %v5228_v26 = vld [vmem:[%s8266_s2 + $0x234] sm:$0xf0]  ;;  %v4020_v27 = vld [vmem:[%s8266_s2 + $0x328] sm:$0xf]  ;;  %v3637_v30 = vor.u32 %v5164_v20, %v3636_v19  ;;  %v3765_v33 = vor.u32 %v5196_v23, %v3764_v21  ;;  %v5178_v7 = vld [vmem:[%s8266_s2 + $0xac] sm:$0xf] }
  0x5d   : > { %1265 = vmatpush.bf16.msra.mxu1 %v3845_v31  ;;  %v5260_v28 = vld [vmem:[%s8266_s2 + $0x334] sm:$0xf0]  ;;  %v3620_v31 = vld [vmem:[%s8266_s2 + $0x8] sm:$0xf]  ;;  %v3893_v34 = vor.u32 %v5228_v26, %v3892_v24  ;;  %v3702_v8 = vld [vmem:[%s8266_s2 + $0xb8] sm:$0xf0] }
  0x5e   : > { %1278 = vmatpush.bf16.msra.mxu2 %v3973_v32  ;;  %v5160_v32 = vld [vmem:[%s8266_s2 + $0x14] sm:$0xf0]  ;;  %v3748_v35 = vld [vmem:[%s8266_s2 + $0x108] sm:$0xf]  ;;  %v4021_v40 = vor.u32 %v5260_v28, %v4020_v27  ;;  %v5210_v9 = vld [vmem:[%s8266_s2 + $0x1ac] sm:$0xf] }
  0x5f   : > { %1291 = vmatpush.bf16.msra.mxu3 %v4101_v38  ;;  %v5192_v38 = vld [vmem:[%s8266_s2 + $0x114] sm:$0xf0]  ;;  %v3876_v39 = vld [vmem:[%s8266_s2 + $0x208] sm:$0xf]  ;;  %v3621_v47 = vor.u32 %v5160_v32, %v3620_v31  ;;  %v3830_v11 = vld [vmem:[%s8266_s2 + $0x1b8] sm:$0xf0] }
  0x60   : > { %1253 = vmatpush.bf16.msra.mxu0 %v3701_v44  ;;  %v5224_v41 = vld [vmem:[%s8266_s2 + $0x214] sm:$0xf0]  ;;  %v4004_v42 = vld [vmem:[%s8266_s2 + $0x308] sm:$0xf]  ;;  %v5186_v44 = vld [vmem:[%s8266_s2 + $0xec] sm:$0xf]  ;;  %v3749_v51 = vor.u32 %v5192_v38, %v3748_v35 }
  0x61   : > { %1266 = vmatpush.bf16.msra.mxu1 %v3829_v45  ;;  %v5256_v43 = vld [vmem:[%s8266_s2 + $0x314] sm:$0xf0]  ;;  %v3734_v45 = vld [vmem:[%s8266_s2 + $0xf8] sm:$0xf0]  ;;  %v3877_v52 = vor.u32 %v5224_v41, %v3876_v39  ;;  %v5242_v12 = vld [vmem:[%s8266_s2 + $0x2ac] sm:$0xf] }
  0x62   : > { %1279 = vmatpush.bf16.msra.mxu2 %v3957_v46  ;;  %v5218_v46 = vld [vmem:[%s8266_s2 + $0x1ec] sm:$0xf]  ;;  %v4005_v55 = vor.u32 %v5256_v43, %v4004_v42  ;;  %v3958_v13 = vld [vmem:[%s8266_s2 + $0x2b8] sm:$0xf0] }
  0x63   : > { %1292 = vmatpush.bf16.msra.mxu3 %v4085_v50  ;;  %v3990_v50 = vld [vmem:[%s8266_s2 + $0x2f8] sm:$0xf0]  ;;  %v5274_v14 = vld [vmem:[%s8266_s2 + $0x3ac] sm:$0xf] }
  0x64   : > { %1254 = vmatpush.bf16.msra.mxu0 %v3685_v56  ;;  %v3737_v56 = vor.u32 %v5186_v44, %v3734_v45  ;;  %v4086_v15 = vld [vmem:[%s8266_s2 + $0x3b8] sm:$0xf0]  ;;  %v5174_v19 = vld [vmem:[%s8266_s2 + $0x8c] sm:$0xf] }
  0x65   : > { %1267 = vmatpush.bf16.msra.mxu1 %v3813_v57  ;;  %v3865_v57 = vor.u32 %v5218_v46, %v3862_v48  ;;  %v3686_v20 = vld [vmem:[%s8266_s2 + $0x98] sm:$0xf0]  ;;  %v5206_v21 = vld [vmem:[%s8266_s2 + $0x18c] sm:$0xf] }
  0x66   : > { %1280 = vmatpush.bf16.msra.mxu2 %v3941_v58  ;;  %v3993_v58 = vor.u32 %v5250_v49, %v3990_v50  ;;  %v3814_v23 = vld [vmem:[%s8266_s2 + $0x198] sm:$0xf0]  ;;  %v5238_v24 = vld [vmem:[%s8266_s2 + $0x28c] sm:$0xf] }
  0x67   : > { %1293 = vmatpush.bf16.msra.mxu3 %v4069_v62  ;;  %v4121_v62 = vor.u32 %v5282_v53, %v4118_v54  ;;  %v3942_v26 = vld [vmem:[%s8266_s2 + $0x298] sm:$0xf0]  ;;  %v5270_v27 = vld [vmem:[%s8266_s2 + $0x38c] sm:$0xf]  ;;  %v3817_v31 = vor.u32 %v5206_v21, %v3814_v23  ;;  %v4492_v21 = vld [vmem:[%s8268_s4 + $0x2e0] sm:$0xf] }
  0x68   : > { %1255 = vmatpush.bf16.msra.mxu0 %v3669_v4  ;;  %v3721_v4 = vor.u32 %v5182_v59, %v3718_v60  ;;  %v4070_v28 = vld [vmem:[%s8266_s2 + $0x398] sm:$0xf0]  ;;  %v3945_v32 = vor.u32 %v5238_v24, %v3942_v26  ;;  %v5202_v35 = vld [vmem:[%s8266_s2 + $0x16c] sm:$0xf]  ;;  %v4620_v26 = vld [vmem:[%s8268_s4 + $0x3e0] sm:$0xf] }
  0x69   : > { %1268 = vmatpush.bf16.msra.mxu1 %v3797_v5  ;;  %v3849_v5 = vor.u32 %v5214_v61, %v3846_v63  ;;  %v4073_v38 = vor.u32 %v5270_v27, %v4070_v28  ;;  %v3798_v39 = vld [vmem:[%s8266_s2 + $0x178] sm:$0xf0]  ;;  %v5266_v42 = vld [vmem:[%s8266_s2 + $0x36c] sm:$0xf]  ;;  %v5411_v27 = vld [vmem:[%s8268_s4 + $0x3ec] sm:$0xf0] }
  0x6a   : > { %1281 = vmatpush.bf16.msra.mxu2 %v3925_v6  ;;  %v3977_v6 = vor.u32 %v5246_v0, %v3974_v1  ;;  %v3926_v41 = vld [vmem:[%s8266_s2 + $0x278] sm:$0xf0]  ;;  %v3801_v45 = vor.u32 %v5202_v35, %v3798_v39  ;;  %v5198_v49 = vld [vmem:[%s8266_s2 + $0x14c] sm:$0xf]  ;;  %v4348_v35 = vld [vmem:[%s8268_s4 + $0x1c0] sm:$0xf] }
  0x6b   : > { %1294 = vmatpush.bf16.msra.mxu3 %v4053_v10  ;;  %v4105_v10 = vor.u32 %v5278_v2, %v4102_v3  ;;  %v4054_v43 = vld [vmem:[%s8266_s2 + $0x378] sm:$0xf0]  ;;  %v5262_v54 = vld [vmem:[%s8266_s2 + $0x34c] sm:$0xf]  ;;  %v5343_v39 = vld [vmem:[%s8268_s4 + $0x1cc] sm:$0xf0] }
  0x6c   : > { %1256 = vmatpush.bf16.msra.mxu0 %v3653_v16  ;;  %v3705_v16 = vor.u32 %v5178_v7, %v3702_v8  ;;  %v3654_v48 = vld [vmem:[%s8266_s2 + $0x58] sm:$0xf0]  ;;  %v4057_v50 = vor.u32 %v5266_v42, %v4054_v43  ;;  %v5162_v59 = vld [vmem:[%s8266_s2 + $0x2c] sm:$0xf]  ;;  %v4604_v42 = vld [vmem:[%s8268_s4 + $0x3c0] sm:$0xf] }
  0x6d   : > { %1269 = vmatpush.bf16.msra.mxu1 %v3781_v17  ;;  %v3833_v17 = vor.u32 %v5210_v9, %v3830_v11  ;;  %v3910_v53 = vld [vmem:[%s8266_s2 + $0x258] sm:$0xf0]  ;;  %v5194_v61 = vld [vmem:[%s8266_s2 + $0x12c] sm:$0xf]  ;;  %v5407_v43 = vld [vmem:[%s8268_s4 + $0x3cc] sm:$0xf0] }
  0x6e   : > { %1282 = vmatpush.bf16.msra.mxu2 %v3909_v18  ;;  %v3961_v18 = vor.u32 %v5242_v12, %v3958_v13  ;;  %v3638_v60 = vld [vmem:[%s8266_s2 + $0x38] sm:$0xf0]  ;;  %v5226_v0 = vld [vmem:[%s8266_s2 + $0x22c] sm:$0xf] }
  0x6f   : > { %1295 = vmatpush.bf16.msra.mxu3 %v4037_v22  ;;  %v4089_v22 = vor.u32 %v5274_v14, %v4086_v15  ;;  %v3766_v63 = vld [vmem:[%s8266_s2 + $0x138] sm:$0xf0]  ;;  %v5258_v2 = vld [vmem:[%s8266_s2 + $0x32c] sm:$0xf] }
  0x70   : > { %1257 = vmatpush.bf16.msra.mxu0 %v3637_v30  ;;  %v3689_v30 = vor.u32 %v5174_v19, %v3686_v20  ;;  %v3894_v1 = vld [vmem:[%s8266_s2 + $0x238] sm:$0xf0]  ;;  %v3769_v7 = vor.u32 %v5194_v61, %v3766_v63  ;;  %v5190_v9 = vld [vmem:[%s8266_s2 + $0x10c] sm:$0xf]  ;;  %v5347_v20 = vld [vmem:[%s8268_s4 + $0x1ec] sm:$0xf0] }
  0x71   : > { %1270 = vmatpush.bf16.msra.mxu1 %v3765_v33  ;;  %v5170_v33 = vld [vmem:[%s8266_s2 + $0x6c] sm:$0xf]  ;;  %v4022_v3 = vld [vmem:[%s8266_s2 + $0x338] sm:$0xf0]  ;;  %v3897_v8 = vor.u32 %v5226_v0, %v3894_v1  ;;  %v5367_v61 = vld [vmem:[%s8268_s4 + $0x28c] sm:$0xf0] }
  0x72   : > { %1283 = vmatpush.bf16.msra.mxu2 %v3893_v34  ;;  %v3670_v34 = vld [vmem:[%s8266_s2 + $0x78] sm:$0xf0]  ;;  %v5222_v11 = vld [vmem:[%s8266_s2 + $0x20c] sm:$0xf]  ;;  %v4025_v12 = vor.u32 %v5258_v2, %v4022_v3  ;;  %v5399_v63 = vld [vmem:[%s8268_s4 + $0x38c] sm:$0xf0] }
  0x73   : > { %1296 = vmatpush.bf16.msra.mxu3 %v4021_v40  ;;  %v5234_v40 = vld [vmem:[%s8266_s2 + $0x26c] sm:$0xf]  ;;  %v3673_v44 = vor.u32 %v5170_v33, %v3670_v34  ;;  %v3878_v13 = vld [vmem:[%s8266_s2 + $0x218] sm:$0xf0]  ;;  %v4220_v33 = vld [vmem:[%s8268_s4 + $0xc0] sm:$0xf] }
  0x74   : > { %1258 = vmatpush.bf16.msra.mxu0 %v3621_v47  ;;  %v3929_v46 = vor.u32 %v5234_v40, %v3926_v41  ;;  %v5166_v47 = vld [vmem:[%s8266_s2 + $0x4c] sm:$0xf]  ;;  %v4006_v15 = vld [vmem:[%s8266_s2 + $0x318] sm:$0xf0]  ;;  %v3881_v24 = vor.u32 %v5222_v11, %v3878_v13  ;;  %v5311_v34 = vld [vmem:[%s8268_s4 + $0xcc] sm:$0xf0] }
  0x75   : > { %1271 = vmatpush.bf16.msra.mxu1 %v3749_v51  ;;  %v3782_v51 = vld [vmem:[%s8266_s2 + $0x158] sm:$0xf0]  ;;  %v5254_v14 = vld [vmem:[%s8266_s2 + $0x30c] sm:$0xf]  ;;  %v4476_v40 = vld [vmem:[%s8268_s4 + $0x2c0] sm:$0xf] }
  0x76   : > { %1284 = vmatpush.bf16.msra.mxu2 %v3877_v52  ;;  %v5230_v52 = vld [vmem:[%s8266_s2 + $0x24c] sm:$0xf]  ;;  %v4009_v28 = vor.u32 %v5254_v14, %v4006_v15  ;;  %v5375_v41 = vld [vmem:[%s8268_s4 + $0x2cc] sm:$0xf0]  ;;  %v4172_v3 = vld [vmem:[%s8268_s4 + $0x60] sm:$0xf] }
  0x77   : > { %1297 = vmatpush.bf16.msra.mxu3 %v4005_v55  ;;  %1259 = vmatmul.bf16.vlgmr.msra.gmra.mxu0 %v6105_v29  ;;  %v4038_v55 = vld [vmem:[%s8266_s2 + $0x358] sm:$0xf0]  ;;  %v5395_v11 = vld [vmem:[%s8268_s4 + $0x36c] sm:$0xf0]  ;;  %v4156_v15 = vld [vmem:[%s8268_s4 + $0x40] sm:$0xf] }
  0x78   : > { %1303 = vmatpush.bf16.msrb.mxu0 %v3737_v56  ;;  %1272 = vmatmul.bf16.vlgmr.msra.gmra.mxu1 %v6118_v37  ;;  %v3657_v56 = vor.u32 %v5166_v47, %v3654_v48  ;;  %v4204_v47 = vld [vmem:[%s8268_s4 + $0xa0] sm:$0xf]  ;;  %v5307_v48 = vld [vmem:[%s8268_s4 + $0xac] sm:$0xf0] }
  0x79   : > { %1316 = vmatpush.bf16.msrb.mxu1 %v3865_v57  ;;  %1285 = vmatmul.bf16.vlgmr.msra.gmra.mxu2 %v6103_v25  ;;  %v3785_v57 = vor.u32 %v5198_v49, %v3782_v51  ;;  %v4332_v49 = vld [vmem:[%s8268_s4 + $0x1a0] sm:$0xf]  ;;  %v5339_v51 = vld [vmem:[%s8268_s4 + $0x1ac] sm:$0xf0] }
  0x7a   : > { %1329 = vmatpush.bf16.msrb.mxu2 %v3993_v58  ;;  %1298 = vmatmul.bf16.vlgmr.msra.gmra.mxu3 %v6116_v36  ;;  %v3913_v58 = vor.u32 %v5230_v52, %v3910_v53  ;;  %v4460_v52 = vld [vmem:[%s8268_s4 + $0x2a0] sm:$0xf]  ;;  %v5371_v53 = vld [vmem:[%s8268_s4 + $0x2ac] sm:$0xf0] }
  0x7b   : > { %1342 = vmatpush.bf16.msrb.mxu3 %v4121_v62  ;;  %v4041_v62 = vor.u32 %v5262_v54, %v4038_v55  ;;  %v4588_v54 = vld [vmem:[%s8268_s4 + $0x3a0] sm:$0xf]  ;;  %v5403_v55 = vld [vmem:[%s8268_s4 + $0x3ac] sm:$0xf0] }
  0x7c   : > { %1304 = vmatpush.bf16.msrb.mxu0 %v3721_v4  ;;  %v3641_v4 = vor.u32 %v5162_v59, %v3638_v60  ;;  %v5303_v59 = vld [vmem:[%s8268_s4 + $0x8c] sm:$0xf0]  ;;  %v4444_v60 = vld [vmem:[%s8268_s4 + $0x280] sm:$0xf] }
  0x7d   : > { %1317 = vmatpush.bf16.msrb.mxu1 %v3849_v5  ;;  %v5158_v5 = vld [vmem:[%s8266_s2 + $0xc] sm:$0xf]  ;;  %v4445_v2 = vor.u32 %v5367_v61, %v4444_v60  ;;  %v361_v60 = vld [vmem:[%s351_s16] sm:$0xff] }
  0x7e   : > { %1330 = vmatpush.bf16.msrb.mxu2 %v3977_v6  ;;  %v3622_v6 = vld [vmem:[%s8266_s2 + $0x18] sm:$0xf0]  ;;  %v362_v61 = vld [vmem:[%s351_s16 + $0x8] sm:$0xff] }
  0x7f   : > { %1343 = vmatpush.bf16.msrb.mxu3 %v4105_v10  ;;  %v3750_v10 = vld [vmem:[%s8266_s2 + $0x118] sm:$0xf0]  ;;  %v3625_v19 = vor.u32 %v5158_v5, %v3622_v6  ;;  %v4300_v5 = vld [vmem:[%s8268_s4 + $0x160] sm:$0xf] }
  0x80   : > { %1305 = vmatpush.bf16.msrb.mxu0 %v3705_v16  ;;  %v4236_v16 = vld [vmem:[%s8268_s4 + $0xe0] sm:$0xf]  ;;  %v3753_v23 = vor.u32 %v5190_v9, %v3750_v10  ;;  %v5363_v9 = vld [vmem:[%s8268_s4 + $0x26c] sm:$0xf0] }
  0x81   : > { %1318 = vmatpush.bf16.msrb.mxu1 %v3833_v17  ;;  %v5315_v17 = vld [vmem:[%s8268_s4 + $0xec] sm:$0xf0]  ;;  %v4556_v10 = vld [vmem:[%s8268_s4 + $0x360] sm:$0xf] }
  0x82   : > { %1331 = vmatpush.bf16.msrb.mxu2 %v3961_v18  ;;  %v4364_v18 = vld [vmem:[%s8268_s4 + $0x1e0] sm:$0xf] }
  0x83   : > { %1344 = vmatpush.bf16.msrb.mxu3 %v4089_v22  ;;  %v5379_v22 = vld [vmem:[%s8268_s4 + $0x2ec] sm:$0xf0] }
  0x84   : > { %1306 = vmatpush.bf16.msrb.mxu0 %v3689_v30  ;;  %v4237_v30 = vor.u32 %v5315_v17, %v4236_v16  ;;  %v5295_v16 = vld [vmem:[%s8268_s4 + $0x4c] sm:$0xf0]  ;;  %v4284_v17 = vld [vmem:[%s8268_s4 + $0x140] sm:$0xf] }
  0x85   : > { %1319 = vmatpush.bf16.msrb.mxu1 %v3817_v31  ;;  %v4365_v31 = vor.u32 %v5347_v20, %v4364_v18  ;;  %v4557_v18 = vor.u32 %v5395_v11, %v4556_v10  ;;  %v4412_v20 = vld [vmem:[%s8268_s4 + $0x240] sm:$0xf]  ;;  %v4478_v10 = vld [vmem:[%s8268_s4 + $0x2d0] sm:$0xf0]  ;;  %v6824_v11 = vpack.c.bf16 %v361_v60, %v361_v60  ;;  %v5357_v60 = vld [vmem:[%s8268_s4 + $0x244] sm:$0xf] }
  0x86   : > { %1332 = vmatpush.bf16.msrb.mxu2 %v3945_v32  ;;  %v4493_v32 = vor.u32 %v5379_v22, %v4492_v21  ;;  %v5359_v21 = vld [vmem:[%s8268_s4 + $0x24c] sm:$0xf0]  ;;  %v4540_v22 = vld [vmem:[%s8268_s4 + $0x340] sm:$0xf] }
  0x87   : > { %1345 = vmatpush.bf16.msrb.mxu3 %v4073_v38  ;;  %v4621_v38 = vor.u32 %v5411_v27, %v4620_v26  ;;  %v4413_v27 = vor.u32 %v5359_v21, %v4412_v20  ;;  %v4206_v20 = vld [vmem:[%s8268_s4 + $0xb0] sm:$0xf0]  ;;  %v5337_v21 = vld [vmem:[%s8268_s4 + $0x1a4] sm:$0xf] }
  0x88   : > { %1307 = vmatpush.bf16.msrb.mxu0 %v3673_v44  ;;  %v4221_v44 = vor.u32 %v5311_v34, %v4220_v33  ;;  %v5323_v33 = vld [vmem:[%s8268_s4 + $0x12c] sm:$0xf0]  ;;  %v4396_v34 = vld [vmem:[%s8268_s4 + $0x220] sm:$0xf] }
  0x89   : > { %1320 = vmatpush.bf16.msrb.mxu1 %v3801_v45  ;;  %v4349_v45 = vor.u32 %v5343_v39, %v4348_v35  ;;  %v5355_v35 = vld [vmem:[%s8268_s4 + $0x22c] sm:$0xf0] }
  0x8a   : > { %1333 = vmatpush.bf16.msrb.mxu2 %v3929_v46  ;;  %v4477_v46 = vor.u32 %v5375_v41, %v4476_v40  ;;  %v5387_v39 = vld [vmem:[%s8268_s4 + $0x32c] sm:$0xf0]  ;;  %v4124_v41 = vld [vmem:[%s8268_s4] sm:$0xf] }
  0x8b   : > { %1346 = vmatpush.bf16.msrb.mxu3 %v4057_v50  ;;  %v4605_v50 = vor.u32 %v5407_v43, %v4604_v42  ;;  %v5287_v42 = vld [vmem:[%s8268_s4 + $0xc] sm:$0xf0] }
  0x8c   : > { %1308 = vmatpush.bf16.msrb.mxu0 %v3657_v56  ;;  %v4205_v56 = vor.u32 %v5307_v48, %v4204_v47  ;;  %v4380_v47 = vld [vmem:[%s8268_s4 + $0x200] sm:$0xf] }
  0x8d   : > { %1321 = vmatpush.bf16.msrb.mxu1 %v3785_v57  ;;  %v4333_v57 = vor.u32 %v5339_v51, %v4332_v49  ;;  %v5351_v49 = vld [vmem:[%s8268_s4 + $0x20c] sm:$0xf0] }
  0x8e   : > { %1334 = vmatpush.bf16.msrb.mxu2 %v3913_v58  ;;  %v4188_v58 = vld [vmem:[%s8268_s4 + $0x80] sm:$0xf]  ;;  %v5383_v51 = vld [vmem:[%s8268_s4 + $0x30c] sm:$0xf0] }
  0x8f   : > { %1347 = vmatpush.bf16.msrb.mxu3 %v4041_v62  ;;  %v4572_v62 = vld [vmem:[%s8268_s4 + $0x380] sm:$0xf]  ;;  %v4189_v0 = vor.u32 %v5303_v59, %v4188_v58  ;;  %v363_v58 = vld [vmem:[%s351_s16 + $0x10] sm:$0xff] }
  0x90   : > { %1309 = vmatpush.bf16.msrb.mxu0 %v3641_v4  ;;  %v5299_v4 = vld [vmem:[%s8268_s4 + $0x6c] sm:$0xf0]  ;;  %v4573_v6 = vor.u32 %v5399_v63, %v4572_v62  ;;  %v364_v62 = vld [vmem:[%s351_s16 + $0x18] sm:$0xff] }
  0x91   : > { %1322 = vmatpush.bf16.msrb.mxu1 %v3769_v7  ;;  %v5331_v7 = vld [vmem:[%s8268_s4 + $0x16c] sm:$0xf0] }
  0x92   : > { %1335 = vmatpush.bf16.msrb.mxu2 %v3897_v8  ;;  %v4428_v8 = vld [vmem:[%s8268_s4 + $0x260] sm:$0xf]  ;;  %v4301_v13 = vor.u32 %v5331_v7, %v4300_v5  ;;  %v5341_v5 = vld [vmem:[%s8268_s4 + $0x1c4] sm:$0xf] }
  0x93   : > { %1348 = vmatpush.bf16.msrb.mxu3 %v4025_v12  ;;  %v4173_v12 = vor.u32 %v5299_v4, %v4172_v3  ;;  %v4429_v14 = vor.u32 %v5363_v9, %v4428_v8  ;;  %v5309_v3 = vld [vmem:[%s8268_s4 + $0xc4] sm:$0xf]  ;;  %v4222_v4 = vld [vmem:[%s8268_s4 + $0xd0] sm:$0xf0] }
  0x94   : > { %1310 = vmatpush.bf16.msrb.mxu0 %v3625_v19  ;;  %v5327_v19 = vld [vmem:[%s8268_s4 + $0x14c] sm:$0xf0]  ;;  %v4350_v8 = vld [vmem:[%s8268_s4 + $0x1d0] sm:$0xf0]  ;;  %v5373_v9 = vld [vmem:[%s8268_s4 + $0x2c4] sm:$0xf] }
  0x95   : > { %1323 = vmatpush.bf16.msrb.mxu1 %v3753_v23  ;;  %v5391_v23 = vld [vmem:[%s8268_s4 + $0x34c] sm:$0xf0]  ;;  %v4285_v26 = vor.u32 %v5327_v19, %v4284_v17  ;;  %v4353_v17 = vor.u32 %v5341_v5, %v4350_v8  ;;  %v5305_v19 = vld [vmem:[%s8268_s4 + $0xa4] sm:$0xf]  ;;  %v4142_v5 = vld [vmem:[%s8268_s4 + $0x30] sm:$0xf0] }
  0x96   : > { %1336 = vmatpush.bf16.msrb.mxu2 %v3881_v24  ;;  %v4157_v24 = vor.u32 %v5295_v16, %v4156_v15  ;;  %v6834_v15 = vpack.c.bf16 %v362_v61, %v362_v61  ;;  %v4225_v16 = vor.u32 %v5309_v3, %v4222_v4  ;;  %v4414_v61 = vld [vmem:[%s8268_s4 + $0x250] sm:$0xf0] }
  0x97   : > { %1349 = vmatpush.bf16.msrb.mxu3 %v4009_v28  ;;  %1311 = vmatmul.bf16.vlgmr.msrb.gmra.mxu0 %v6105_v29  ;;  %v4316_v29 = vld [vmem:[%s8268_s4 + $0x180] sm:$0xf]  ;;  %v4417_v4 = vor.u32 %v5357_v60, %v4414_v61  ;;  %v4612_v61 = vld [vmem:[%s8268_s4 + $0x3c8] sm:$0xf] }
  0x98   : > { %2133 = vmatpush.bf16.msra.mxu0 %v4237_v30  ;;  %1324 = vmatmul.bf16.vlgmr.msrb.gmra.mxu1 %v6118_v37  ;;  %v5335_v37 = vld [vmem:[%s8268_s4 + $0x18c] sm:$0xf0]  ;;  %v4140_v28 = vld [vmem:[%s8268_s4 + $0x20] sm:$0xf] }
  0x99   : > { %2146 = vmatpush.bf16.msra.mxu1 %v4365_v31  ;;  %1337 = vmatmul.bf16.vlgmr.msrb.gmra.mxu2 %v6103_v25  ;;  %v4461_v25 = vor.u32 %v5371_v53, %v4460_v52  ;;  %v4317_v1 = vor.u32 %v5335_v37, %v4316_v29  ;;  %v5291_v30 = vld [vmem:[%s8268_s4 + $0x2c] sm:$0xf0]  ;;  %v4268_v31 = vld [vmem:[%s8268_s4 + $0x120] sm:$0xf]  ;;  %v5313_v52 = vld [vmem:[%s8268_s4 + $0xe4] sm:$0xf]  ;;  %v4381_v29 = vor.u32 %v5351_v49, %v4380_v47 }
  0x9a   : > { %2159 = vmatpush.bf16.msra.mxu2 %v4493_v32  ;;  %1350 = vmatmul.bf16.vlgmr.msrb.gmra.mxu3 %v6116_v36  ;;  %v4589_v36 = vor.u32 %v5403_v55, %v4588_v54  ;;  %v4541_v32 = vor.u32 %v5391_v23, %v4540_v22  ;;  %v4141_v40 = vor.u32 %v5291_v30, %v4140_v28  ;;  %v4238_v53 = vld [vmem:[%s8268_s4 + $0xf0] sm:$0xf0]  ;;  %v5345_v54 = vld [vmem:[%s8268_s4 + $0x1e4] sm:$0xf] }
  0x9b   : > { %2172 = vmatpush.bf16.msra.mxu3 %v4621_v38  ;;  %v4524_v38 = vld [vmem:[%s8268_s4 + $0x320] sm:$0xf]  ;;  %v4269_v43 = vor.u32 %v5323_v33, %v4268_v31  ;;  %v4125_v55 = vor.u32 %v5287_v42, %v4124_v41  ;;  %v4622_v37 = vld [vmem:[%s8268_s4 + $0x3f0] sm:$0xf0]  ;;  %v4209_v30 = vor.u32 %v5305_v19, %v4206_v20  ;;  %v5301_v33 = vld [vmem:[%s8268_s4 + $0x84] sm:$0xf] }
  0x9c   : > { %2134 = vmatpush.bf16.msra.mxu0 %v4221_v44  ;;  %v4397_v44 = vor.u32 %v5355_v35, %v4396_v34  ;;  %v4525_v48 = vor.u32 %v5387_v39, %v4524_v38  ;;  %v4334_v23 = vld [vmem:[%s8268_s4 + $0x1b0] sm:$0xf0]  ;;  %v5333_v35 = vld [vmem:[%s8268_s4 + $0x184] sm:$0xf] }
  0x9d   : > { %2147 = vmatpush.bf16.msra.mxu1 %v4349_v45  ;;  %v4252_v45 = vld [vmem:[%s8268_s4 + $0x100] sm:$0xf]  ;;  %v4590_v28 = vld [vmem:[%s8268_s4 + $0x3b0] sm:$0xf0]  ;;  %v4337_v31 = vor.u32 %v5337_v21, %v4334_v23  ;;  %v5397_v42 = vld [vmem:[%s8268_s4 + $0x384] sm:$0xf] }
  0x9e   : > { %2160 = vmatpush.bf16.msra.mxu2 %v4477_v46  ;;  %v5319_v46 = vld [vmem:[%s8268_s4 + $0x10c] sm:$0xf0]  ;;  %v4190_v34 = vld [vmem:[%s8268_s4 + $0x90] sm:$0xf0]  ;;  %v5297_v47 = vld [vmem:[%s8268_s4 + $0x64] sm:$0xf] }
  0x9f   : > { %2173 = vmatpush.bf16.msra.mxu3 %v4605_v50  ;;  %v4508_v50 = vld [vmem:[%s8268_s4 + $0x300] sm:$0xf]  ;;  %v4253_v59 = vor.u32 %v5319_v46, %v4252_v45  ;;  %v4318_v39 = vld [vmem:[%s8268_s4 + $0x190] sm:$0xf0]  ;;  %v5329_v49 = vld [vmem:[%s8268_s4 + $0x164] sm:$0xf] }
  0xa0   : > { %2135 = vmatpush.bf16.msra.mxu0 %v4205_v56  ;;  %v4366_v56 = vld [vmem:[%s8268_s4 + $0x1f0] sm:$0xf0]  ;;  %v4509_v63 = vor.u32 %v5383_v51, %v4508_v50  ;;  %v4321_v45 = vor.u32 %v5333_v35, %v4318_v39  ;;  %v5285_v19 = vld [vmem:[%s8268_s4 + $0x4] sm:$0xf]  ;;  %v4244_v35 = vld [vmem:[%s8268_s4 + $0xe8] sm:$0xf] }
  0xa1   : > { %2148 = vmatpush.bf16.msra.mxu1 %v4333_v57  ;;  %v5377_v57 = vld [vmem:[%s8268_s4 + $0x2e4] sm:$0xf]  ;;  %v4446_v41 = vld [vmem:[%s8268_s4 + $0x290] sm:$0xf0]  ;;  %v4372_v39 = vld [vmem:[%s8268_s4 + $0x1e8] sm:$0xf] }
  0xa2   : > { %2161 = vmatpush.bf16.msra.mxu2 %v4461_v25  ;;  %v4494_v25 = vld [vmem:[%s8268_s4 + $0x2f0] sm:$0xf0] }
  0xa3   : > { %2174 = vmatpush.bf16.msra.mxu3 %v4589_v36  ;;  %v5409_v36 = vld [vmem:[%s8268_s4 + $0x3e4] sm:$0xf]  ;;  %v4302_v51 = vld [vmem:[%s8268_s4 + $0x170] sm:$0xf0] }
  0xa4   : > { %2136 = vmatpush.bf16.msra.mxu0 %v4189_v0  ;;  %v4241_v0 = vor.u32 %v5313_v52, %v4238_v53  ;;  %v4625_v7 = vor.u32 %v5409_v36, %v4622_v37  ;;  %v5361_v52 = vld [vmem:[%s8268_s4 + $0x264] sm:$0xf]  ;;  %v4430_v53 = vld [vmem:[%s8268_s4 + $0x270] sm:$0xf0] }
  0xa5   : > { %2149 = vmatpush.bf16.msra.mxu1 %v4317_v1  ;;  %v4369_v1 = vor.u32 %v5345_v54, %v4366_v56  ;;  %v5393_v54 = vld [vmem:[%s8268_s4 + $0x364] sm:$0xf]  ;;  %v4286_v36 = vld [vmem:[%s8268_s4 + $0x150] sm:$0xf0] }
  0xa6   : > { %2162 = vmatpush.bf16.msra.mxu2 %v4445_v2  ;;  %v4497_v2 = vor.u32 %v5377_v57, %v4494_v25  ;;  %v5293_v57 = vld [vmem:[%s8268_s4 + $0x44] sm:$0xf]  ;;  %v4305_v25 = vor.u32 %v5329_v49, %v4302_v51  ;;  %v4126_v20 = vld [vmem:[%s8268_s4 + $0x10] sm:$0xf0] }
  0xa7   : > { %2175 = vmatpush.bf16.msra.mxu3 %v4573_v6  ;;  %v6813_v6 = vpack.c.bf16 %v363_v58, %v363_v58  ;;  %v4433_v58 = vor.u32 %v5361_v52, %v4430_v53 }
  0xa8   : > { %2137 = vmatpush.bf16.msra.mxu0 %v4173_v12  ;;  %v6826_v12 = vpack.c.bf16 %v364_v62, %v364_v62  ;;  %v6933_v62 = vld [vmem:[%s8267_s3] sm:$0xf] }
  0xa9   : > { %2150 = vmatpush.bf16.msra.mxu1 %v4301_v13  ;;  %v5405_v13 = vld [vmem:[%s8268_s4 + $0x3c4] sm:$0xf]  ;;  %v499_v8 = vperm.slane %v6933_v62, 0 }
  0xaa   : > { %2163 = vmatpush.bf16.msra.mxu2 %v4429_v14  ;;  %v4606_v14 = vld [vmem:[%s8268_s4 + $0x3d0] sm:$0xf0] }
  0xab   : > { %2176 = vmatpush.bf16.msra.mxu3 %v4557_v18  ;;  %v4481_v18 = vor.u32 %v5373_v9, %v4478_v10  ;;  %v4609_v22 = vor.u32 %v5405_v13, %v4606_v14  ;;  %v4270_v10 = vld [vmem:[%s8268_s4 + $0x130] sm:$0xf0]  ;;  %v5353_v13 = vld [vmem:[%s8268_s4 + $0x224] sm:$0xf] }
  0xac   : > { %2138 = vmatpush.bf16.msra.mxu0 %v4157_v24  ;;  %v5369_v24 = vld [vmem:[%s8268_s4 + $0x2a4] sm:$0xf]  ;;  %v4398_v14 = vld [vmem:[%s8268_s4 + $0x230] sm:$0xf0] }
  0xad   : > { %2151 = vmatpush.bf16.msra.mxu1 %v4285_v26  ;;  %v4462_v26 = vld [vmem:[%s8268_s4 + $0x2b0] sm:$0xf0]  ;;  %v4401_v23 = vor.u32 %v5353_v13, %v4398_v14  ;;  %v5372_v13 = vld [vmem:[%s8268_s4 + $0x2b4] sm:$0xf0]  ;;  %v4596_v14 = vld [vmem:[%s8268_s4 + $0x3a8] sm:$0xf] }
  0xae   : > { %2164 = vmatpush.bf16.msra.mxu2 %v4413_v27  ;;  %v5401_v27 = vld [vmem:[%s8268_s4 + $0x3a4] sm:$0xf] }
  0xaf   : > { %2177 = vmatpush.bf16.msra.mxu3 %v4541_v32  ;;  %v4465_v32 = vor.u32 %v5369_v24, %v4462_v26  ;;  %v4593_v38 = vor.u32 %v5401_v27, %v4590_v28  ;;  %v5317_v24 = vld [vmem:[%s8268_s4 + $0x104] sm:$0xf]  ;;  %v4254_v26 = vld [vmem:[%s8268_s4 + $0x110] sm:$0xf0] }
  0xb0   : > { %2139 = vmatpush.bf16.msra.mxu0 %v4141_v40  ;;  %v5365_v40 = vld [vmem:[%s8268_s4 + $0x284] sm:$0xf] }
  0xb1   : > { %2152 = vmatpush.bf16.msra.mxu1 %v4269_v43  ;;  %v4574_v43 = vld [vmem:[%s8268_s4 + $0x390] sm:$0xf0]  ;;  %v4449_v46 = vor.u32 %v5365_v40, %v4446_v41  ;;  %v5349_v27 = vld [vmem:[%s8268_s4 + $0x204] sm:$0xf]  ;;  %v4129_v41 = vor.u32 %v5285_v19, %v4126_v20  ;;  %v4196_v19 = vld [vmem:[%s8268_s4 + $0x88] sm:$0xf] }
  0xb2   : > { %2165 = vmatpush.bf16.msra.mxu2 %v4397_v44  ;;  %v4193_v44 = vor.u32 %v5301_v33, %v4190_v34  ;;  %v4577_v50 = vor.u32 %v5397_v42, %v4574_v43  ;;  %v5381_v33 = vld [vmem:[%s8268_s4 + $0x304] sm:$0xf]  ;;  %v4510_v34 = vld [vmem:[%s8268_s4 + $0x310] sm:$0xf0]  ;;  %v5348_v42 = vld [vmem:[%s8268_s4 + $0x1f4] sm:$0xf0] }
  0xb3   : > { %2178 = vmatpush.bf16.msra.mxu3 %v4525_v48  ;;  %v4174_v48 = vld [vmem:[%s8268_s4 + $0x70] sm:$0xf0]  ;;  %v4500_v43 = vld [vmem:[%s8268_s4 + $0x2e8] sm:$0xf] }
  0xb4   : > { %2140 = vmatpush.bf16.msra.mxu0 %v4125_v55  ;;  %v4558_v55 = vld [vmem:[%s8268_s4 + $0x370] sm:$0xf0]  ;;  %v4177_v56 = vor.u32 %v5297_v47, %v4174_v48  ;;  %v4628_v47 = vld [vmem:[%s8268_s4 + $0x3e8] sm:$0xf]  ;;  %v5412_v48 = vld [vmem:[%s8268_s4 + $0x3f4] sm:$0xf0] }
  0xb5   : > { %2153 = vmatpush.bf16.msra.mxu1 %v4253_v59  ;;  %v4158_v59 = vld [vmem:[%s8268_s4 + $0x50] sm:$0xf0]  ;;  %v4561_v37 = vor.u32 %v5393_v54, %v4558_v55  ;;  %v4373_v54 = vor.u32 %v5348_v42, %v4372_v39  ;;  %v4308_v42 = vld [vmem:[%s8268_s4 + $0x168] sm:$0xf] }
  0xb6   : > { %2166 = vmatpush.bf16.msra.mxu2 %v4381_v29  ;;  %v5325_v29 = vld [vmem:[%s8268_s4 + $0x144] sm:$0xf] }
  0xb7   : > { %2179 = vmatpush.bf16.msra.mxu3 %v4509_v63  ;;  %2141 = vmatmul.bf16.vlgmr.msra.gmra.mxu0 %v6824_v11  ;;  %v5389_v63 = vld [vmem:[%s8268_s4 + $0x344] sm:$0xf]  ;;  %v4289_v3 = vor.u32 %v5325_v29, %v4286_v36  ;;  %v4484_v29 = vld [vmem:[%s8268_s4 + $0x2c8] sm:$0xf]  ;;  %v5376_v36 = vld [vmem:[%s8268_s4 + $0x2d4] sm:$0xf0] }
  0xb8   : > { %2185 = vmatpush.bf16.msrb.mxu0 %v4241_v0  ;;  %2154 = vmatmul.bf16.vlgmr.msra.gmra.mxu1 %v6834_v15  ;;  %v4542_v0 = vld [vmem:[%s8268_s4 + $0x350] sm:$0xf0] }
  0xb9   : > { %2198 = vmatpush.bf16.msrb.mxu1 %v4369_v1  ;;  %2167 = vmatmul.bf16.vlgmr.msra.gmra.mxu2 %v6813_v6  ;;  %v4161_v1 = vor.u32 %v5293_v57, %v4158_v59  ;;  %v4545_v9 = vor.u32 %v5389_v63, %v4542_v0  ;;  %v5312_v57 = vld [vmem:[%s8268_s4 + $0xd4] sm:$0xf0] }
  0xba   : > { %2211 = vmatpush.bf16.msrb.mxu2 %v4497_v2  ;;  %2180 = vmatmul.bf16.vlgmr.msra.gmra.mxu3 %v6826_v12  ;;  %v5289_v2 = vld [vmem:[%s8268_s4 + $0x24] sm:$0xf]  ;;  %v5344_v59 = vld [vmem:[%s8268_s4 + $0x1d4] sm:$0xf0] }
  0xbb   : > { %2224 = vmatpush.bf16.msrb.mxu3 %v4625_v7  ;;  %v5321_v7 = vld [vmem:[%s8268_s4 + $0x124] sm:$0xf]  ;;  %v5408_v63 = vld [vmem:[%s8268_s4 + $0x3d4] sm:$0xf0] }
  0xbc   : > { %2186 = vmatpush.bf16.msrb.mxu0 %v4225_v16  ;;  %v5385_v16 = vld [vmem:[%s8268_s4 + $0x324] sm:$0xf] }
  0xbd   : > { %2199 = vmatpush.bf16.msrb.mxu1 %v4353_v17  ;;  %v4526_v17 = vld [vmem:[%s8268_s4 + $0x330] sm:$0xf0]  ;;  %v1195_v53 = vpop.f32.mrf.mxu3 }
  0xbe   : > { %2212 = vmatpush.bf16.msrb.mxu2 %v4481_v18  ;;  %v4145_v18 = vor.u32 %v5289_v2, %v4142_v5  ;;  %v5308_v5 = vld [vmem:[%s8268_s4 + $0xb4] sm:$0xf0] }
  0xbf   : > { %2225 = vmatpush.bf16.msrb.mxu3 %v4609_v22  ;;  %v1156_v21 = vpop.f32.mrf.mxu0  ;;  %v4273_v22 = vor.u32 %v5321_v7, %v4270_v10  ;;  %v4340_v7 = vld [vmem:[%s8268_s4 + $0x1a8] sm:$0xf] }
  0xc0   : > { %2187 = vmatpush.bf16.msrb.mxu0 %v4209_v30  ;;  %v1157_v28 = vadd.f32 %v1156_v21, %v499_v8  ;;  %v1169_v30 = vpop.f32.mrf.mxu1  ;;  %v4613_v8 = vor.u32 %v5408_v63, %v4612_v61  ;;  %v4468_v10 = vld [vmem:[%s8268_s4 + $0x2a8] sm:$0xf] }
  0xc1   : > { %2200 = vmatpush.bf16.msrb.mxu1 %v4337_v31  ;;  %v4529_v31 = vor.u32 %v5385_v16, %v4526_v17  ;;  %v5404_v16 = vld [vmem:[%s8268_s4 + $0x3b4] sm:$0xf0]  ;;  %v4548_v63 = vld [vmem:[%s8268_s4 + $0x348] sm:$0xf] }
  0xc2   : > { %2213 = vmatpush.bf16.msrb.mxu2 %v4465_v32  ;;  %v4382_v32 = vld [vmem:[%s8268_s4 + $0x210] sm:$0xf0]  ;;  %v1170_v40 = vadd.f32 %v1169_v30, %v1157_v28  ;;  %v5336_v28 = vld [vmem:[%s8268_s4 + $0x194] sm:$0xf0]  ;;  %v4452_v30 = vld [vmem:[%s8268_s4 + $0x288] sm:$0xf] }
  0xc3   : > { %2226 = vmatpush.bf16.msrb.mxu3 %v4593_v38  ;;  %v5316_v38 = vld [vmem:[%s8268_s4 + $0xf4] sm:$0xf0] }
  0xc4   : > { %2188 = vmatpush.bf16.msrb.mxu0 %v4193_v44  ;;  %v5380_v44 = vld [vmem:[%s8268_s4 + $0x2f4] sm:$0xf0]  ;;  %v1182_v49 = vpop.f32.mrf.mxu2  ;;  %v4245_v51 = vor.u32 %v5316_v38, %v4244_v35 }
  0xc5   : > { %2201 = vmatpush.bf16.msrb.mxu1 %v4321_v45  ;;  %v4257_v45 = vor.u32 %v5317_v24, %v4254_v26  ;;  %v1183_v52 = vadd.f32 %v1182_v49, %v1170_v40  ;;  %v4501_v55 = vor.u32 %v5380_v44, %v4500_v43  ;;  %v1197_v20 = vpop.f32.mrf.mxu3  ;;  %v4324_v24 = vld [vmem:[%s8268_s4 + $0x188] sm:$0xf]  ;;  %v500_v26 = vperm.slane %v6933_v62, 1 }
  0xc6   : > { %2214 = vmatpush.bf16.msrb.mxu2 %v4449_v46  ;;  %v4385_v46 = vor.u32 %v5349_v27, %v4382_v32  ;;  %v4597_v27 = vor.u32 %v5404_v16, %v4596_v14  ;;  %v4580_v32 = vld [vmem:[%s8268_s4 + $0x388] sm:$0xf]  ;;  %v4325_v38 = vor.u32 %v5336_v28, %v4324_v24  ;;  %v5324_v14 = vld [vmem:[%s8268_s4 + $0x134] sm:$0xf0] }
  0xc7   : > { %2227 = vmatpush.bf16.msrb.mxu3 %v4577_v50  ;;  %v4513_v50 = vor.u32 %v5381_v33, %v4510_v34  ;;  %v1158_v60 = vpop.f32.mrf.mxu0  ;;  %v5400_v33 = vld [vmem:[%s8268_s4 + $0x394] sm:$0xf0]  ;;  %v4180_v40 = vld [vmem:[%s8268_s4 + $0x68] sm:$0xf] }
  0xc8   : > { %2189 = vmatpush.bf16.msrb.mxu0 %v4177_v56  ;;  %v4228_v56 = vld [vmem:[%s8268_s4 + $0xc8] sm:$0xf]  ;;  %v1171_v0 = vpop.f32.mrf.mxu1 }
  0xc9   : > { %2202 = vmatpush.bf16.msrb.mxu1 %v4305_v25  ;;  %v4356_v25 = vld [vmem:[%s8268_s4 + $0x1c8] sm:$0xf]  ;;  %v5392_v0 = vld [vmem:[%s8268_s4 + $0x354] sm:$0xf0] }
  0xca   : > { %2215 = vmatpush.bf16.msrb.mxu2 %v4433_v58  ;;  %v4629_v58 = vor.u32 %v5412_v48, %v4628_v47  ;;  %v4357_v2 = vor.u32 %v5344_v59, %v4356_v25  ;;  %v4436_v47 = vld [vmem:[%s8268_s4 + $0x268] sm:$0xf]  ;;  %v5364_v48 = vld [vmem:[%s8268_s4 + $0x274] sm:$0xf0] }
  0xcb   : > { %2228 = vmatpush.bf16.msrb.mxu3 %v4561_v37  ;;  %v7032_v37 = vadd.f32 %v1195_v53, %v1183_v52  ;;  %v4564_v49 = vld [vmem:[%s8268_s4 + $0x368] sm:$0xf]  ;;  %v5328_v59 = vld [vmem:[%s8268_s4 + $0x154] sm:$0xf0] }
  0xcc   : > { %2190 = vmatpush.bf16.msrb.mxu0 %v4161_v1  ;;  %v4229_v1 = vor.u32 %v5312_v57, %v4228_v56  ;;  %v1184_v17 = vpop.f32.mrf.mxu2  ;;  %v5296_v56 = vld [vmem:[%s8268_s4 + $0x54] sm:$0xf0]  ;;  %v4292_v57 = vld [vmem:[%s8268_s4 + $0x148] sm:$0xf] }
  0xcd   : > { %2203 = vmatpush.bf16.msrb.mxu1 %v4289_v3  ;;  %v4485_v3 = vor.u32 %v5376_v36, %v4484_v29  ;;  %v4420_v29 = vld [vmem:[%s8268_s4 + $0x248] sm:$0xf]  ;;  %v5360_v36 = vld [vmem:[%s8268_s4 + $0x254] sm:$0xf0] }
  0xce   : > { %2216 = vmatpush.bf16.msrb.mxu2 %v4417_v4  ;;  %v4212_v4 = vld [vmem:[%s8268_s4 + $0xa8] sm:$0xf]  ;;  %v5356_v17 = vld [vmem:[%s8268_s4 + $0x234] sm:$0xf0] }
  0xcf   : > { %2229 = vmatpush.bf16.msrb.mxu3 %v4545_v9  ;;  %v5340_v9 = vld [vmem:[%s8268_s4 + $0x1b4] sm:$0xf0]  ;;  %v4404_v16 = vld [vmem:[%s8268_s4 + $0x228] sm:$0xf] }
  0xd0   : > { %2191 = vmatpush.bf16.msrb.mxu0 %v4145_v18  ;;  %v4213_v18 = vor.u32 %v5308_v5, %v4212_v4  ;;  %v4341_v21 = vor.u32 %v5340_v9, %v4340_v7  ;;  %v4293_v4 = vor.u32 %v5328_v59, %v4292_v57  ;;  %v4421_v5 = vor.u32 %v5360_v36, %v4420_v29  ;;  %v4148_v7 = vld [vmem:[%s8268_s4 + $0x28] sm:$0xf]  ;;  %v4358_v57 = vld [vmem:[%s8268_s4 + $0x1d8] sm:$0xf0]  ;;  %v5406_v59 = vld [vmem:[%s8268_s4 + $0x3cc] sm:$0xf] }
  0xd1   : > { %2204 = vmatpush.bf16.msrb.mxu1 %v4273_v22  ;;  %v4469_v22 = vor.u32 %v5372_v13, %v4468_v10  ;;  %v4276_v9 = vld [vmem:[%s8268_s4 + $0x128] sm:$0xf]  ;;  %v4549_v13 = vor.u32 %v5392_v0, %v4548_v63  ;;  %v4405_v24 = vor.u32 %v5356_v17, %v4404_v16  ;;  %v4614_v29 = vld [vmem:[%s8268_s4 + $0x3d8] sm:$0xf0]  ;;  %v5306_v63 = vld [vmem:[%s8268_s4 + $0xac] sm:$0xf] }
  0xd2   : > { %2217 = vmatpush.bf16.msrb.mxu2 %v4401_v23  ;;  %v5304_v23 = vld [vmem:[%s8268_s4 + $0x94] sm:$0xf0]  ;;  %v4388_v28 = vld [vmem:[%s8268_s4 + $0x208] sm:$0xf]  ;;  %v4214_v0 = vld [vmem:[%s8268_s4 + $0xb8] sm:$0xf0] }
  0xd3   : > { %2230 = vmatpush.bf16.msrb.mxu3 %v4529_v31  ;;  %v5368_v31 = vld [vmem:[%s8268_s4 + $0x294] sm:$0xf0]  ;;  %v4197_v34 = vor.u32 %v5304_v23, %v4196_v19  ;;  %v4277_v23 = vor.u32 %v5324_v14, %v4276_v9  ;;  %v4598_v9 = vld [vmem:[%s8268_s4 + $0x3b8] sm:$0xf0] }
  0xd4   : > { %2192 = vmatpush.bf16.msrb.mxu0 %v4129_v41  ;;  %v1208_v35 = vpop.f32.mrf.mxu0  ;;  %v4453_v39 = vor.u32 %v5368_v31, %v4452_v30  ;;  %v5300_v41 = vld [vmem:[%s8268_s4 + $0x74] sm:$0xf0]  ;;  %v4198_v17 = vld [vmem:[%s8268_s4 + $0x98] sm:$0xf0] }
  0xd5   : > { %2205 = vmatpush.bf16.msrb.mxu1 %v4257_v45  ;;  %v1209_v43 = vadd.f32 %v1208_v35, %v500_v26  ;;  %v1221_v44 = vpop.f32.mrf.mxu1  ;;  %v4581_v45 = vor.u32 %v5400_v33, %v4580_v32  ;;  %v4181_v52 = vor.u32 %v5300_v41, %v4180_v40  ;;  %v5388_v19 = vld [vmem:[%s8268_s4 + $0x334] sm:$0xf0]  ;;  %v4260_v26 = vld [vmem:[%s8268_s4 + $0x108] sm:$0xf]  ;;  %v5346_v40 = vld [vmem:[%s8268_s4 + $0x1ec] sm:$0xf] }
  0xd6   : > { %2218 = vmatpush.bf16.msrb.mxu2 %v4385_v46  ;;  %v5332_v46 = vld [vmem:[%s8268_s4 + $0x174] sm:$0xf0]  ;;  %v4516_v33 = vld [vmem:[%s8268_s4 + $0x308] sm:$0xf] }
  0xd7   : > { %2231 = vmatpush.bf16.msrb.mxu3 %v4513_v50  ;;  %2193 = vmatmul.bf16.vlgmr.msrb.gmra.mxu0 %v6824_v11  ;;  %v5396_v50 = vld [vmem:[%s8268_s4 + $0x374] sm:$0xf0]  ;;  %v4309_v53 = vor.u32 %v5332_v46, %v4308_v42  ;;  %v4374_v42 = vld [vmem:[%s8268_s4 + $0x1f8] sm:$0xf0] }
  0xd8   : > { %2237 = vmatpush.bf16.msra.mxu0 %v4245_v51  ;;  %2206 = vmatmul.bf16.vlgmr.msrb.gmra.mxu1 %v6834_v15  ;;  %v1222_v51 = vadd.f32 %v1221_v44, %v1209_v43  ;;  %v5352_v32 = vld [vmem:[%s8268_s4 + $0x214] sm:$0xf0]  ;;  %v5378_v43 = vld [vmem:[%s8268_s4 + $0x2ec] sm:$0xf]  ;;  %v4502_v44 = vld [vmem:[%s8268_s4 + $0x2f8] sm:$0xf0] }
  0xd9   : > { %2250 = vmatpush.bf16.msra.mxu1 %v4373_v54  ;;  %2219 = vmatmul.bf16.vlgmr.msrb.gmra.mxu2 %v6813_v6  ;;  %v4437_v54 = vor.u32 %v5364_v48, %v4436_v47  ;;  %v4389_v46 = vor.u32 %v5352_v32, %v4388_v28  ;;  %v5410_v47 = vld [vmem:[%s8268_s4 + $0x3ec] sm:$0xf]  ;;  %v4630_v48 = vld [vmem:[%s8268_s4 + $0x3f8] sm:$0xf0] }
  0xda   : > { %2263 = vmatpush.bf16.msra.mxu2 %v4501_v55  ;;  %2232 = vmatmul.bf16.vlgmr.msrb.gmra.mxu3 %v6826_v12  ;;  %v4164_v55 = vld [vmem:[%s8268_s4 + $0x48] sm:$0xf]  ;;  %v5298_v32 = vld [vmem:[%s8268_s4 + $0x6c] sm:$0xf] }
  0xdb   : > { %2276 = vmatpush.bf16.msra.mxu3 %v4629_v58  ;;  %v4565_v58 = vor.u32 %v5396_v50, %v4564_v49 }
  0xdc   : > { %2238 = vmatpush.bf16.msra.mxu0 %v4229_v1  ;;  %v1234_v25 = vpop.f32.mrf.mxu2  ;;  %v4165_v1 = vor.u32 %v5296_v56, %v4164_v55  ;;  %v5342_v55 = vld [vmem:[%s8268_s4 + $0x1cc] sm:$0xf]  ;;  %v4633_v56 = vor.u32 %v5410_v47, %v4630_v48 }
  0xdd   : > { %2251 = vmatpush.bf16.msra.mxu1 %v4357_v2  ;;  %v1235_v60 = vadd.f32 %v1234_v25, %v1222_v51  ;;  %v1247_v61 = vpop.f32.mrf.mxu3  ;;  %v1223_v10 = vpop.f32.mrf.mxu1  ;;  %v4377_v51 = vor.u32 %v5346_v40, %v4374_v42  ;;  %v5374_v25 = vld [vmem:[%s8268_s4 + $0x2cc] sm:$0xf]  ;;  %v4310_v40 = vld [vmem:[%s8268_s4 + $0x178] sm:$0xf0] }
  0xde   : > { %2264 = vmatpush.bf16.msra.mxu2 %v4485_v3  ;;  %v1210_v3 = vpop.f32.mrf.mxu0  ;;  %v4217_v10 = vor.u32 %v5306_v63, %v4214_v0  ;;  %v4438_v42 = vld [vmem:[%s8268_s4 + $0x278] sm:$0xf0]  ;;  %v5290_v0 = vld [vmem:[%s8268_s4 + $0x2c] sm:$0xf] }
  0xdf   : > { %2277 = vmatpush.bf16.msra.mxu3 %v4613_v8  ;;  %v7141_v2 = vadd.f32 %v1247_v61, %v1235_v60  ;;  %v5292_v8 = vld [vmem:[%s8268_s4 + $0x34] sm:$0xf0]  ;;  %v4361_v60 = vor.u32 %v5342_v55, %v4358_v57  ;;  %v4617_v3 = vor.u32 %v5406_v59, %v4614_v29  ;;  %v5358_v55 = vld [vmem:[%s8268_s4 + $0x24c] sm:$0xf]  ;;  %v4550_v59 = vld [vmem:[%s8268_s4 + $0x358] sm:$0xf0] }
  0xe0   : > { %2239 = vmatpush.bf16.msra.mxu0 %v4213_v18  ;;  %v4532_v18 = vld [vmem:[%s8268_s4 + $0x328] sm:$0xf]  ;;  %v4149_v20 = vor.u32 %v5292_v8, %v4148_v7  ;;  %v4470_v7 = vld [vmem:[%s8268_s4 + $0x2b8] sm:$0xf0]  ;;  %v5402_v8 = vld [vmem:[%s8268_s4 + $0x3ac] sm:$0xf] }
  0xe1   : > { %2252 = vmatpush.bf16.msra.mxu1 %v4341_v21  ;;  %v4132_v21 = vld [vmem:[%s8268_s4 + $0x8] sm:$0xf]  ;;  %v4533_v31 = vor.u32 %v5388_v19, %v4532_v18  ;;  %v5334_v18 = vld [vmem:[%s8268_s4 + $0x18c] sm:$0xf]  ;;  %v501_v19 = vperm.slane %v6933_v62, 2 }
  0xe2   : > { %2265 = vmatpush.bf16.msra.mxu2 %v4469_v22  ;;  %v5288_v22 = vld [vmem:[%s8268_s4 + $0x14] sm:$0xf0] }
  0xe3   : > { %2278 = vmatpush.bf16.msra.mxu3 %v4597_v27  ;;  %v5320_v27 = vld [vmem:[%s8268_s4 + $0x114] sm:$0xf0]  ;;  %v4133_v41 = vor.u32 %v5288_v22, %v4132_v21  ;;  %v4326_v21 = vld [vmem:[%s8268_s4 + $0x198] sm:$0xf0]  ;;  %v5366_v22 = vld [vmem:[%s8268_s4 + $0x28c] sm:$0xf] }
  0xe4   : > { %2240 = vmatpush.bf16.msra.mxu0 %v4197_v34  ;;  %v1236_v30 = vpop.f32.mrf.mxu2  ;;  %v5384_v34 = vld [vmem:[%s8268_s4 + $0x314] sm:$0xf0] }
  0xe5   : > { %2253 = vmatpush.bf16.msra.mxu1 %v4325_v38  ;;  %v1249_v35 = vpop.f32.mrf.mxu3  ;;  %v5314_v38 = vld [vmem:[%s8268_s4 + $0xec] sm:$0xf]  ;;  %v4517_v49 = vor.u32 %v5384_v34, %v4516_v33  ;;  %v4329_v30 = vor.u32 %v5334_v18, %v4326_v21  ;;  %v4182_v33 = vld [vmem:[%s8268_s4 + $0x78] sm:$0xf0] }
  0xe6   : > { %2266 = vmatpush.bf16.msra.mxu2 %v4453_v39  ;;  %v4246_v39 = vld [vmem:[%s8268_s4 + $0xf8] sm:$0xf0]  ;;  %v5330_v34 = vld [vmem:[%s8268_s4 + $0x16c] sm:$0xf] }
  0xe7   : > { %2279 = vmatpush.bf16.msra.mxu3 %v4581_v45  ;;  %v4261_v45 = vor.u32 %v5320_v27, %v4260_v26  ;;  %v4249_v50 = vor.u32 %v5314_v38, %v4246_v39  ;;  %v4582_v26 = vld [vmem:[%s8268_s4 + $0x398] sm:$0xf0]  ;;  %v4313_v47 = vor.u32 %v5330_v34, %v4310_v40 }
  0xe8   : > { %2241 = vmatpush.bf16.msra.mxu0 %v4181_v52  ;;  %v4505_v52 = vor.u32 %v5378_v43, %v4502_v44  ;;  %v5394_v43 = vld [vmem:[%s8268_s4 + $0x36c] sm:$0xf]  ;;  %v4566_v44 = vld [vmem:[%s8268_s4 + $0x378] sm:$0xf0] }
  0xe9   : > { %2254 = vmatpush.bf16.msra.mxu1 %v4309_v53  ;;  %v5310_v53 = vld [vmem:[%s8268_s4 + $0xcc] sm:$0xf]  ;;  %v4262_v21 = vld [vmem:[%s8268_s4 + $0x118] sm:$0xf0] }
  0xea   : > { %2267 = vmatpush.bf16.msra.mxu2 %v4437_v54  ;;  %v4230_v54 = vld [vmem:[%s8268_s4 + $0xd8] sm:$0xf0] }
  0xeb   : > { %2280 = vmatpush.bf16.msra.mxu3 %v4565_v58  ;;  %v4486_v58 = vld [vmem:[%s8268_s4 + $0x2d8] sm:$0xf0]  ;;  %v4233_v36 = vor.u32 %v5310_v53, %v4230_v54  ;;  %v4569_v53 = vor.u32 %v5394_v43, %v4566_v44  ;;  %v4732_v44 = vld [vmem:[%s8270_s6 + $0xc0] sm:$0xf] }
  0xec   : > { %2242 = vmatpush.bf16.msra.mxu0 %v4165_v1  ;;  %v4489_v61 = vor.u32 %v5374_v25, %v4486_v58  ;;  %v5338_v1 = vld [vmem:[%s8268_s4 + $0x1ac] sm:$0xf]  ;;  %v4294_v54 = vld [vmem:[%s8268_s4 + $0x158] sm:$0xf0] }
  0xed   : > { %2255 = vmatpush.bf16.msra.mxu1 %v4293_v4  ;;  %v4342_v4 = vld [vmem:[%s8268_s4 + $0x1b8] sm:$0xf0]  ;;  %v5390_v58 = vld [vmem:[%s8268_s4 + $0x34c] sm:$0xf] }
  0xee   : > { %2268 = vmatpush.bf16.msra.mxu2 %v4421_v5  ;;  %v5370_v5 = vld [vmem:[%s8268_s4 + $0x2ac] sm:$0xf]  ;;  %v4345_v14 = vor.u32 %v5338_v1, %v4342_v4  ;;  %v4150_v1 = vld [vmem:[%s8268_s4 + $0x38] sm:$0xf0] }
  0xef   : > { %2281 = vmatpush.bf16.msra.mxu3 %v4549_v13  ;;  %v5302_v13 = vld [vmem:[%s8268_s4 + $0x8c] sm:$0xf]  ;;  %v4473_v16 = vor.u32 %v5370_v5, %v4470_v7  ;;  %v4553_v5 = vor.u32 %v5390_v58, %v4550_v59  ;;  %v4278_v7 = vld [vmem:[%s8268_s4 + $0x138] sm:$0xf0]  ;;  %v4844_v59 = vld [vmem:[%s8270_s6 + $0x1a0] sm:$0xf] }
  0xf0   : > { %2243 = vmatpush.bf16.msra.mxu0 %v4149_v20  ;;  %v4601_v20 = vor.u32 %v5402_v8, %v4598_v9  ;;  %v4201_v27 = vor.u32 %v5302_v13, %v4198_v17  ;;  %v5354_v8 = vld [vmem:[%s8268_s4 + $0x22c] sm:$0xf]  ;;  %v4406_v9 = vld [vmem:[%s8268_s4 + $0x238] sm:$0xf0] }
  0xf1   : > { %2256 = vmatpush.bf16.msra.mxu1 %v4277_v23  ;;  %v4454_v23 = vld [vmem:[%s8268_s4 + $0x298] sm:$0xf0] }
  0xf2   : > { %2269 = vmatpush.bf16.msra.mxu2 %v4405_v24  ;;  %v5398_v24 = vld [vmem:[%s8268_s4 + $0x38c] sm:$0xf]  ;;  %v4534_v13 = vld [vmem:[%s8268_s4 + $0x338] sm:$0xf0] }
  0xf3   : > { %2282 = vmatpush.bf16.msra.mxu3 %v4533_v31  ;;  %v4457_v31 = vor.u32 %v5366_v22, %v4454_v23  ;;  %v4585_v39 = vor.u32 %v5398_v24, %v4582_v26  ;;  %v4134_v17 = vld [vmem:[%s8268_s4 + $0x18] sm:$0xf0]  ;;  %v5350_v22 = vld [vmem:[%s8268_s4 + $0x20c] sm:$0xf] }
  0xf4   : > { %2244 = vmatpush.bf16.msra.mxu0 %v4133_v41  ;;  %v1260_v28 = vpop.f32.mrf.mxu0  ;;  %v5362_v41 = vld [vmem:[%s8268_s4 + $0x26c] sm:$0xf]  ;;  %v4390_v26 = vld [vmem:[%s8268_s4 + $0x218] sm:$0xf0] }
  0xf5   : > { %2257 = vmatpush.bf16.msra.mxu1 %v4261_v45  ;;  %v1261_v35 = vadd.f32 %v1260_v28, %v501_v19  ;;  %v1273_v38 = vpop.f32.mrf.mxu1  ;;  %v4441_v48 = vor.u32 %v5362_v41, %v4438_v42  ;;  %v4409_v19 = vor.u32 %v5354_v8, %v4406_v9  ;;  %v4518_v28 = vld [vmem:[%s8268_s4 + $0x318] sm:$0xf0]  ;;  %v4393_v41 = vor.u32 %v5350_v22, %v4390_v26  ;;  %v4812_v26 = vld [vmem:[%s8270_s6 + $0x160] sm:$0xf] }
  0xf6   : > { %2270 = vmatpush.bf16.msra.mxu2 %v4389_v46  ;;  %v4185_v46 = vor.u32 %v5298_v32, %v4182_v33  ;;  %v5443_v32 = vld [vmem:[%s8270_s6 + $0xec] sm:$0xf0]  ;;  %v4876_v33 = vld [vmem:[%s8270_s6 + $0x1e0] sm:$0xf] }
  0xf7   : > { %2283 = vmatpush.bf16.msra.mxu3 %v4517_v49  ;;  %2245 = vmatmul.bf16.vlgmr.msra.gmra.mxu0 %v6824_v11  ;;  %v1274_v45 = vadd.f32 %v1273_v38, %v1261_v35  ;;  %v5294_v49 = vld [vmem:[%s8268_s4 + $0x4c] sm:$0xf]  ;;  %v5475_v35 = vld [vmem:[%s8270_s6 + $0x1ec] sm:$0xf0]  ;;  %v5004_v38 = vld [vmem:[%s8270_s6 + $0x2e0] sm:$0xf] }
  0xf8   : > { %2289 = vmatpush.bf16.msrb.mxu0 %v4249_v50  ;;  %2258 = vmatmul.bf16.vlgmr.msra.gmra.mxu1 %v6834_v15  ;;  %v4166_v50 = vld [vmem:[%s8268_s4 + $0x58] sm:$0xf0] }
  0xf9   : > { %2302 = vmatpush.bf16.msrb.mxu1 %v4377_v51  ;;  %2271 = vmatmul.bf16.vlgmr.msra.gmra.mxu2 %v6813_v6  ;;  %v5326_v51 = vld [vmem:[%s8268_s4 + $0x14c] sm:$0xf]  ;;  %v4169_v29 = vor.u32 %v5294_v49, %v4166_v50  ;;  %v5132_v49 = vld [vmem:[%s8270_s6 + $0x3e0] sm:$0xf]  ;;  %v5539_v50 = vld [vmem:[%s8270_s6 + $0x3ec] sm:$0xf0] }
  0xfa   : > { %2315 = vmatpush.bf16.msrb.mxu2 %v4505_v52  ;;  %2284 = vmatmul.bf16.vlgmr.msra.gmra.mxu3 %v6826_v12 }
  0xfb   : > { %2328 = vmatpush.bf16.msrb.mxu3 %v4633_v56  ;;  %v4422_v56 = vld [vmem:[%s8268_s4 + $0x258] sm:$0xf0] }
  0xfc   : > { %2290 = vmatpush.bf16.msrb.mxu0 %v4233_v36  ;;  %v1286_v52 = vpop.f32.mrf.mxu2  ;;  %v4425_v63 = vor.u32 %v5358_v55, %v4422_v56  ;;  %v4716_v55 = vld [vmem:[%s8270_s6 + $0xa0] sm:$0xf]  ;;  %v5435_v56 = vld [vmem:[%s8270_s6 + $0xac] sm:$0xf0] }
  0xfd   : > { %2303 = vmatpush.bf16.msrb.mxu1 %v4361_v60  ;;  %v1287_v57 = vadd.f32 %v1286_v52, %v1274_v45  ;;  %v1299_v25 = vpop.f32.mrf.mxu3  ;;  %v1262_v60 = vpop.f32.mrf.mxu0  ;;  %v5439_v45 = vld [vmem:[%s8270_s6 + $0xcc] sm:$0xf0]  ;;  %v4988_v52 = vld [vmem:[%s8270_s6 + $0x2c0] sm:$0xf] }
  0xfe   : > { %2316 = vmatpush.bf16.msrb.mxu2 %v4489_v61  ;;  %v4297_v61 = vor.u32 %v5326_v51, %v4294_v54  ;;  %v1275_v4 = vpop.f32.mrf.mxu1  ;;  %v5471_v51 = vld [vmem:[%s8270_s6 + $0x1cc] sm:$0xf0]  ;;  %v4733_v54 = vor.u32 %v5439_v45, %v4732_v44  ;;  %v4796_v44 = vld [vmem:[%s8270_s6 + $0x140] sm:$0xf] }
  0xff   : > { %2329 = vmatpush.bf16.msrb.mxu3 %v4617_v3  ;;  %v7340_v36 = vadd.f32 %v1299_v25, %v1287_v57  ;;  %v5322_v3 = vld [vmem:[%s8268_s4 + $0x12c] sm:$0xf]  ;;  %v5133_v57 = vor.u32 %v5539_v50, %v5132_v49  ;;  %v5535_v60 = vld [vmem:[%s8270_s6 + $0x3cc] sm:$0xf0]  ;;  %v5068_v45 = vld [vmem:[%s8270_s6 + $0x360] sm:$0xf] }
 0x100   : > { %2291 = vmatpush.bf16.msrb.mxu0 %v4217_v10  ;;  %v5386_v10 = vld [vmem:[%s8268_s4 + $0x32c] sm:$0xf]  ;;  %v4281_v18 = vor.u32 %v5322_v3, %v4278_v7  ;;  %v4700_v3 = vld [vmem:[%s8270_s6 + $0x80] sm:$0xf]  ;;  %v5431_v4 = vld [vmem:[%s8270_s6 + $0x8c] sm:$0xf0] }
 0x101   : > { %2304 = vmatpush.bf16.msrb.mxu1 %v4345_v14  ;;  %v4153_v14 = vor.u32 %v5290_v0, %v4150_v1  ;;  %v4537_v24 = vor.u32 %v5386_v10, %v4534_v13  ;;  %v5499_v0 = vld [vmem:[%s8270_s6 + $0x2ac] sm:$0xf0]  ;;  %v4717_v1 = vor.u32 %v5435_v56, %v4716_v55  ;;  %v5100_v10 = vld [vmem:[%s8270_s6 + $0x3a0] sm:$0xf] }
 0x102   : > { %2317 = vmatpush.bf16.msrb.mxu2 %v4473_v16  ;;  %v5286_v16 = vld [vmem:[%s8268_s4 + $0xc] sm:$0xf]  ;;  %v5531_v13 = vld [vmem:[%s8270_s6 + $0x3ac] sm:$0xf0]  ;;  %v4924_v49 = vld [vmem:[%s8270_s6 + $0x240] sm:$0xf] }
 0x103   : > { %2330 = vmatpush.bf16.msrb.mxu3 %v4601_v20  ;;  %v5318_v20 = vld [vmem:[%s8268_s4 + $0x10c] sm:$0xf]  ;;  %v4137_v34 = vor.u32 %v5286_v16, %v4134_v17  ;;  %v5463_v16 = vld [vmem:[%s8270_s6 + $0x18c] sm:$0xf0]  ;;  %v4956_v17 = vld [vmem:[%s8270_s6 + $0x280] sm:$0xf] }
 0x104   : > { %2292 = vmatpush.bf16.msrb.mxu0 %v4201_v27  ;;  %v1288_v23 = vpop.f32.mrf.mxu2  ;;  %v5382_v27 = vld [vmem:[%s8268_s4 + $0x30c] sm:$0xf]  ;;  %v4265_v40 = vor.u32 %v5318_v20, %v4262_v21  ;;  %v4684_v20 = vld [vmem:[%s8270_s6 + $0x60] sm:$0xf]  ;;  %v5101_v21 = vor.u32 %v5531_v13, %v5100_v10  ;;  %v5487_v50 = vld [vmem:[%s8270_s6 + $0x24c] sm:$0xf0] }
 0x105   : > { %2305 = vmatpush.bf16.msrb.mxu1 %v4329_v30  ;;  %v1301_v30 = vpop.f32.mrf.mxu3  ;;  %v4521_v42 = vor.u32 %v5382_v27, %v4518_v28  ;;  %v5084_v27 = vld [vmem:[%s8270_s6 + $0x380] sm:$0xf]  ;;  %v5527_v28 = vld [vmem:[%s8270_s6 + $0x38c] sm:$0xf0] }
 0x106   : > { %2318 = vmatpush.bf16.msrb.mxu2 %v4457_v31  ;;  %v4748_v31 = vld [vmem:[%s8270_s6 + $0xe0] sm:$0xf]  ;;  %v5419_v55 = vld [vmem:[%s8270_s6 + $0x2c] sm:$0xf0] }
 0x107   : > { %2331 = vmatpush.bf16.msrb.mxu3 %v4585_v39  ;;  %v5507_v39 = vld [vmem:[%s8270_s6 + $0x2ec] sm:$0xf0]  ;;  %v4749_v43 = vor.u32 %v5443_v32, %v4748_v31 }
 0x108   : > { %2293 = vmatpush.bf16.msrb.mxu0 %v4185_v46  ;;  %v4877_v46 = vor.u32 %v5475_v35, %v4876_v33  ;;  %v5459_v32 = vld [vmem:[%s8270_s6 + $0x16c] sm:$0xf0]  ;;  %v4940_v33 = vld [vmem:[%s8270_s6 + $0x260] sm:$0xf] }
 0x109   : > { %2306 = vmatpush.bf16.msrb.mxu1 %v4313_v47  ;;  %v5005_v47 = vor.u32 %v5507_v39, %v5004_v38  ;;  %v4668_v39 = vld [vmem:[%s8270_s6 + $0x40] sm:$0xf] }
 0x10a   : > { %2319 = vmatpush.bf16.msrb.mxu2 %v4441_v48  ;;  %v4860_v48 = vld [vmem:[%s8270_s6 + $0x1c0] sm:$0xf] }
 0x10b   : > { %2332 = vmatpush.bf16.msrb.mxu3 %v4569_v53  ;;  %v5503_v53 = vld [vmem:[%s8270_s6 + $0x2cc] sm:$0xf0]  ;;  %v4861_v25 = vor.u32 %v5471_v51, %v4860_v48 }
 0x10c   : > { %2294 = vmatpush.bf16.msrb.mxu0 %v4169_v29  ;;  %v4989_v58 = vor.u32 %v5503_v53, %v4988_v52  ;;  %v5116_v29 = vld [vmem:[%s8270_s6 + $0x3c0] sm:$0xf]  ;;  %v5455_v48 = vld [vmem:[%s8270_s6 + $0x14c] sm:$0xf0] }
 0x10d   : > { %2307 = vmatpush.bf16.msrb.mxu1 %v4297_v61  ;;  %v5467_v61 = vld [vmem:[%s8270_s6 + $0x1ac] sm:$0xf0]  ;;  %v5117_v7 = vor.u32 %v5535_v60, %v5116_v29  ;;  %v4780_v29 = vld [vmem:[%s8270_s6 + $0x120] sm:$0xf] }
 0x10e   : > { %2320 = vmatpush.bf16.msrb.mxu2 %v4425_v63  ;;  %v4972_v63 = vld [vmem:[%s8270_s6 + $0x2a0] sm:$0xf]  ;;  %v4845_v8 = vor.u32 %v5467_v61, %v4844_v59  ;;  %v4925_v59 = vor.u32 %v5487_v50, %v4924_v49  ;;  %v5519_v61 = vld [vmem:[%s8270_s6 + $0x34c] sm:$0xf0] }
 0x10f   : > { %2333 = vmatpush.bf16.msrb.mxu3 %v4553_v5  ;;  %v4828_v5 = vld [vmem:[%s8270_s6 + $0x180] sm:$0xf]  ;;  %v4973_v9 = vor.u32 %v5499_v0, %v4972_v63  ;;  %v5451_v0 = vld [vmem:[%s8270_s6 + $0x12c] sm:$0xf0] }
 0x110   : > { %2295 = vmatpush.bf16.msrb.mxu0 %v4153_v14  ;;  %v502_v14 = vperm.slane %v6933_v62, 3  ;;  %v5427_v62 = vld [vmem:[%s8270_s6 + $0x6c] sm:$0xf0]  ;;  %v4829_v23 = vor.u32 %v5463_v16, %v4828_v5  ;;  %v5052_v60 = vld [vmem:[%s8270_s6 + $0x340] sm:$0xf]  ;;  %v4781_v10 = vor.u32 %v5451_v0, %v4780_v29 }
 0x111   : > { %2308 = vmatpush.bf16.msrb.mxu1 %v4281_v18  ;;  %v5495_v18 = vld [vmem:[%s8270_s6 + $0x28c] sm:$0xf0]  ;;  %v4685_v38 = vor.u32 %v5427_v62, %v4684_v20  ;;  %v4636_v5 = vld [vmem:[%s8270_s6] sm:$0xf]  ;;  %v5441_v62 = vld [vmem:[%s8270_s6 + $0xe4] sm:$0xf] }
 0x112   : > { %2321 = vmatpush.bf16.msrb.mxu2 %v4409_v19  ;;  %v4701_v19 = vor.u32 %v5431_v4, %v4700_v3  ;;  %v5483_v3 = vld [vmem:[%s8270_s6 + $0x22c] sm:$0xf0]  ;;  %v5036_v16 = vld [vmem:[%s8270_s6 + $0x320] sm:$0xf]  ;;  %v4974_v29 = vld [vmem:[%s8270_s6 + $0x2b0] sm:$0xf0] }
 0x113   : > { %2334 = vmatpush.bf16.msrb.mxu3 %v4537_v24  ;;  %v4957_v24 = vor.u32 %v5495_v18, %v4956_v17  ;;  %v5515_v17 = vld [vmem:[%s8270_s6 + $0x32c] sm:$0xf0] }
 0x114   : > { %2296 = vmatpush.bf16.msrb.mxu0 %v4137_v34  ;;  %v1312_v22 = vpop.f32.mrf.mxu0  ;;  %v5491_v34 = vld [vmem:[%s8270_s6 + $0x26c] sm:$0xf0] }
 0x115   : > { %2309 = vmatpush.bf16.msrb.mxu1 %v4265_v40  ;;  %v1313_v30 = vadd.f32 %v1312_v22, %v502_v14  ;;  %v1325_v31 = vpop.f32.mrf.mxu1  ;;  %v5423_v40 = vld [vmem:[%s8270_s6 + $0x4c] sm:$0xf0]  ;;  %v4750_v22 = vld [vmem:[%s8270_s6 + $0xf0] sm:$0xf0] }
 0x116   : > { %2322 = vmatpush.bf16.msrb.mxu2 %v4393_v41  ;;  %v5085_v41 = vor.u32 %v5527_v28, %v5084_v27  ;;  %v4669_v53 = vor.u32 %v5423_v40, %v4668_v39  ;;  %v5447_v14 = vld [vmem:[%s8270_s6 + $0x10c] sm:$0xf0]  ;;  %v5505_v27 = vld [vmem:[%s8270_s6 + $0x2e4] sm:$0xf]  ;;  %v5006_v28 = vld [vmem:[%s8270_s6 + $0x2f0] sm:$0xf0] }
 0x117   : > { %2335 = vmatpush.bf16.msrb.mxu3 %v4521_v42  ;;  %2297 = vmatmul.bf16.vlgmr.msrb.gmra.mxu0 %v6824_v11  ;;  %v1326_v35 = vadd.f32 %v1325_v31, %v1313_v30  ;;  %v4813_v42 = vor.u32 %v5459_v32, %v4812_v26  ;;  %v5479_v20 = vld [vmem:[%s8270_s6 + $0x20c] sm:$0xf0]  ;;  %v5037_v30 = vor.u32 %v5515_v17, %v5036_v16  ;;  %v5437_v39 = vld [vmem:[%s8270_s6 + $0xc4] sm:$0xf] }
 0x118   : > { %3119 = vmatpush.bf16.msra.mxu0 %v4749_v43  ;;  %2310 = vmatmul.bf16.vlgmr.msrb.gmra.mxu1 %v6834_v15  ;;  %v4941_v43 = vor.u32 %v5491_v34, %v4940_v33  ;;  %v5020_v33 = vld [vmem:[%s8270_s6 + $0x300] sm:$0xf]  ;;  %v5511_v34 = vld [vmem:[%s8270_s6 + $0x30c] sm:$0xf0]  ;;  %v5537_v40 = vld [vmem:[%s8270_s6 + $0x3e4] sm:$0xf] }
 0x119   : > { %3132 = vmatpush.bf16.msra.mxu1 %v4877_v46  ;;  %2323 = vmatmul.bf16.vlgmr.msrb.gmra.mxu2 %v6813_v6  ;;  %v5523_v46 = vld [vmem:[%s8270_s6 + $0x36c] sm:$0xf0] }
 0x11a   : > { %3145 = vmatpush.bf16.msra.mxu2 %v5005_v47  ;;  %2336 = vmatmul.bf16.vlgmr.msrb.gmra.mxu3 %v6826_v12  ;;  %v5069_v56 = vor.u32 %v5523_v46, %v5068_v45  ;;  %v4862_v45 = vld [vmem:[%s8270_s6 + $0x1d0] sm:$0xf0]  ;;  %v5501_v46 = vld [vmem:[%s8270_s6 + $0x2c4] sm:$0xf] }
 0x11b   : > { %3158 = vmatpush.bf16.msra.mxu3 %v5133_v57 }
 0x11c   : > { %3120 = vmatpush.bf16.msra.mxu0 %v4733_v54  ;;  %v1338_v47 = vpop.f32.mrf.mxu2  ;;  %v4652_v54 = vld [vmem:[%s8270_s6 + $0x20] sm:$0xf] }
 0x11d   : > { %3133 = vmatpush.bf16.msra.mxu1 %v4861_v25  ;;  %v1339_v51 = vadd.f32 %v1338_v47, %v1326_v35  ;;  %v1351_v52 = vpop.f32.mrf.mxu3  ;;  %v1314_v25 = vpop.f32.mrf.mxu0  ;;  %v4653_v4 = vor.u32 %v5419_v55, %v4652_v54  ;;  %v4753_v35 = vor.u32 %v5441_v62, %v4750_v22  ;;  %v4990_v47 = vld [vmem:[%s8270_s6 + $0x2d0] sm:$0xf0] }
 0x11e   : > { %3146 = vmatpush.bf16.msra.mxu2 %v4989_v58  ;;  %v4797_v58 = vor.u32 %v5455_v48, %v4796_v44  ;;  %v1327_v63 = vpop.f32.mrf.mxu1  ;;  %v5469_v44 = vld [vmem:[%s8270_s6 + $0x1c4] sm:$0xf]  ;;  %v5021_v48 = vor.u32 %v5511_v34, %v5020_v33  ;;  %v5118_v54 = vld [vmem:[%s8270_s6 + $0x3d0] sm:$0xf0]  ;;  %v4993_v55 = vor.u32 %v5501_v46, %v4990_v47 }
 0x11f   : > { %3159 = vmatpush.bf16.msra.mxu3 %v5117_v7  ;;  %v7539_v57 = vadd.f32 %v1351_v52, %v1339_v51  ;;  %v5415_v7 = vld [vmem:[%s8270_s6 + $0xc] sm:$0xf0]  ;;  %v4865_v51 = vor.u32 %v5469_v44, %v4862_v45  ;;  %v5433_v52 = vld [vmem:[%s8270_s6 + $0xa4] sm:$0xf]  ;;  %v5086_v62 = vld [vmem:[%s8270_s6 + $0x390] sm:$0xf0] }
 0x120   : > { %3121 = vmatpush.bf16.msra.mxu0 %v4717_v1  ;;  %v4908_v1 = vld [vmem:[%s8270_s6 + $0x220] sm:$0xf]  ;;  %v4637_v26 = vor.u32 %v5415_v7, %v4636_v5  ;;  %v5465_v25 = vld [vmem:[%s8270_s6 + $0x1a4] sm:$0xf]  ;;  %v5102_v5 = vld [vmem:[%s8270_s6 + $0x3b0] sm:$0xf0] }
 0x121   : > { %3134 = vmatpush.bf16.msra.mxu1 %v4845_v8  ;;  %v4764_v8 = vld [vmem:[%s8270_s6 + $0x100] sm:$0xf]  ;;  %v4909_v13 = vor.u32 %v5483_v3, %v4908_v1  ;;  %v4702_v3 = vld [vmem:[%s8270_s6 + $0x90] sm:$0xf0]  ;;  %v5485_v46 = vld [vmem:[%s8270_s6 + $0x244] sm:$0xf] }
 0x122   : > { %3147 = vmatpush.bf16.msra.mxu2 %v4973_v9  ;;  %v5053_v9 = vor.u32 %v5519_v61, %v5052_v60  ;;  %v4765_v31 = vor.u32 %v5447_v14, %v4764_v8  ;;  %v7660_v60 = vld [vmem:[%s8269_s5] sm:$0xf]  ;;  %v5429_v61 = vld [vmem:[%s8270_s6 + $0x84] sm:$0xf]  ;;  %v4958_v14 = vld [vmem:[%s8270_s6 + $0x290] sm:$0xf0] }
 0x123   : > { %3160 = vmatpush.bf16.msra.mxu3 %v5101_v21  ;;  %v5461_v8 = vld [vmem:[%s8270_s6 + $0x184] sm:$0xf]  ;;  %v4705_v17 = vor.u32 %v5429_v61, %v4702_v3  ;;  %v4798_v44 = vld [vmem:[%s8270_s6 + $0x150] sm:$0xf0] }
 0x124   : > { %3122 = vmatpush.bf16.msra.mxu0 %v4701_v19  ;;  %v1340_v18 = vpop.f32.mrf.mxu2  ;;  %v4892_v19 = vld [vmem:[%s8270_s6 + $0x200] sm:$0xf]  ;;  %v4926_v47 = vld [vmem:[%s8270_s6 + $0x250] sm:$0xf0]  ;;  %v5413_v3 = vld [vmem:[%s8270_s6 + $0x4] sm:$0xf] }
 0x125   : > { %3135 = vmatpush.bf16.msra.mxu1 %v4829_v23  ;;  %v1353_v21 = vpop.f32.mrf.mxu3  ;;  %v5473_v23 = vld [vmem:[%s8270_s6 + $0x1e4] sm:$0xf]  ;;  %v4893_v32 = vor.u32 %v5479_v20, %v4892_v19  ;;  %v4782_v61 = vld [vmem:[%s8270_s6 + $0x130] sm:$0xf0] }
 0x126   : > { %3148 = vmatpush.bf16.msra.mxu2 %v4957_v24  ;;  %v4878_v24 = vld [vmem:[%s8270_s6 + $0x1f0] sm:$0xf0]  ;;  %v5425_v19 = vld [vmem:[%s8270_s6 + $0x64] sm:$0xf] }
 0x127   : > { %3161 = vmatpush.bf16.msra.mxu3 %v5085_v41  ;;  %v5134_v41 = vld [vmem:[%s8270_s6 + $0x3f0] sm:$0xf0]  ;;  %v5525_v20 = vld [vmem:[%s8270_s6 + $0x384] sm:$0xf] }
 0x128   : > { %3123 = vmatpush.bf16.msra.mxu0 %v4685_v38  ;;  %v4881_v38 = vor.u32 %v5473_v23, %v4878_v24  ;;  %v5137_v49 = vor.u32 %v5537_v40, %v5134_v41  ;;  %v4686_v23 = vld [vmem:[%s8270_s6 + $0x70] sm:$0xf0]  ;;  %v5457_v24 = vld [vmem:[%s8270_s6 + $0x164] sm:$0xf] }
 0x129   : > { %3136 = vmatpush.bf16.msra.mxu1 %v4813_v42  ;;  %v5009_v42 = vor.u32 %v5505_v27, %v5006_v28  ;;  %v4689_v34 = vor.u32 %v5425_v19, %v4686_v23  ;;  %v5070_v40 = vld [vmem:[%s8270_s6 + $0x370] sm:$0xf0]  ;;  %v5476_v23 = vld [vmem:[%s8270_s6 + $0x1f4] sm:$0xf0] }
 0x12a   : > { %3149 = vmatpush.bf16.msra.mxu2 %v4941_v43  ;;  %v4734_v43 = vld [vmem:[%s8270_s6 + $0xd0] sm:$0xf0] }
 0x12b   : > { %3162 = vmatpush.bf16.msra.mxu3 %v5069_v56  ;;  %v4737_v50 = vor.u32 %v5437_v39, %v4734_v43  ;;  %v4718_v56 = vld [vmem:[%s8270_s6 + $0xb0] sm:$0xf0]  ;;  %v5521_v39 = vld [vmem:[%s8270_s6 + $0x364] sm:$0xf] }
 0x12c   : > { %3124 = vmatpush.bf16.msra.mxu0 %v4669_v53  ;;  %v5533_v53 = vld [vmem:[%s8270_s6 + $0x3c4] sm:$0xf]  ;;  %v4721_v0 = vor.u32 %v5433_v52, %v4718_v56 }
 0x12d   : > { %3137 = vmatpush.bf16.msra.mxu1 %v4797_v58  ;;  %v4846_v58 = vld [vmem:[%s8270_s6 + $0x1b0] sm:$0xf0]  ;;  %v5121_v63 = vor.u32 %v5533_v53, %v5118_v54  ;;  %v5453_v43 = vld [vmem:[%s8270_s6 + $0x144] sm:$0xf] }
 0x12e   : > { %3150 = vmatpush.bf16.msra.mxu2 %v4925_v59  ;;  %v5497_v59 = vld [vmem:[%s8270_s6 + $0x2a4] sm:$0xf]  ;;  %v4849_v1 = vor.u32 %v5465_v25, %v4846_v58  ;;  %v4801_v52 = vor.u32 %v5453_v43, %v4798_v44  ;;  %v4929_v58 = vor.u32 %v5485_v46, %v4926_v47  ;;  %v4868_v43 = vld [vmem:[%s8270_s6 + $0x1c8] sm:$0xf]  ;;  %v5472_v44 = vld [vmem:[%s8270_s6 + $0x1d4] sm:$0xf0] }
 0x12f   : > { %3163 = vmatpush.bf16.msra.mxu3 %v5053_v9  ;;  %v4977_v7 = vor.u32 %v5497_v59, %v4974_v29  ;;  %v4830_v9 = vld [vmem:[%s8270_s6 + $0x190] sm:$0xf0]  ;;  %v5417_v53 = vld [vmem:[%s8270_s6 + $0x24] sm:$0xf]  ;;  %v5504_v46 = vld [vmem:[%s8270_s6 + $0x2d4] sm:$0xf0] }
 0x130   : > { %3125 = vmatpush.bf16.msra.mxu0 %v4653_v4  ;;  %v5529_v4 = vld [vmem:[%s8270_s6 + $0x3a4] sm:$0xf]  ;;  %v4833_v18 = vor.u32 %v5461_v8, %v4830_v9  ;;  %v4654_v59 = vld [vmem:[%s8270_s6 + $0x30] sm:$0xf0] }
 0x131   : > { %3138 = vmatpush.bf16.msra.mxu1 %v4781_v10  ;;  %v1485_v10 = vperm.slane %v7660_v60, 0  ;;  %v5105_v16 = vor.u32 %v5529_v4, %v5102_v5  ;;  %v5517_v54 = vld [vmem:[%s8270_s6 + $0x344] sm:$0xf]  ;;  %v4638_v4 = vld [vmem:[%s8270_s6 + $0x10] sm:$0xf0] }
 0x132   : > { %3151 = vmatpush.bf16.msra.mxu2 %v4909_v13  ;;  %v5493_v13 = vld [vmem:[%s8270_s6 + $0x284] sm:$0xf] }
 0x133   : > { %3164 = vmatpush.bf16.msra.mxu3 %v5037_v30  ;;  %v4961_v22 = vor.u32 %v5493_v13, %v4958_v14  ;;  %v5489_v30 = vld [vmem:[%s8270_s6 + $0x264] sm:$0xf]  ;;  %v5038_v13 = vld [vmem:[%s8270_s6 + $0x330] sm:$0xf0] }
 0x134   : > { %3126 = vmatpush.bf16.msra.mxu0 %v4637_v26  ;;  %v2142_v21 = vpop.f32.mrf.mxu0  ;;  %v4814_v26 = vld [vmem:[%s8270_s6 + $0x170] sm:$0xf0]  ;;  %v5449_v29 = vld [vmem:[%s8270_s6 + $0x124] sm:$0xf] }
 0x135   : > { %3139 = vmatpush.bf16.msra.mxu1 %v4765_v31  ;;  %v2143_v27 = vadd.f32 %v2142_v21, %v1485_v10  ;;  %v2155_v28 = vpop.f32.mrf.mxu1  ;;  %v4942_v31 = vld [vmem:[%s8270_s6 + $0x270] sm:$0xf0]  ;;  %v4785_v8 = vor.u32 %v5449_v29, %v4782_v61  ;;  %v5445_v9 = vld [vmem:[%s8270_s6 + $0x104] sm:$0xf]  ;;  %v4884_v21 = vld [vmem:[%s8270_s6 + $0x1e8] sm:$0xf] }
 0x136   : > { %3152 = vmatpush.bf16.msra.mxu2 %v4893_v32  ;;  %v5089_v32 = vor.u32 %v5525_v20, %v5086_v62  ;;  %v4945_v41 = vor.u32 %v5489_v30, %v4942_v31  ;;  %v5513_v10 = vld [vmem:[%s8270_s6 + $0x324] sm:$0xf]  ;;  %v4756_v20 = vld [vmem:[%s8270_s6 + $0xe8] sm:$0xf]  ;;  %v5444_v62 = vld [vmem:[%s8270_s6 + $0xf4] sm:$0xf0] }
 0x137   : > { %3127 = vmatmul.bf16.vlgmr.msra.gmra.mxu0 %v6824_v11  ;;  %3165 = vmatpush.bf16.msra.mxu3 %v5021_v48  ;;  %v2156_v33 = vadd.f32 %v2155_v28, %v2143_v27  ;;  %v5041_v27 = vor.u32 %v5513_v10, %v5038_v13  ;;  %v4641_v28 = vor.u32 %v5413_v3, %v4638_v4  ;;  %v5509_v31 = vld [vmem:[%s8270_s6 + $0x304] sm:$0xf]  ;;  %v5500_v29 = vld [vmem:[%s8270_s6 + $0x2b4] sm:$0xf0]  ;;  %v4964_v10 = vld [vmem:[%s8270_s6 + $0x288] sm:$0xf] }
 0x138   : > { %3171 = vmatpush.bf16.msrb.mxu0 %v4753_v35  ;;  %3140 = vmatmul.bf16.vlgmr.msra.gmra.mxu1 %v6834_v15  ;;  %v4817_v35 = vor.u32 %v5457_v24, %v4814_v26  ;;  %v5012_v24 = vld [vmem:[%s8270_s6 + $0x2e8] sm:$0xf]  ;;  %v5508_v26 = vld [vmem:[%s8270_s6 + $0x2f4] sm:$0xf0] }
 0x139   : > { %3184 = vmatpush.bf16.msrb.mxu1 %v4881_v38  ;;  %3153 = vmatmul.bf16.vlgmr.msra.gmra.mxu2 %v6813_v6  ;;  %v5421_v38 = vld [vmem:[%s8270_s6 + $0x44] sm:$0xf]  ;;  %v5496_v13 = vld [vmem:[%s8270_s6 + $0x294] sm:$0xf0] }
 0x13a   : > { %3197 = vmatpush.bf16.msrb.mxu2 %v5009_v42  ;;  %3166 = vmatmul.bf16.vlgmr.msra.gmra.mxu3 %v6826_v12  ;;  %v4670_v42 = vld [vmem:[%s8270_s6 + $0x50] sm:$0xf0] }
 0x13b   : > { %3210 = vmatpush.bf16.msrb.mxu3 %v5137_v49 }
 0x13c   : > { %3172 = vmatpush.bf16.msrb.mxu0 %v4737_v50  ;;  %v2168_v45 = vpop.f32.mrf.mxu2  ;;  %v5073_v50 = vor.u32 %v5521_v39, %v5070_v40  ;;  %v2144_v25 = vpop.f32.mrf.mxu0  ;;  %v4885_v39 = vor.u32 %v5476_v23, %v4884_v21  ;;  %v5013_v40 = vor.u32 %v5508_v26, %v5012_v24  ;;  %v5428_v21 = vld [vmem:[%s8270_s6 + $0x74] sm:$0xf0]  ;;  %v4948_v26 = vld [vmem:[%s8270_s6 + $0x268] sm:$0xf] }
 0x13d   : > { %3185 = vmatpush.bf16.msrb.mxu1 %v4865_v51  ;;  %v2169_v48 = vadd.f32 %v2168_v45, %v2156_v33  ;;  %v2181_v49 = vpop.f32.mrf.mxu3  ;;  %v4673_v51 = vor.u32 %v5421_v38, %v4670_v42  ;;  %v5540_v38 = vld [vmem:[%s8270_s6 + $0x3f4] sm:$0xf0]  ;;  %v4996_v45 = vld [vmem:[%s8270_s6 + $0x2c8] sm:$0xf] }
 0x13e   : > { %3198 = vmatpush.bf16.msrb.mxu2 %v4993_v55  ;;  %v5054_v55 = vld [vmem:[%s8270_s6 + $0x350] sm:$0xf0]  ;;  %v5440_v42 = vld [vmem:[%s8270_s6 + $0xd4] sm:$0xf0]  ;;  %v4852_v25 = vld [vmem:[%s8270_s6 + $0x1a8] sm:$0xf] }
 0x13f   : > { %3211 = vmatpush.bf16.msrb.mxu3 %v5121_v63  ;;  %v7746_v56 = vadd.f32 %v2181_v49, %v2169_v48  ;;  %v2157_v63 = vpop.f32.mrf.mxu1  ;;  %v5057_v5 = vor.u32 %v5517_v54, %v5054_v55  ;;  %v4724_v54 = vld [vmem:[%s8270_s6 + $0xa8] sm:$0xf]  ;;  %v5436_v55 = vld [vmem:[%s8270_s6 + $0xb4] sm:$0xf0] }
 0x140   : > { %3173 = vmatpush.bf16.msrb.mxu0 %v4721_v0  ;;  %v5481_v0 = vld [vmem:[%s8270_s6 + $0x224] sm:$0xf]  ;;  %v4725_v63 = vor.u32 %v5436_v55, %v4724_v54  ;;  %v5460_v24 = vld [vmem:[%s8270_s6 + $0x174] sm:$0xf0]  ;;  %v4788_v54 = vld [vmem:[%s8270_s6 + $0x128] sm:$0xf] }
 0x141   : > { %3186 = vmatpush.bf16.msrb.mxu1 %v4849_v1  ;;  %v4910_v1 = vld [vmem:[%s8270_s6 + $0x230] sm:$0xf0] }
 0x142   : > { %3199 = vmatpush.bf16.msrb.mxu2 %v4977_v7  ;;  %v4657_v7 = vor.u32 %v5417_v53, %v4654_v59  ;;  %v4913_v14 = vor.u32 %v5481_v0, %v4910_v1  ;;  %v4997_v53 = vor.u32 %v5504_v46, %v4996_v45  ;;  %v4980_v59 = vld [vmem:[%s8270_s6 + $0x2a8] sm:$0xf]  ;;  %v5532_v1 = vld [vmem:[%s8270_s6 + $0x3b4] sm:$0xf0] }
 0x143   : > { %3212 = vmatpush.bf16.msrb.mxu3 %v5105_v16  ;;  %v4766_v16 = vld [vmem:[%s8270_s6 + $0x110] sm:$0xf0]  ;;  %v5108_v0 = vld [vmem:[%s8270_s6 + $0x3a8] sm:$0xf]  ;;  %v4981_v4 = vor.u32 %v5500_v29, %v4980_v59  ;;  %v5484_v59 = vld [vmem:[%s8270_s6 + $0x234] sm:$0xf0] }
 0x144   : > { %3174 = vmatpush.bf16.msrb.mxu0 %v4705_v17  ;;  %v5477_v17 = vld [vmem:[%s8270_s6 + $0x204] sm:$0xf]  ;;  %v2170_v19 = vpop.f32.mrf.mxu2  ;;  %v4769_v30 = vor.u32 %v5445_v9, %v4766_v16  ;;  %v5464_v9 = vld [vmem:[%s8270_s6 + $0x194] sm:$0xf0] }
 0x145   : > { %3187 = vmatpush.bf16.msrb.mxu1 %v4833_v18  ;;  %v4894_v18 = vld [vmem:[%s8270_s6 + $0x210] sm:$0xf0] }
 0x146   : > { %3200 = vmatpush.bf16.msrb.mxu2 %v4961_v22  ;;  %v2183_v22 = vpop.f32.mrf.mxu3  ;;  %v4897_v33 = vor.u32 %v5477_v17, %v4894_v18  ;;  %v5092_v17 = vld [vmem:[%s8270_s6 + $0x388] sm:$0xf]  ;;  %v5528_v18 = vld [vmem:[%s8270_s6 + $0x394] sm:$0xf0] }
 0x147   : > { %3213 = vmatpush.bf16.msrb.mxu3 %v5089_v32  ;;  %v5022_v32 = vld [vmem:[%s8270_s6 + $0x310] sm:$0xf0]  ;;  %v4820_v22 = vld [vmem:[%s8270_s6 + $0x168] sm:$0xf] }
 0x148   : > { %3175 = vmatpush.bf16.msrb.mxu0 %v4689_v34  ;;  %v4757_v34 = vor.u32 %v5444_v62, %v4756_v20  ;;  %v5025_v47 = vor.u32 %v5509_v31, %v5022_v32  ;;  %v4965_v20 = vor.u32 %v5496_v13, %v4964_v10  ;;  %v4692_v62 = vld [vmem:[%s8270_s6 + $0x68] sm:$0xf]  ;;  %v5480_v13 = vld [vmem:[%s8270_s6 + $0x214] sm:$0xf0] }
 0x149   : > { %3188 = vmatpush.bf16.msrb.mxu1 %v4817_v35  ;;  %v5140_v35 = vld [vmem:[%s8270_s6 + $0x3e8] sm:$0xf]  ;;  %v4693_v31 = vor.u32 %v5428_v21, %v4692_v62 }
 0x14a   : > { %3201 = vmatpush.bf16.msrb.mxu2 %v4945_v41  ;;  %v4740_v41 = vld [vmem:[%s8270_s6 + $0xc8] sm:$0xf]  ;;  %v5141_v48 = vor.u32 %v5540_v38, %v5140_v35 }
 0x14b   : > { %3214 = vmatpush.bf16.msrb.mxu3 %v5073_v50  ;;  %v4741_v49 = vor.u32 %v5440_v42, %v4740_v41  ;;  %v5124_v50 = vld [vmem:[%s8270_s6 + $0x3c8] sm:$0xf]  ;;  %v5456_v41 = vld [vmem:[%s8270_s6 + $0x154] sm:$0xf0] }
 0x14c   : > { %3176 = vmatpush.bf16.msrb.mxu0 %v4673_v51  ;;  %v5536_v51 = vld [vmem:[%s8270_s6 + $0x3d4] sm:$0xf0]  ;;  %v5076_v32 = vld [vmem:[%s8270_s6 + $0x368] sm:$0xf] }
 0x14d   : > { %3189 = vmatpush.bf16.msrb.mxu1 %v4801_v52  ;;  %v4869_v52 = vor.u32 %v5472_v44, %v4868_v43  ;;  %v5125_v61 = vor.u32 %v5536_v51, %v5124_v50  ;;  %v4676_v38 = vld [vmem:[%s8270_s6 + $0x48] sm:$0xf]  ;;  %v5488_v43 = vld [vmem:[%s8270_s6 + $0x254] sm:$0xf0] }
 0x14e   : > { %3202 = vmatpush.bf16.msrb.mxu2 %v4929_v58  ;;  %v5468_v58 = vld [vmem:[%s8270_s6 + $0x1b4] sm:$0xf0]  ;;  %v4932_v42 = vld [vmem:[%s8270_s6 + $0x248] sm:$0xf] }
 0x14f   : > { %3215 = vmatpush.bf16.msrb.mxu3 %v5057_v5  ;;  %v4853_v3 = vor.u32 %v5468_v58, %v4852_v25  ;;  %v4708_v5 = vld [vmem:[%s8270_s6 + $0x88] sm:$0xf]  ;;  %v4933_v51 = vor.u32 %v5488_v43, %v4932_v42  ;;  %v5452_v25 = vld [vmem:[%s8270_s6 + $0x134] sm:$0xf0]  ;;  %v4870_v42 = vld [vmem:[%s8270_s6 + $0x1d8] sm:$0xf0] }
 0x150   : > { %3177 = vmatpush.bf16.msrb.mxu0 %v4657_v7  ;;  %v5432_v7 = vld [vmem:[%s8270_s6 + $0x94] sm:$0xf0]  ;;  %v4916_v58 = vld [vmem:[%s8270_s6 + $0x228] sm:$0xf] }
 0x151   : > { %3190 = vmatpush.bf16.msrb.mxu1 %v4785_v8  ;;  %v4836_v8 = vld [vmem:[%s8270_s6 + $0x188] sm:$0xf]  ;;  %v4709_v16 = vor.u32 %v5432_v7, %v4708_v5  ;;  %v4789_v5 = vor.u32 %v5452_v25, %v4788_v54  ;;  %v4917_v7 = vor.u32 %v5484_v59, %v4916_v58  ;;  %v5466_v25 = vld [vmem:[%s8270_s6 + $0x1ac] sm:$0xf]  ;;  %v4854_v58 = vld [vmem:[%s8270_s6 + $0x1b8] sm:$0xf0] }
 0x152   : > { %3203 = vmatpush.bf16.msrb.mxu2 %v4913_v14  ;;  %v5109_v14 = vor.u32 %v5532_v1, %v5108_v0  ;;  %v4837_v19 = vor.u32 %v5464_v9, %v4836_v8  ;;  %v5416_v1 = vld [vmem:[%s8270_s6 + $0x14] sm:$0xf0]  ;;  %v4772_v8 = vld [vmem:[%s8270_s6 + $0x108] sm:$0xf]  ;;  %v5498_v59 = vld [vmem:[%s8270_s6 + $0x2ac] sm:$0xf] }
 0x153   : > { %3216 = vmatpush.bf16.msrb.mxu3 %v5041_v27  ;;  %v5492_v27 = vld [vmem:[%s8270_s6 + $0x274] sm:$0xf0]  ;;  %v4900_v10 = vld [vmem:[%s8270_s6 + $0x208] sm:$0xf] }
 0x154   : > { %3178 = vmatpush.bf16.msrb.mxu0 %v4641_v28  ;;  %v7902_v23 = vpop.f32.mrf.mxu0  ;;  %v4949_v35 = vor.u32 %v5492_v27, %v4948_v26  ;;  %v5448_v9 = vld [vmem:[%s8270_s6 + $0x114] sm:$0xf0]  ;;  %v5028_v26 = vld [vmem:[%s8270_s6 + $0x308] sm:$0xf] }
 0x155   : > { %3191 = vmatpush.bf16.msrb.mxu1 %v4769_v30  ;;  %v7913_v28 = vpop.f32.mrf.mxu1  ;;  %v5093_v30 = vor.u32 %v5528_v18, %v5092_v17  ;;  %v5474_v18 = vld [vmem:[%s8270_s6 + $0x1ec] sm:$0xf]  ;;  %v5512_v27 = vld [vmem:[%s8270_s6 + $0x314] sm:$0xf0] }
 0x156   : > { %3204 = vmatpush.bf16.msrb.mxu2 %v4897_v33  ;;  %v5524_v33 = vld [vmem:[%s8270_s6 + $0x374] sm:$0xf0]  ;;  %v5029_v43 = vor.u32 %v5512_v27, %v5028_v26  ;;  %v5458_v26 = vld [vmem:[%s8270_s6 + $0x16c] sm:$0xf]  ;;  %v4822_v27 = vld [vmem:[%s8270_s6 + $0x178] sm:$0xf0] }
 0x157   : > { %3217 = vmatpush.bf16.msrb.mxu3 %v5025_v47  ;;  %3179 = vmatmul.bf16.vlgmr.msrb.gmra.mxu0 %v6824_v11  ;;  %v5077_v45 = vor.u32 %v5524_v33, %v5076_v32  ;;  %v5538_v32 = vld [vmem:[%s8270_s6 + $0x3ec] sm:$0xf]  ;;  %v5142_v33 = vld [vmem:[%s8270_s6 + $0x3f8] sm:$0xf0] }
 0x158   : > { %3223 = vmatpush.bf16.msra.mxu0 %v4757_v34  ;;  %3192 = vmatmul.bf16.vlgmr.msrb.gmra.mxu1 %v6834_v15  ;;  %v4821_v34 = vor.u32 %v5460_v24, %v4820_v22  ;;  %v5014_v24 = vld [vmem:[%s8270_s6 + $0x2f8] sm:$0xf0] }
 0x159   : > { %3236 = vmatpush.bf16.msra.mxu1 %v4885_v39  ;;  %3205 = vmatmul.bf16.vlgmr.msrb.gmra.mxu2 %v6813_v6  ;;  %v5424_v39 = vld [vmem:[%s8270_s6 + $0x54] sm:$0xf0] }
 0x15a   : > { %3249 = vmatpush.bf16.msra.mxu2 %v5013_v40  ;;  %3218 = vmatmul.bf16.vlgmr.msrb.gmra.mxu3 %v6826_v12  ;;  %v4804_v40 = vld [vmem:[%s8270_s6 + $0x148] sm:$0xf]  ;;  %v4677_v47 = vor.u32 %v5424_v39, %v4676_v38  ;;  %v5438_v38 = vld [vmem:[%s8270_s6 + $0xcc] sm:$0xf] }
 0x15b   : > { %3262 = vmatpush.bf16.msra.mxu3 %v5141_v48  ;;  %v5060_v48 = vld [vmem:[%s8270_s6 + $0x348] sm:$0xf]  ;;  %v4805_v50 = vor.u32 %v5456_v41, %v4804_v40  ;;  %v4742_v40 = vld [vmem:[%s8270_s6 + $0xd8] sm:$0xf0]  ;;  %v5470_v41 = vld [vmem:[%s8270_s6 + $0x1cc] sm:$0xf] }
 0x15c   : > { %3224 = vmatpush.bf16.msra.mxu0 %v4741_v49  ;;  %v7939_v44 = vpop.f32.mrf.mxu2  ;;  %v5520_v49 = vld [vmem:[%s8270_s6 + $0x354] sm:$0xf0]  ;;  %v2196_v55 = vpop.f32.mrf.mxu0 }
 0x15d   : > { %3237 = vmatpush.bf16.msra.mxu1 %v4869_v52  ;;  %v7941_v46 = vpop.f32.mrf.mxu3  ;;  %v4660_v52 = vld [vmem:[%s8270_s6 + $0x28] sm:$0xf]  ;;  %v2209_v29 = vpop.f32.mrf.mxu1  ;;  %v4726_v55 = vld [vmem:[%s8270_s6 + $0xb8] sm:$0xf0] }
 0x15e   : > { %3250 = vmatpush.bf16.msra.mxu2 %v4997_v53  ;;  %v5420_v53 = vld [vmem:[%s8270_s6 + $0x34] sm:$0xf0]  ;;  %v4982_v29 = vld [vmem:[%s8270_s6 + $0x2b8] sm:$0xf0] }
 0x15f   : > { %3263 = vmatpush.bf16.msra.mxu3 %v5125_v61  ;;  %v4644_v61 = vld [vmem:[%s8270_s6 + $0x8] sm:$0xf]  ;;  %v4661_v0 = vor.u32 %v5420_v53, %v4660_v52  ;;  %v4873_v52 = vor.u32 %v5470_v41, %v4870_v42  ;;  %v5434_v53 = vld [vmem:[%s8270_s6 + $0xac] sm:$0xf]  ;;  %v4825_v42 = vor.u32 %v5458_v26, %v4822_v27 }
 0x160   : > { %3225 = vmatpush.bf16.msra.mxu0 %v4725_v63  ;;  %v5061_v63 = vor.u32 %v5520_v49, %v5060_v48  ;;  %v4645_v22 = vor.u32 %v5416_v1, %v4644_v61  ;;  %v5145_v48 = vor.u32 %v5538_v32, %v5142_v33  ;;  %v5534_v49 = vld [vmem:[%s8270_s6 + $0x3cc] sm:$0xf]  ;;  %v4729_v1 = vor.u32 %v5434_v53, %v4726_v55  ;;  %v4950_v32 = vld [vmem:[%s8270_s6 + $0x278] sm:$0xf0] }
 0x161   : > { %3238 = vmatpush.bf16.msra.mxu1 %v4853_v3  ;;  %v5044_v3 = vld [vmem:[%s8270_s6 + $0x328] sm:$0xf]  ;;  %v5518_v55 = vld [vmem:[%s8270_s6 + $0x34c] sm:$0xf] }
 0x162   : > { %3251 = vmatpush.bf16.msra.mxu2 %v4981_v4  ;;  %v5516_v4 = vld [vmem:[%s8270_s6 + $0x334] sm:$0xf0] }
 0x163   : > { %3264 = vmatpush.bf16.msra.mxu3 %v5109_v14  ;;  %v5442_v14 = vld [vmem:[%s8270_s6 + $0xec] sm:$0xf]  ;;  %v5045_v62 = vor.u32 %v5516_v4, %v5044_v3  ;;  %v4857_v3 = vor.u32 %v5466_v25, %v4854_v58  ;;  %v5062_v25 = vld [vmem:[%s8270_s6 + $0x358] sm:$0xf0] }
 0x164   : > { %3226 = vmatpush.bf16.msra.mxu0 %v4709_v16  ;;  %v4758_v16 = vld [vmem:[%s8270_s6 + $0xf8] sm:$0xf0]  ;;  %v2222_v17 = vpop.f32.mrf.mxu2  ;;  %v5430_v4 = vld [vmem:[%s8270_s6 + $0x8c] sm:$0xf] }
 0x165   : > { %3239 = vmatpush.bf16.msra.mxu1 %v4837_v19  ;;  %v4886_v19 = vld [vmem:[%s8270_s6 + $0x1f8] sm:$0xf0]  ;;  %v2235_v21 = vpop.f32.mrf.mxu3  ;;  %v5526_v17 = vld [vmem:[%s8270_s6 + $0x38c] sm:$0xf] }
 0x166   : > { %3252 = vmatpush.bf16.msra.mxu2 %v4965_v20  ;;  %v5506_v20 = vld [vmem:[%s8270_s6 + $0x2ec] sm:$0xf] }
 0x167   : > { %3265 = vmatpush.bf16.msra.mxu3 %v5093_v30  ;;  %v4773_v30 = vor.u32 %v5448_v9, %v4772_v8  ;;  %v5017_v39 = vor.u32 %v5506_v20, %v5014_v24  ;;  %v5462_v8 = vld [vmem:[%s8270_s6 + $0x18c] sm:$0xf]  ;;  %v4838_v9 = vld [vmem:[%s8270_s6 + $0x198] sm:$0xf0] }
 0x168   : > { %3227 = vmatpush.bf16.msra.mxu0 %v4693_v31  ;;  %v4901_v31 = vor.u32 %v5480_v13, %v4900_v10  ;;  %v5494_v10 = vld [vmem:[%s8270_s6 + $0x28c] sm:$0xf]  ;;  %v4966_v13 = vld [vmem:[%s8270_s6 + $0x298] sm:$0xf0] }
 0x169   : > { %3240 = vmatpush.bf16.msra.mxu1 %v4821_v34  ;;  %v4761_v34 = vor.u32 %v5442_v14, %v4758_v16  ;;  %v1487_v14 = vperm.slane %v7660_v60, 2  ;;  %v5426_v21 = vld [vmem:[%s8270_s6 + $0x6c] sm:$0xf]  ;;  %v4694_v24 = vld [vmem:[%s8270_s6 + $0x78] sm:$0xf0] }
 0x16a   : > { %3253 = vmatpush.bf16.msra.mxu2 %v4949_v35  ;;  %v4889_v35 = vor.u32 %v5474_v18, %v4886_v19  ;;  %v5094_v18 = vld [vmem:[%s8270_s6 + $0x398] sm:$0xf0]  ;;  %v1486_v19 = vperm.slane %v7660_v60, 1  ;;  %v4697_v41 = vor.u32 %v5426_v21, %v4694_v24 }
 0x16b   : > { %3266 = vmatpush.bf16.msra.mxu3 %v5077_v45  ;;  %v5502_v45 = vld [vmem:[%s8270_s6 + $0x2cc] sm:$0xf]  ;;  %v4902_v24 = vld [vmem:[%s8270_s6 + $0x218] sm:$0xf0] }
 0x16c   : > { %3228 = vmatpush.bf16.msra.mxu0 %v4677_v47  ;;  %v4998_v47 = vld [vmem:[%s8270_s6 + $0x2d8] sm:$0xf0] }
 0x16d   : > { %3241 = vmatpush.bf16.msra.mxu1 %v4805_v50  ;;  %v5126_v50 = vld [vmem:[%s8270_s6 + $0x3d8] sm:$0xf0]  ;;  %v5001_v54 = vor.u32 %v5502_v45, %v4998_v47 }
 0x16e   : > { %3254 = vmatpush.bf16.msra.mxu2 %v4933_v51  ;;  %v4745_v51 = vor.u32 %v5438_v38, %v4742_v40  ;;  %v5129_v61 = vor.u32 %v5534_v49, %v5126_v50  ;;  %v5522_v38 = vld [vmem:[%s8270_s6 + $0x36c] sm:$0xf]  ;;  %v2195_v40 = vadd.f32 %v7902_v23, %v1486_v19  ;;  %v4678_v47 = vld [vmem:[%s8270_s6 + $0x58] sm:$0xf0] }
 0x16f   : > { %3267 = vmatpush.bf16.msra.mxu3 %v5061_v63  ;;  %v5530_v63 = vld [vmem:[%s8270_s6 + $0x3ac] sm:$0xf]  ;;  %v4806_v23 = vld [vmem:[%s8270_s6 + $0x158] sm:$0xf0] }
 0x170   : > { %3229 = vmatpush.bf16.msra.mxu0 %v4661_v0  ;;  %v5110_v0 = vld [vmem:[%s8270_s6 + $0x3b8] sm:$0xf0]  ;;  %v5486_v50 = vld [vmem:[%s8270_s6 + $0x24c] sm:$0xf]  ;;  %v2208_v58 = vadd.f32 %v7913_v28, %v2195_v40  ;;  %v3331_v40 = vpack.c.bf16 %v7746_v56, %v7746_v56 }
 0x171   : > { %3242 = vmatpush.bf16.msra.mxu1 %v4789_v5  ;;  %v4985_v5 = vor.u32 %v5498_v59, %v4982_v29  ;;  %v5113_v16 = vor.u32 %v5530_v63, %v5110_v0  ;;  %v4662_v0 = vld [vmem:[%s8270_s6 + $0x38] sm:$0xf0] }
 0x172   : > { %3255 = vmatpush.bf16.msra.mxu2 %v4917_v7  ;;  %v4710_v7 = vld [vmem:[%s8270_s6 + $0x98] sm:$0xf0] }
 0x173   : > { %3268 = vmatpush.bf16.msra.mxu3 %v5045_v62  ;;  %v4713_v20 = vor.u32 %v5430_v4, %v4710_v7  ;;  %v4841_v62 = vor.u32 %v5462_v8, %v4838_v9  ;;  %v4790_v28 = vld [vmem:[%s8270_s6 + $0x138] sm:$0xf0]  ;;  %v5065_v9 = vor.u32 %v5518_v55, %v5062_v25 }
 0x174   : > { %3230 = vmatpush.bf16.msra.mxu0 %v4645_v22  ;;  %v4969_v22 = vor.u32 %v5494_v10, %v4966_v13  ;;  %v4918_v7 = vld [vmem:[%s8270_s6 + $0x238] sm:$0xf0]  ;;  %v5514_v10 = vld [vmem:[%s8270_s6 + $0x32c] sm:$0xf] }
 0x175   : > { %3243 = vmatpush.bf16.msra.mxu1 %v4773_v30  ;;  %v2246_v30 = vpop.f32.mrf.mxu0  ;;  %v5046_v13 = vld [vmem:[%s8270_s6 + $0x338] sm:$0xf0] }
 0x176   : > { %3256 = vmatpush.bf16.msra.mxu2 %v4901_v31  ;;  %v5490_v31 = vld [vmem:[%s8270_s6 + $0x26c] sm:$0xf]  ;;  %v2247_v33 = vadd.f32 %v2246_v30, %v1487_v14  ;;  %v2221_v14 = vadd.f32 %v7939_v44, %v2208_v58  ;;  %v4774_v44 = vld [vmem:[%s8270_s6 + $0x118] sm:$0xf0]  ;;  %v5049_v27 = vor.u32 %v5514_v10, %v5046_v13 }
 0x177   : > { %3269 = vmatpush.bf16.msra.mxu3 %v5029_v43  ;;  %3231 = vmatmul.bf16.vlgmr.msra.gmra.mxu0 %v6824_v11  ;;  %v5422_v43 = vld [vmem:[%s8270_s6 + $0x4c] sm:$0xf]  ;;  %v4953_v45 = vor.u32 %v5490_v31, %v4950_v32 }
 0x178   : > { %3275 = vmatpush.bf16.msrb.mxu0 %v4761_v34  ;;  %3244 = vmatmul.bf16.vlgmr.msra.gmra.mxu1 %v6834_v15  ;;  %v2259_v34 = vpop.f32.mrf.mxu1  ;;  %v4681_v59 = vor.u32 %v5422_v43, %v4678_v47  ;;  %v2234_v31 = vadd.f32 %v7941_v46, %v2221_v14 }
 0x179   : > { %3288 = vmatpush.bf16.msrb.mxu1 %v4889_v35  ;;  %3257 = vmatmul.bf16.vlgmr.msra.gmra.mxu2 %v6813_v6  ;;  %v5097_v35 = vor.u32 %v5526_v17, %v5094_v18  ;;  %v2260_v49 = vadd.f32 %v2259_v34, %v2247_v33  ;;  %v5414_v18 = vld [vmem:[%s8270_s6 + $0xc] sm:$0xf] }
 0x17a   : > { %3301 = vmatpush.bf16.msrb.mxu2 %v5017_v39  ;;  %3270 = vmatmul.bf16.vlgmr.msra.gmra.mxu3 %v6826_v12  ;;  %v5078_v39 = vld [vmem:[%s8270_s6 + $0x378] sm:$0xf0]  ;;  %v3332_v46 = vpack.c.bf16 %v2234_v31, %v2234_v31 }
 0x17b   : > { %3314 = vmatpush.bf16.msrb.mxu3 %v5145_v48  ;;  %v5454_v48 = vld [vmem:[%s8270_s6 + $0x14c] sm:$0xf]  ;;  %v5081_v53 = vor.u32 %v5522_v38, %v5078_v39  ;;  %v5030_v38 = vld [vmem:[%s8270_s6 + $0x318] sm:$0xf0] }
 0x17c   : > { %3276 = vmatpush.bf16.msrb.mxu0 %v4745_v51  ;;  %v4934_v51 = vld [vmem:[%s8270_s6 + $0x258] sm:$0xf0]  ;;  %v4809_v29 = vor.u32 %v5454_v48, %v4806_v23  ;;  %v3327_v48 = vpack.c.bf16 %v7032_v37, %v7032_v37  ;;  %v3328_v23 = vpack.c.bf16 %v7141_v2, %v7141_v2  ;;  %v3330_v37 = vpack.c.bf16 %v7539_v57, %v7539_v57  ;;  %v2469_v2 = vld [vmem:[%s8271_s7] sm:$0xf] }
 0x17d   : > { %3289 = vmatpush.bf16.msrb.mxu1 %v4873_v52  ;;  %v2272_v52 = vpop.f32.mrf.mxu2  ;;  %v4937_v63 = vor.u32 %v5486_v50, %v4934_v51 }
 0x17e   : > { %3302 = vmatpush.bf16.msrb.mxu2 %v5001_v54  ;;  %v2285_v54 = vpop.f32.mrf.mxu3  ;;  %v2273_v4 = vadd.f32 %v2272_v52, %v2260_v49 }
 0x17f   : > { %3315 = vmatpush.bf16.msrb.mxu3 %v5129_v61  ;;  %v5418_v61 = vld [vmem:[%s8270_s6 + $0x2c] sm:$0xf] }
 0x180   : > { %3277 = vmatpush.bf16.msrb.mxu0 %v4729_v1  ;;  %v5450_v1 = vld [vmem:[%s8270_s6 + $0x12c] sm:$0xf]  ;;  %v2261_v8 = vpop.f32.mrf.mxu1  ;;  %v2286_v21 = vadd.f32 %v2285_v54, %v2273_v4 }
 0x181   : > { %3290 = vmatpush.bf16.msrb.mxu1 %v4857_v3  ;;  %v2248_v3 = vpop.f32.mrf.mxu0  ;;  %v4793_v17 = vor.u32 %v5450_v1, %v4790_v28 }
 0x182   : > { %3303 = vmatpush.bf16.msrb.mxu2 %v4985_v5  ;;  %v5482_v5 = vld [vmem:[%s8270_s6 + $0x22c] sm:$0xf]  ;;  %v3333_v39 = vpack.c.bf16 %v2286_v21, %v2286_v21 }
 0x183   : > { %3316 = vmatpush.bf16.msrb.mxu3 %v5113_v16  ;;  %v4665_v16 = vor.u32 %v5418_v61, %v4662_v0  ;;  %v4921_v19 = vor.u32 %v5482_v5, %v4918_v7  ;;  %v2472_v5 = vperm.slane %v2469_v2, 1 }
 0x184   : > { %3278 = vmatpush.bf16.msrb.mxu0 %v4713_v20  ;;  %v4646_v20 = vld [vmem:[%s8270_s6 + $0x18] sm:$0xf0] }
 0x185   : > { %3291 = vmatpush.bf16.msrb.mxu1 %v4841_v62  ;;  %v5446_v62 = vld [vmem:[%s8270_s6 + $0x10c] sm:$0xf]  ;;  %v2274_v26 = vpop.f32.mrf.mxu2  ;;  %v4649_v32 = vor.u32 %v5414_v18, %v4646_v20 }
 0x186   : > { %3304 = vmatpush.bf16.msrb.mxu2 %v4969_v22  ;;  %v5478_v22 = vld [vmem:[%s8270_s6 + $0x20c] sm:$0xf]  ;;  %v2287_v30 = vpop.f32.mrf.mxu3  ;;  %v4777_v33 = vor.u32 %v5446_v62, %v4774_v44 }
 0x187   : > { %3317 = vmatpush.bf16.msrb.mxu3 %v5097_v35  ;;  %v4905_v34 = vor.u32 %v5478_v22, %v4902_v24  ;;  %v5510_v35 = vld [vmem:[%s8270_s6 + $0x30c] sm:$0xf]  ;;  %v2473_v22 = vperm.slane %v2469_v2, 2 }
 0x188   : > { %3279 = vmatpush.bf16.msrb.mxu0 %v4697_v41  ;;  %v5033_v41 = vor.u32 %v5510_v35, %v5030_v38 }
 0x189   : > { %3292 = vmatpush.bf16.msrb.mxu1 %v4825_v42  ;;  %v1488_v42 = vperm.slane %v7660_v60, 3 }
 0x18a   : > { %3305 = vmatpush.bf16.msrb.mxu2 %v4953_v45 }
 0x18b   : > { %3318 = vmatpush.bf16.msrb.mxu3 %v5081_v53 }
 0x18c   : > { %3280 = vmatpush.bf16.msrb.mxu0 %v4681_v59 }
 0x18d   : > { %3293 = vmatpush.bf16.msrb.mxu1 %v4809_v29 }
 0x18e   : > { %3306 = vmatpush.bf16.msrb.mxu2 %v4937_v63 }
 0x18f   : > { %3319 = vmatpush.bf16.msrb.mxu3 %v5065_v9 }
 0x190   : > { %3281 = vmatpush.bf16.msrb.mxu0 %v4665_v16 }
 0x191   : > { %3294 = vmatpush.bf16.msrb.mxu1 %v4793_v17 }
 0x192   : > { %3307 = vmatpush.bf16.msrb.mxu2 %v4921_v19 }
 0x193   : > { %3320 = vmatpush.bf16.msrb.mxu3 %v5049_v27 }
 0x194   : > { %3282 = vmatpush.bf16.msrb.mxu0 %v4649_v32  ;;  %v2298_v56 = vpop.f32.mrf.mxu0 }
 0x195   : > { %3295 = vmatpush.bf16.msrb.mxu1 %v4777_v33  ;;  %v2311_v43 = vpop.f32.mrf.mxu1  ;;  %v2299_v45 = vadd.f32 %v2298_v56, %v1488_v42  ;;  %v2474_v42 = vperm.slane %v2469_v2, 3 }
 0x196   : > { %3308 = vmatpush.bf16.msrb.mxu2 %v4905_v34 }
 0x197   : > { %3283 = vmatmul.bf16.vlgmr.msrb.gmra.mxu0 %v6824_v11  ;;  %3321 = vmatpush.bf16.msrb.mxu3 %v5033_v41  ;;  %v2312_v47 = vadd.f32 %v2311_v43, %v2299_v45 }
 0x198   : > { %3342 = vmatpush.bf16.xpose.msra.mxu0 %v3331_v40  ;;  %3296 = vmatmul.bf16.vlgmr.msrb.gmra.mxu1 %v6834_v15 }
 0x199   : > { %3355 = vmatpush.bf16.xpose.msra.mxu1 %v3332_v46  ;;  %3309 = vmatmul.bf16.vlgmr.msrb.gmra.mxu2 %v6813_v6  ;;  %v3329_v6 = vpack.c.bf16 %v7340_v36, %v7340_v36  ;;  %v2471_v36 = vperm.slane %v2469_v2, 0 }
 0x19a   : > { %3368 = vmatpush.bf16.xpose.msra.mxu2 %v3333_v39  ;;  %3322 = vmatmul.bf16.vlgmr.msrb.gmra.mxu3 %v6826_v12 }
 0x19c   : > { %v2324_v11 = vpop.f32.mrf.mxu2  ;;  %v2300_v50 = vpop.f32.mrf.mxu0 }
 0x19d   : > { %v2337_v49 = vpop.f32.mrf.mxu3  ;;  %v2325_v15 = vadd.f32 %v2324_v11, %v2312_v47  ;;  %v2313_v60 = vpop.f32.mrf.mxu1 }
 0x19f   : > { %v2338_v12 = vadd.f32 %v2337_v49, %v2325_v15 }
 0x1a1   : > { %v3334_v51 = vpack.c.bf16 %v2338_v12, %v2338_v12 }
 0x1a3   : > { %3381 = vmatpush.bf16.xpose.msra.mxu3 %v3334_v51 }
 0x1a4   : > { %v2326_v52 = vpop.f32.mrf.mxu2 }
 0x1a5   : > { %v2339_v53 = vpop.f32.mrf.mxu3 }
 0x1a7   : > { %3343 = vmatmul.bf16.vlgmr.msra.gmra.mxu0 %v3327_v48 }
 0x1a8   : > { %3356 = vmatmul.bf16.vlgmr.msra.gmra.mxu1 %v3328_v23 }
 0x1a9   : > { %3369 = vmatmul.bf16.vlgmr.msra.gmra.mxu2 %v3329_v6 }
 0x1aa   : > { %3382 = vmatmul.bf16.vlgmr.msra.gmra.mxu3 %v3330_v37 }
 0x1b4   : > { %v3128_v54 = vpop.f32.mrf.mxu0 }
 0x1b5   : > { %v3129_v55 = vadd.f32 %v3128_v54, %v2471_v36  ;;  %v3141_v25 = vpop.f32.mrf.mxu1 }
 0x1b7   : > { %v3142_v58 = vadd.f32 %v3141_v25, %v3129_v55 }
 0x1bc   : > { %v3154_v59 = vpop.f32.mrf.mxu2  ;;  %v3130_v29 = vpop.f32.mrf.mxu0 }
 0x1bd   : > { %v3155_v61 = vadd.f32 %v3154_v59, %v3142_v58  ;;  %v3143_v63 = vpop.f32.mrf.mxu1  ;;  %v3167_v0 = vpop.f32.mrf.mxu3 }
 0x1bf   : > { %v3168_v1 = vadd.f32 %v3167_v0, %v3155_v61 }
 0x1c1   : > { %v3414_v28 = vpack.c.bf16 %v3168_v1, %v3168_v1 }
 0x1c3   : > { %v3423_v57 = vsel %vm3421_vm0, %v3414_v28, 0 }
 0x1c4   : > { %v3156_v3 = vpop.f32.mrf.mxu2  ;;  %3441 = vmatpush.bf16.msrb.mxu0 %v3423_v57 }
 0x1c5   : > { %v3169_v4 = vpop.f32.mrf.mxu3 }
 0x1d4   : > { %v3180_v7 = vpop.f32.mrf.mxu0 }
 0x1d5   : > { %v3181_v8 = vadd.f32 %v3180_v7, %v2472_v5  ;;  %v3193_v9 = vpop.f32.mrf.mxu1 }
 0x1d7   : > { %v3194_v10 = vadd.f32 %v3193_v9, %v3181_v8 }
 0x1dc   : > { %v3206_v13 = vpop.f32.mrf.mxu2  ;;  %v3182_v14 = vpop.f32.mrf.mxu0 }
 0x1dd   : > { %v3207_v16 = vadd.f32 %v3206_v13, %v3194_v10  ;;  %v3195_v17 = vpop.f32.mrf.mxu1  ;;  %v3219_v18 = vpop.f32.mrf.mxu3 }
 0x1df   : > { %v3220_v19 = vadd.f32 %v3219_v18, %v3207_v16 }
 0x1e1   : > { %v3415_v20 = vpack.c.bf16 %v3220_v19, %v3220_v19 }
 0x1e3   : > { %v3426_v62 = vsel %vm3421_vm0, %v3415_v20, 0 }
 0x1e4   : > { %v3208_v44 = vpop.f32.mrf.mxu2  ;;  %3454 = vmatpush.bf16.msrb.mxu1 %v3426_v62 }
 0x1e5   : > { %v3221_v21 = vpop.f32.mrf.mxu3 }
 0x1f4   : > { %v3232_v24 = vpop.f32.mrf.mxu0 }
 0x1f5   : > { %v3233_v26 = vadd.f32 %v3232_v24, %v2473_v22  ;;  %v3245_v27 = vpop.f32.mrf.mxu1 }
 0x1f7   : > { %v3246_v30 = vadd.f32 %v3245_v27, %v3233_v26 }
 0x1fc   : > { %v3258_v31 = vpop.f32.mrf.mxu2  ;;  %v3234_v33 = vpop.f32.mrf.mxu0 }
 0x1fd   : > { %v3259_v32 = vadd.f32 %v3258_v31, %v3246_v30  ;;  %v3247_v34 = vpop.f32.mrf.mxu1  ;;  %v3271_v35 = vpop.f32.mrf.mxu3 }
 0x1ff   : > { %v3272_v38 = vadd.f32 %v3271_v35, %v3259_v32 }
 0x201   : > { %v3416_v39 = vpack.c.bf16 %v3272_v38, %v3272_v38 }
 0x203   : > { %v3429_v40 = vsel %vm3421_vm0, %v3416_v39, 0 }
 0x204   : > { %v3260_v46 = vpop.f32.mrf.mxu2  ;;  %3467 = vmatpush.bf16.msrb.mxu2 %v3429_v40 }
 0x205   : > { %v3273_v41 = vpop.f32.mrf.mxu3 }
 0x214   : > { %v3284_v56 = vpop.f32.mrf.mxu0 }
 0x215   : > { %v3297_v43 = vpop.f32.mrf.mxu1  ;;  %v3285_v45 = vadd.f32 %v3284_v56, %v2474_v42 }
 0x217   : > { %v3298_v47 = vadd.f32 %v3297_v43, %v3285_v45 }
 0x21c   : > { %v3310_v48 = vpop.f32.mrf.mxu2  ;;  %v3286_v11 = vpop.f32.mrf.mxu0 }
 0x21d   : > { %v3311_v23 = vadd.f32 %v3310_v48, %v3298_v47  ;;  %v3299_v49 = vpop.f32.mrf.mxu1  ;;  %v3323_v6 = vpop.f32.mrf.mxu3 }
 0x21f   : > { %v3324_v15 = vadd.f32 %v3323_v6, %v3311_v23 }
 0x221   : > { %v3417_v50 = vpack.c.bf16 %v3324_v15, %v3324_v15 }
 0x223   : > { %v3432_v12 = vsel %vm3421_vm0, %v3417_v50, 0 }
 0x224   : > { %v3312_v60 = vpop.f32.mrf.mxu2  ;;  %v3344_v51 = vpop.f32.mrf.mxu0  ;;  %3480 = vmatpush.bf16.msrb.mxu3 %v3432_v12 }
 0x225   : > { %v3357_v52 = vpop.f32.mrf.mxu1  ;;  %v3325_v53 = vpop.f32.mrf.mxu3 }
 0x226   : > { %v3358_v54 = vadd.f32 %v3357_v52, %v3344_v51 }
 0x22c   : > { %v3370_v37 = vpop.f32.mrf.mxu2  ;;  %v3346_v2 = vpop.f32.mrf.mxu0 }
 0x22d   : > { %v3359_v36 = vpop.f32.mrf.mxu1  ;;  %v3371_v25 = vadd.f32 %v3370_v37, %v3358_v54  ;;  %v3383_v58 = vpop.f32.mrf.mxu3 }
 0x22f   : > { %v3384_v59 = vadd.f32 %v3383_v58, %v3371_v25 }
 0x231   : > { %v3387_v29 = vmul.f32 0.044194173, %v3384_v59 }
 0x233   : > { %v3389_v61 = vsel %vm3388_vm1, %v3387_v29, -inf }
 0x234   : > { %v3372_v55 = vpop.f32.mrf.mxu2  ;;  %3390 = vmax.xlane.f32.xlu0 %v3389_v61 }
 0x235   : > { %v3385_v63 = vpop.f32.mrf.mxu3 }
 0x2a7   : > { %v3391_v0 = vpop.xlane.xlu0 %3390 }
 0x2a8   : > { %v3392_v1 = vsub.f32 %v3387_v29, %v3391_v0 }
 0x2aa   : > { %v3393_v28 = vmul.f32 1.442695, %v3392_v1 }
 0x2ac   : > { %5597 = vpow2.f32 %v3393_v28 }
 0x2b2   : > { %v5598_v57 = vpop.eup %5597 }
 0x2b3   : > { %v3395_v3 = vsel %vm3388_vm1, %v5598_v57, 0.0 }
 0x2b4   : > { %3396 = vadd.xlane.f32.xlu0 %v3395_v3 }
 0x327   : > { %v3397_v4 = vpop.xlane.xlu0 %3396 }
 0x328   : > { %5599 = vrcp.f32 %v3397_v4  ;;  %v3409_v9 = vand.u32 2147483648, %v3397_v4  ;;  %v3407_v13 = vand.u32 2147483647, %v3397_v4  ;;  %vm3403_vm3 = vweird.f32 %v3397_v4 }
 0x32a   : > { %v3410_v16 = vor.u32 1.1754944e-38, %v3409_v9  ;;  %vm3408_vm5 = vcmp.eq.f32.partialorder %v3407_v13, 8.507059e+37 }
 0x32e   : > { %v5600_v5 = vpop.eup %5599 }
 0x32f   : > { %v3399_v7 = vmul.f32 %v5600_v5, %v3397_v4  ;;  %vm3404_vm2 = vweird.f32 %v5600_v5 }
 0x330   : > { %vm3405_vm4 = vmor %vm3403_vm3, %vm3404_vm2 }
 0x331   : > { %v3400_v8 = vsub.f32 1.0, %v3399_v7 }
 0x333   : > { %v3401_v10 = vmul.f32 %v5600_v5, %v3400_v8 }
 0x335   : > { %v3402_v14 = vadd.f32 %v5600_v5, %v3401_v10 }
 0x337   : > { %v3406_v17 = vsel %vm3405_vm4, %v5600_v5, %v3402_v14 }
 0x338   : > { %v3411_v18 = vsel %vm3408_vm5, %v3410_v16, %v3406_v17 }
 0x339   : > { %v3412_v19 = vmul.f32 %v5598_v57, %v3411_v18 }
 0x33b   : > { %v3413_v20 = vpack.c.bf16 %v3412_v19, %v3412_v19 }
 0x33d   : > { %5146 = vmatmul.msk.bf16.vlgmr.msrb.gmra.mxu0 %vm3388_vm1, %v3413_v20  ;;  %5147 = vmatmul.msk.bf16.vlgmr.msrb.gmra.mxu1 %vm3388_vm1, %v3413_v20 }
 0x33e   : > { %5148 = vmatmul.msk.bf16.vlgmr.msrb.gmra.mxu2 %vm3388_vm1, %v3413_v20  ;;  %5149 = vmatmul.msk.bf16.vlgmr.msrb.gmra.mxu3 %vm3388_vm1, %v3413_v20 }
 0x3ba   : > { %v3443_v62 = vpop.f32.mrf.mxu0  ;;  %v3456_v44 = vpop.f32.mrf.mxu1 }
 0x3bb   : > { %3486 = vst [vmem:[%s337_s23] sm:$0xff] %v3443_v62 }
 0x3bc   : > { %3487 = vst [vmem:[%s337_s23 + $0x8] sm:$0xff] %v3456_v44 }
 0x3c1   : > { %v3469_v21 = vpop.f32.mrf.mxu2  ;;  %v3482_v22 = vpop.f32.mrf.mxu3 }
 0x3c2   : > { %3488 = vst [vmem:[%s337_s23 + $0x10] sm:$0xff] %v3469_v21  ;;  %v3445_v24 = vpop.f32.mrf.mxu0  ;;  %v3458_v26 = vpop.f32.mrf.mxu1 }
 0x3c3   : > { %3489 = vst [vmem:[%s337_s23 + $0x18] sm:$0xff] %v3482_v22 }
 0x3c4   : > { %5628 = shalt.err (!%p5625_p5)
}
 0x3c5   : > { %5542 = dma.vmem_to_hbm [thread:$0]  (%p5766_p4), %s3507_s25, 512, %s3509_s11, %s3491_s30  }
 0x3c9   : > { %v3471_v27 = vpop.f32.mrf.mxu2  ;;  %v3484_v30 = vpop.f32.mrf.mxu3 }
 0x3ca PF: > { %p5548_p6 = scmp.ge.s32.totalorder %s5679_s10, 2  ;;  %s3520_s19 = sand.u32 1, %s5659_s27  }
 0x3cb   : > { %s3521_s23 = scalar_lea.sflag [#allocation3], %s3520_s19 }
 0x3cc   : > { %p5545_p7 = pnand %p5548_p6, %p5773_p8 }
 0x3ce   : > { %p5546_p9 = pneg %p5545_p7 }
 0x3d0   : > { %5654 = dma.done.wait (%p5546_p9), %s3521_s23, 512  }
 0x3d1   : > { %5656 = vsyncadd (%p5546_p9), %s3521_s23, 4294966784  ;;  %s21_s10 = sadd.s32 1, %s5679_s10   ;;  %s8279_s15 = sld [smem:[#allocation5_spill]] }
 0x3d2   : > { %p18_p10 = scmp.ge.s32.totalorder %s21_s10, 4   ;;  %s8280_s27 = smov %s5663_s28 }
 0x3d3   : > { %s8281_s28 = smov %s5667_s29  ;;  %s8282_s29 = smov %s5779_s18 }
 0x3d4   : > { %s8283_s30 = smov %s5675_s9  ;;  %20 = sbr.rel (!%p18_p10) target bundleno = 4 (0x4), region = 90 }
 0x3d7   : > { %s8284_s9 = smov %s8279_s15 }
 0x3d9   :  { %3527 = vsyncpa [#allocation3], 1 }
 0x3da   :  { %3529 = vsyncpa [#allocation3 + $0x1], 1 }

</bundles_post_ra>
